<compile_context>
chip_gen: v7x
topology: tpu7x:2x2x1
jax: 0.10.0
libtpu: 0.0.40
codegen_flags: <defaults>
</compile_context>

<pallas_src>
import jax
import jax.numpy as jnp
from jax.experimental import pallas as pl
from jax.experimental.pallas import tpu as pltpu

# ----------------------------- configuration --------------------------------
INPUT_DIM = 16          # X_train.shape[1] (synthetic)
EMBED = 64              # embed_size
NUM_HEADS = 4           # nhead (irrelevant to the math when seq_len == 1)
NUM_ENC_LAYERS = 2      # num_layers passed to the module
NUM_DEC_LAYERS = 6      # PyTorch nn.Transformer default num_decoder_layers
FFN = 4 * EMBED         # dim_feedforward = embed_size * 4
LN_EPS = 1e-5           # nn.LayerNorm default eps
BATCH = 8
TB = 8                  # batch tile (second-to-last dim multiple of 8)
NUM_BLOCKS = NUM_ENC_LAYERS + NUM_DEC_LAYERS   # 8 stacked attn/FFN blocks


# --------------------- packed-bias row-index bookkeeping ----------------------
def _be_index():
    """Row indices into the single (R, EMBED) f32 bias/LN slab."""
    idx, c = {}, 0

    def nxt(name):
        nonlocal c
        idx[name] = c
        c += 1

    nxt("emb_b")
    for l in range(NUM_ENC_LAYERS):
        for nm in ("enc_ab", "enc_ln1w", "enc_ln1b", "enc_b2", "enc_ln2w", "enc_ln2b"):
            nxt(f"{nm}{l}")
    nxt("enc_nw"); nxt("enc_nb")
    for l in range(NUM_DEC_LAYERS):
        for nm in ("dec_sab", "dec_ln1w", "dec_ln1b", "dec_cab", "dec_ln2w",
                   "dec_ln2b", "dec_b2", "dec_ln3w", "dec_ln3b"):
            nxt(f"{nm}{l}")
    nxt("dec_nw"); nxt("dec_nb")
    return idx, c


BE_IDX, BE_ROWS = _be_index()   # 71 rows of (EMBED,)


# ------------------------------- kernel --------------------------------------
def _transformer_kernel(x_ref, w_attn, w_f1, w_f2, w_cross, w_emb, w_fc,
                        b_e, b_f, b_fc, out_ref):
    E = EMBED

    def mm(h, w):  # bf16 MXU matmul, f32 accumulation
        return jnp.dot(h.astype(jnp.bfloat16), w,
                       preferred_element_type=jnp.float32)

    def ln(h, wname, bname):  # f32 LayerNorm
        w = b_e[BE_IDX[wname]]
        b = b_e[BE_IDX[bname]]
        m = jnp.mean(h, axis=-1, keepdims=True)
        v = jnp.mean((h - m) ** 2, axis=-1, keepdims=True)
        return (h - m) * jax.lax.rsqrt(v + LN_EPS) * w + b

    x = x_ref[...]                                                   # (TB, D) f32

    # embedding (tiny weight, kept f32)
    emb = jnp.dot(x, w_emb[...], preferred_element_type=jnp.float32) \
        + b_e[BE_IDX["emb_b"]]                                       # (TB, E)

    # ---------------- encoder (post-norm, ReLU FFN) ----------------
    h = emb
    for l in range(NUM_ENC_LAYERS):
        a = mm(h, w_attn[l]) + b_e[BE_IDX[f"enc_ab{l}"]]             # folded Wv@Wo
        h = ln(h + a, f"enc_ln1w{l}", f"enc_ln1b{l}")
        f1 = jnp.maximum(mm(h, w_f1[l]) + b_f[l], 0.0)
        f2 = mm(f1, w_f2[l]) + b_e[BE_IDX[f"enc_b2{l}"]]
        h = ln(h + f2, f"enc_ln2w{l}", f"enc_ln2b{l}")
    mem = ln(h, "enc_nw", "enc_nb")                                  # encoder final norm

    # hoisted cross-attention for all decoder layers: one lane-dense matmul
    cross_all = mm(mem, w_cross[...])                                # (TB, Ld*E)

    # ---------------- decoder: tgt is the embedded input (transformer(x, x)) --
    t = emb
    for l in range(NUM_DEC_LAYERS):
        bi = NUM_ENC_LAYERS + l
        # masked self-attention over a length-1 seq (folded)
        a = mm(t, w_attn[bi]) + b_e[BE_IDX[f"dec_sab{l}"]]
        t = ln(t + a, f"dec_ln1w{l}", f"dec_ln1b{l}")
        # cross-attention with encoder memory (pre-computed, slice + bias)
        c = cross_all[:, l * E:(l + 1) * E] + b_e[BE_IDX[f"dec_cab{l}"]]
        t = ln(t + c, f"dec_ln2w{l}", f"dec_ln2b{l}")
        # feed-forward
        f1 = jnp.maximum(mm(t, w_f1[bi]) + b_f[bi], 0.0)
        f2 = mm(f1, w_f2[bi]) + b_e[BE_IDX[f"dec_b2{l}"]]
        t = ln(t + f2, f"dec_ln3w{l}", f"dec_ln3b{l}")
    t = ln(t, "dec_nw", "dec_nb")                                    # decoder final norm

    # mean over seq dim of length 1 is identity; final nn.Linear(E, 1)
    out_ref[...] = jnp.dot(t, w_fc[...], preferred_element_type=jnp.float32) + b_fc[...]


def _full_spec(shape):
    rank = len(shape)
    return pl.BlockSpec(shape, lambda i, _r=rank: (0,) * _r)


def transformer_regression(x, packed):
    B = x.shape[0]
    assert B % TB == 0
    in_specs = [pl.BlockSpec((TB, INPUT_DIM), lambda i: (i, 0))]
    in_specs += [_full_spec(p.shape) for p in packed]
    out_spec = pl.BlockSpec((TB, 1), lambda i: (i, 0))
    return pl.pallas_call(
        _transformer_kernel,
        out_shape=jax.ShapeDtypeStruct((B, 1), jnp.float32),
        grid_spec=pltpu.PrefetchScalarGridSpec(
            num_scalar_prefetch=0,
            grid=(B // TB,),
            in_specs=in_specs,
            out_specs=out_spec,
        ),
        compiler_params=pltpu.CompilerParams(
            dimension_semantics=("parallel",),
            vmem_limit_bytes=16 << 20,
        ),
    )(x, *packed)


# ---------------------------- parameter init ---------------------------------
def init_params(key):
    """Unfolded, PyTorch-layout-equivalent params (weights pre-transposed to (in, out))."""
    cnt = [0]

    def rnd(shape, scale=0.05):
        cnt[0] += 1
        return scale * jax.random.normal(jax.random.fold_in(key, cnt[0]),
                                         shape, jnp.float32)

    E, D, F = EMBED, INPUT_DIM, FFN
    Le, Ld = NUM_ENC_LAYERS, NUM_DEC_LAYERS
    ones = lambda s: jnp.ones(s, jnp.float32)
    zeros = lambda s: jnp.zeros(s, jnp.float32)

    return (
        # embedding: nn.Linear(input_dim, embed_size)
        rnd((D, E)), rnd((1, E)),
        # encoder layers (stacked along layer dim)
        rnd((Le, E, E)), rnd((Le, 1, E)),      # self-attn V proj (in_proj[2E:3E])
        rnd((Le, E, E)), rnd((Le, 1, E)),      # self-attn out_proj
        rnd((Le, E, F)), rnd((Le, 1, F)),      # ffn linear1
        rnd((Le, F, E)), rnd((Le, 1, E)),      # ffn linear2
        ones((Le, 1, E)), zeros((Le, 1, E)),   # norm1
        ones((Le, 1, E)), zeros((Le, 1, E)),   # norm2
        ones((1, E)), zeros((1, E)),           # encoder final LayerNorm
        # decoder layers (stacked along layer dim)
        rnd((Ld, E, E)), rnd((Ld, 1, E)),      # self-attn V proj
        rnd((Ld, E, E)), rnd((Ld, 1, E)),      # self-attn out_proj
        rnd((Ld, E, E)), rnd((Ld, 1, E)),      # cross-attn V proj
        rnd((Ld, E, E)), rnd((Ld, 1, E)),      # cross-attn out_proj
        rnd((Ld, E, F)), rnd((Ld, 1, F)),      # ffn linear1
        rnd((Ld, F, E)), rnd((Ld, 1, E)),      # ffn linear2
        ones((Ld, 1, E)), zeros((Ld, 1, E)),   # norm1
        ones((Ld, 1, E)), zeros((Ld, 1, E)),   # norm2
        ones((Ld, 1, E)), zeros((Ld, 1, E)),   # norm3
        ones((1, E)), zeros((1, E)),           # decoder final LayerNorm
        # fc_out: nn.Linear(embed_size, 1)
        rnd((E, 1)), rnd((1, 1)),
    )


# --------------------------- parameter packing --------------------------------
def pack_params(p):
    """Fold V/out_proj, concatenate cross-attn, stack layers, cast big weights to bf16,
    and pack all E/F-width biases & LN params into two f32 slabs."""
    (emb_w, emb_b,
     enc_wv, enc_bv, enc_wo, enc_bo, enc_w1, enc_b1, enc_w2, enc_b2,
     enc_ln1w, enc_ln1b, enc_ln2w, enc_ln2b, enc_nw, enc_nb,
     dec_swv, dec_sbv, dec_swo, dec_sbo, dec_cwv, dec_cbv, dec_cwo, dec_cbo,
     dec_w1, dec_b1, dec_w2, dec_b2,
     dec_ln1w, dec_ln1b, dec_ln2w, dec_ln2b, dec_ln3w, dec_ln3b,
     dec_nw, dec_nb, fc_w, fc_b) = p

    fold_w = lambda wv, wo: jnp.einsum('lij,ljk->lik', wv, wo)
    fold_b = lambda bv, wo, bo: jnp.einsum('lij,ljk->lik', bv, wo) + bo

    enc_aw = fold_w(enc_wv, enc_wo)                     # (Le,E,E)
    enc_ab = fold_b(enc_bv, enc_wo, enc_bo)             # (Le,1,E)
    dec_saw = fold_w(dec_swv, dec_swo)                  # (Ld,E,E)
    dec_sab = fold_b(dec_sbv, dec_swo, dec_sbo)         # (Ld,1,E)
    dec_caw = fold_w(dec_cwv, dec_cwo)                  # (Ld,E,E)
    dec_cab = fold_b(dec_cbv, dec_cwo, dec_cbo)         # (Ld,1,E)

    # bf16 matmul-weight slabs
    w_attn = jnp.concatenate([enc_aw, dec_saw], axis=0).astype(jnp.bfloat16)   # (8,E,E)
    w_f1 = jnp.concatenate([enc_w1, dec_w1], axis=0).astype(jnp.bfloat16)      # (8,E,F)
    w_f2 = jnp.concatenate([enc_w2, dec_w2], axis=0).astype(jnp.bfloat16)      # (8,F,E)
    w_cross = jnp.transpose(dec_caw, (1, 0, 2)).reshape(
        EMBED, NUM_DEC_LAYERS * EMBED).astype(jnp.bfloat16)                    # (E, Ld*E)

    # tiny weights stay f32 (negligible bytes)
    w_emb = emb_w                                                              # (D,E) f32
    w_fc = fc_w                                                                # (E,1) f32

    # E-width bias / LayerNorm slab (f32)
    rows = [None] * BE_ROWS
    rows[BE_IDX["emb_b"]] = emb_b
    for l in range(NUM_ENC_LAYERS):
        rows[BE_IDX[f"enc_ab{l}"]] = enc_ab[l]
        rows[BE_IDX[f"enc_ln1w{l}"]] = enc_ln1w[l]
        rows[BE_IDX[f"enc_ln1b{l}"]] = enc_ln1b[l]
        rows[BE_IDX[f"enc_b2{l}"]] = enc_b2[l]
        rows[BE_IDX[f"enc_ln2w{l}"]] = enc_ln2w[l]
        rows[BE_IDX[f"enc_ln2b{l}"]] = enc_ln2b[l]
    rows[BE_IDX["enc_nw"]] = enc_nw
    rows[BE_IDX["enc_nb"]] = enc_nb
    for l in range(NUM_DEC_LAYERS):
        rows[BE_IDX[f"dec_sab{l}"]] = dec_sab[l]
        rows[BE_IDX[f"dec_ln1w{l}"]] = dec_ln1w[l]
        rows[BE_IDX[f"dec_ln1b{l}"]] = dec_ln1b[l]
        rows[BE_IDX[f"dec_cab{l}"]] = dec_cab[l]
        rows[BE_IDX[f"dec_ln2w{l}"]] = dec_ln2w[l]
        rows[BE_IDX[f"dec_ln2b{l}"]] = dec_ln2b[l]
        rows[BE_IDX[f"dec_b2{l}"]] = dec_b2[l]
        rows[BE_IDX[f"dec_ln3w{l}"]] = dec_ln3w[l]
        rows[BE_IDX[f"dec_ln3b{l}"]] = dec_ln3b[l]
    rows[BE_IDX["dec_nw"]] = dec_nw
    rows[BE_IDX["dec_nb"]] = dec_nb
    b_e = jnp.concatenate(rows, axis=0)                                        # (71, E) f32

    # FFN-width bias slab (f32)
    b_f = jnp.concatenate([enc_b1, dec_b1], axis=0).reshape(NUM_BLOCKS, FFN)   # (8, F) f32

    b_fc = fc_b                                                                # (1,1) f32

    return (w_attn, w_f1, w_f2, w_cross, w_emb, w_fc, b_e, b_f, b_fc)


# ------------------------- pure-JAX f32 reference ------------------------------
def _reference_forward(x, p):
    (emb_w, emb_b,
     enc_wv, enc_bv, enc_wo, enc_bo, enc_w1, enc_b1, enc_w2, enc_b2,
     enc_ln1w, enc_ln1b, enc_ln2w, enc_ln2b, enc_nw, enc_nb,
     dec_swv, dec_sbv, dec_swo, dec_sbo, dec_cwv, dec_cbv, dec_cwo, dec_cbo,
     dec_w1, dec_b1, dec_w2, dec_b2,
     dec_ln1w, dec_ln1b, dec_ln2w, dec_ln2b, dec_ln3w, dec_ln3b,
     dec_nw, dec_nb, fc_w, fc_b) = p

    def linear(h, w, b):
        return h @ w + b

    def layernorm(h, w, b):
        m = jnp.mean(h, axis=-1, keepdims=True)
        v = jnp.mean((h - m) ** 2, axis=-1, keepdims=True)
        return (h - m) * jax.lax.rsqrt(v + LN_EPS) * w + b

    emb = linear(x, emb_w, emb_b)
    h = emb
    for l in range(NUM_ENC_LAYERS):
        a = linear(linear(h, enc_wv[l], enc_bv[l]), enc_wo[l], enc_bo[l])
        h = layernorm(h + a, enc_ln1w[l], enc_ln1b[l])
        f = linear(jnp.maximum(linear(h, enc_w1[l], enc_b1[l]), 0.0), enc_w2[l], enc_b2[l])
        h = layernorm(h + f, enc_ln2w[l], enc_ln2b[l])
    mem = layernorm(h, enc_nw, enc_nb)

    t = emb
    for l in range(NUM_DEC_LAYERS):
        a = linear(linear(t, dec_swv[l], dec_sbv[l]), dec_swo[l], dec_sbo[l])
        t = layernorm(t + a, dec_ln1w[l], dec_ln1b[l])
        a = linear(linear(mem, dec_cwv[l], dec_cbv[l]), dec_cwo[l], dec_cbo[l])
        t = layernorm(t + a, dec_ln2w[l], dec_ln2b[l])
        f = linear(jnp.maximum(linear(t, dec_w1[l], dec_b1[l]), 0.0), dec_w2[l], dec_b2[l])
        t = layernorm(t + f, dec_ln3w[l], dec_ln3b[l])
    t = layernorm(t, dec_nw, dec_nb)
    return linear(t, fc_w, fc_b)


# --------------------------------- main ---------------------------------------
if __name__ == "__main__":
    key = jax.random.PRNGKey(0)
    xkey, pkey = jax.random.split(key)
    x = jax.random.normal(xkey, (BATCH, INPUT_DIM), dtype=jnp.float32)
    params = init_params(pkey)
    packed = pack_params(params)

    y = transformer_regression(x, packed)
    y = jax.block_until_ready(y)

    assert y.shape == (BATCH, 1) and y.dtype == jnp.float32
    assert bool(jnp.all(jnp.isfinite(y)))

    # unfolded f32 pure-JAX reference validates folding + hoisting + bf16 weights
    y_ref = _reference_forward(x, params)
    max_diff = float(jnp.max(jnp.abs(y - y_ref)))
    assert max_diff < 5e-2, f"kernel vs reference mismatch: {max_diff}"

    print("KERNEL_OK")
</pallas_src>

<mosaic_0001>
module attributes {stable_mosaic.version = 11 : i64} {
  func.func @_transformer_kernel(%arg0: i32, %arg1: memref<8x16xf32, #tpu.memory_space<vmem>>, %arg2: memref<8x64x64xbf16, #tpu.memory_space<vmem>>, %arg3: memref<8x64x256xbf16, #tpu.memory_space<vmem>>, %arg4: memref<8x256x64xbf16, #tpu.memory_space<vmem>>, %arg5: memref<64x384xbf16, #tpu.memory_space<vmem>>, %arg6: memref<16x64xf32, #tpu.memory_space<vmem>>, %arg7: memref<64x1xf32, #tpu.memory_space<vmem>>, %arg8: memref<71x64xf32, #tpu.memory_space<vmem>>, %arg9: memref<8x256xf32, #tpu.memory_space<vmem>>, %arg10: memref<1x1xf32, #tpu.memory_space<vmem>>, %arg11: memref<8x1xf32, #tpu.memory_space<vmem>>) attributes {dimension_semantics = [#tpu.dimension_semantics<parallel>], iteration_bounds = array<i64: 1>, scalar_prefetch = 0 : i64, scratch_operands = 0 : i64, tpu.core_type = #tpu.core_type<tc>, window_params = [{transform_indices = @transform_0, window_bounds = array<i64: 8, 16>}, {pipeline_mode = #tpu.pipeline_mode<synchronous>, transform_indices = @transform_1, window_bounds = array<i64: 8, 64, 64>}, {pipeline_mode = #tpu.pipeline_mode<synchronous>, transform_indices = @transform_2, window_bounds = array<i64: 8, 64, 256>}, {pipeline_mode = #tpu.pipeline_mode<synchronous>, transform_indices = @transform_3, window_bounds = array<i64: 8, 256, 64>}, {pipeline_mode = #tpu.pipeline_mode<synchronous>, transform_indices = @transform_4, window_bounds = array<i64: 64, 384>}, {pipeline_mode = #tpu.pipeline_mode<synchronous>, transform_indices = @transform_5, window_bounds = array<i64: 16, 64>}, {pipeline_mode = #tpu.pipeline_mode<synchronous>, transform_indices = @transform_6, window_bounds = array<i64: 64, 1>}, {pipeline_mode = #tpu.pipeline_mode<synchronous>, transform_indices = @transform_7, window_bounds = array<i64: 71, 64>}, {pipeline_mode = #tpu.pipeline_mode<synchronous>, transform_indices = @transform_8, window_bounds = array<i64: 8, 256>}, {pipeline_mode = #tpu.pipeline_mode<synchronous>, transform_indices = @transform_9, window_bounds = array<i64: 1, 1>}, {transform_indices = @transform_10, window_bounds = array<i64: 8, 1>}]} {
    %c0 = arith.constant 0 : index
    %c0_0 = arith.constant 0 : index
    %0 = vector.load %arg1[%c0, %c0_0] : memref<8x16xf32, #tpu.memory_space<vmem>>, vector<8x16xf32>
    %c0_1 = arith.constant 0 : index
    %c0_2 = arith.constant 0 : index
    %1 = vector.load %arg6[%c0_1, %c0_2] : memref<16x64xf32, #tpu.memory_space<vmem>>, vector<16x64xf32>
    %cst = arith.constant dense<0.000000e+00> : vector<8x64xf32>
    %2 = tpu.matmul %0, %1, %cst {dimension_numbers = #tpu.dot_dimension_numbers<[1], [0], [0], [1], [0, 0, 1, 1], [], []>} : vector<8x16xf32>, vector<16x64xf32>, vector<8x64xf32> -> vector<8x64xf32>
    %c0_3 = arith.constant 0 : index
    %c0_4 = arith.constant 0 : index
    %3 = vector.load %arg8[%c0_3, %c0_4] : memref<71x64xf32, #tpu.memory_space<vmem>>, vector<1x64xf32>
    %4 = vector.shape_cast %3 : vector<1x64xf32> to vector<64xf32>
    %5 = vector.shape_cast %4 : vector<64xf32> to vector<1x64xf32>
    %6 = vector.broadcast %5 : vector<1x64xf32> to vector<8x64xf32>
    %7 = arith.addf %2, %6 : vector<8x64xf32>
    %c0_5 = arith.constant 0 : index
    %c0_6 = arith.constant 0 : index
    %c0_7 = arith.constant 0 : index
    %8 = vector.load %arg2[%c0_5, %c0_6, %c0_7] : memref<8x64x64xbf16, #tpu.memory_space<vmem>>, vector<1x64x64xbf16>
    %9 = vector.shape_cast %8 : vector<1x64x64xbf16> to vector<64x64xbf16>
    %10 = arith.truncf %7 : vector<8x64xf32> to vector<8x64xbf16>
    %cst_8 = arith.constant dense<0.000000e+00> : vector<8x64xf32>
    %11 = tpu.matmul %10, %9, %cst_8 {dimension_numbers = #tpu.dot_dimension_numbers<[1], [0], [0], [1], [0, 0, 1, 1], [], []>} : vector<8x64xbf16>, vector<64x64xbf16>, vector<8x64xf32> -> vector<8x64xf32>
    %c1 = arith.constant 1 : index
    %c0_9 = arith.constant 0 : index
    %12 = vector.load %arg8[%c1, %c0_9] : memref<71x64xf32, #tpu.memory_space<vmem>>, vector<1x64xf32>
    %13 = vector.shape_cast %12 : vector<1x64xf32> to vector<64xf32>
    %14 = vector.shape_cast %13 : vector<64xf32> to vector<1x64xf32>
    %15 = vector.broadcast %14 : vector<1x64xf32> to vector<8x64xf32>
    %16 = arith.addf %11, %15 : vector<8x64xf32>
    %17 = arith.addf %7, %16 : vector<8x64xf32>
    %c2 = arith.constant 2 : index
    %c0_10 = arith.constant 0 : index
    %18 = vector.load %arg8[%c2, %c0_10] : memref<71x64xf32, #tpu.memory_space<vmem>>, vector<1x64xf32>
    %19 = vector.shape_cast %18 : vector<1x64xf32> to vector<64xf32>
    %c3 = arith.constant 3 : index
    %c0_11 = arith.constant 0 : index
    %20 = vector.load %arg8[%c3, %c0_11] : memref<71x64xf32, #tpu.memory_space<vmem>>, vector<1x64xf32>
    %21 = vector.shape_cast %20 : vector<1x64xf32> to vector<64xf32>
    %cst_12 = arith.constant dense<0.000000e+00> : vector<8xf32>
    %22 = vector.multi_reduction <add>, %17, %cst_12 [1] : vector<8x64xf32> to vector<8xf32>
    %23 = vector.shape_cast %22 : vector<8xf32> to vector<8x1xf32>
    %cst_13 = arith.constant 6.400000e+01 : f32
    %24 = vector.broadcast %cst_13 : f32 to vector<8x1xf32>
    %25 = arith.divf %23, %24 : vector<8x1xf32>
    %26 = vector.broadcast %25 : vector<8x1xf32> to vector<8x64xf32>
    %27 = arith.subf %17, %26 : vector<8x64xf32>
    %28 = arith.mulf %27, %27 : vector<8x64xf32>
    %cst_14 = arith.constant dense<0.000000e+00> : vector<8xf32>
    %29 = vector.multi_reduction <add>, %28, %cst_14 [1] : vector<8x64xf32> to vector<8xf32>
    %30 = vector.shape_cast %29 : vector<8xf32> to vector<8x1xf32>
    %cst_15 = arith.constant 6.400000e+01 : f32
    %31 = vector.broadcast %cst_15 : f32 to vector<8x1xf32>
    %32 = arith.divf %30, %31 : vector<8x1xf32>
    %33 = vector.broadcast %25 : vector<8x1xf32> to vector<8x64xf32>
    %34 = arith.subf %17, %33 : vector<8x64xf32>
    %cst_16 = arith.constant 9.99999974E-6 : f32
    %35 = vector.broadcast %cst_16 : f32 to vector<8x1xf32>
    %36 = arith.addf %32, %35 : vector<8x1xf32>
    %37 = math.rsqrt %36 : vector<8x1xf32>
    %38 = vector.broadcast %37 : vector<8x1xf32> to vector<8x64xf32>
    %39 = arith.mulf %34, %38 : vector<8x64xf32>
    %40 = vector.shape_cast %19 : vector<64xf32> to vector<1x64xf32>
    %41 = vector.broadcast %40 : vector<1x64xf32> to vector<8x64xf32>
    %42 = arith.mulf %39, %41 : vector<8x64xf32>
    %43 = vector.shape_cast %21 : vector<64xf32> to vector<1x64xf32>
    %44 = vector.broadcast %43 : vector<1x64xf32> to vector<8x64xf32>
    %45 = arith.addf %42, %44 : vector<8x64xf32>
    %c0_17 = arith.constant 0 : index
    %c0_18 = arith.constant 0 : index
    %c0_19 = arith.constant 0 : index
    %46 = vector.load %arg3[%c0_17, %c0_18, %c0_19] : memref<8x64x256xbf16, #tpu.memory_space<vmem>>, vector<1x64x256xbf16>
    %47 = vector.shape_cast %46 : vector<1x64x256xbf16> to vector<64x256xbf16>
    %48 = arith.truncf %45 : vector<8x64xf32> to vector<8x64xbf16>
    %cst_20 = arith.constant dense<0.000000e+00> : vector<8x256xf32>
    %49 = tpu.matmul %48, %47, %cst_20 {dimension_numbers = #tpu.dot_dimension_numbers<[1], [0], [0], [1], [0, 0, 1, 1], [], []>} : vector<8x64xbf16>, vector<64x256xbf16>, vector<8x256xf32> -> vector<8x256xf32>
    %c0_21 = arith.constant 0 : index
    %c0_22 = arith.constant 0 : index
    %50 = vector.load %arg9[%c0_21, %c0_22] : memref<8x256xf32, #tpu.memory_space<vmem>>, vector<1x256xf32>
    %51 = vector.shape_cast %50 : vector<1x256xf32> to vector<256xf32>
    %52 = vector.shape_cast %51 : vector<256xf32> to vector<1x256xf32>
    %53 = vector.broadcast %52 : vector<1x256xf32> to vector<8x256xf32>
    %54 = arith.addf %49, %53 : vector<8x256xf32>
    %cst_23 = arith.constant 0.000000e+00 : f32
    %55 = vector.broadcast %cst_23 : f32 to vector<8x256xf32>
    %56 = arith.maximumf %54, %55 : vector<8x256xf32>
    %c0_24 = arith.constant 0 : index
    %c0_25 = arith.constant 0 : index
    %c0_26 = arith.constant 0 : index
    %57 = vector.load %arg4[%c0_24, %c0_25, %c0_26] : memref<8x256x64xbf16, #tpu.memory_space<vmem>>, vector<1x256x64xbf16>
    %58 = vector.shape_cast %57 : vector<1x256x64xbf16> to vector<256x64xbf16>
    %59 = arith.truncf %56 : vector<8x256xf32> to vector<8x256xbf16>
    %cst_27 = arith.constant dense<0.000000e+00> : vector<8x64xf32>
    %60 = tpu.matmul %59, %58, %cst_27 {dimension_numbers = #tpu.dot_dimension_numbers<[1], [0], [0], [1], [0, 0, 1, 1], [], []>} : vector<8x256xbf16>, vector<256x64xbf16>, vector<8x64xf32> -> vector<8x64xf32>
    %c4 = arith.constant 4 : index
    %c0_28 = arith.constant 0 : index
    %61 = vector.load %arg8[%c4, %c0_28] : memref<71x64xf32, #tpu.memory_space<vmem>>, vector<1x64xf32>
    %62 = vector.shape_cast %61 : vector<1x64xf32> to vector<64xf32>
    %63 = vector.shape_cast %62 : vector<64xf32> to vector<1x64xf32>
    %64 = vector.broadcast %63 : vector<1x64xf32> to vector<8x64xf32>
    %65 = arith.addf %60, %64 : vector<8x64xf32>
    %66 = arith.addf %45, %65 : vector<8x64xf32>
    %c5 = arith.constant 5 : index
    %c0_29 = arith.constant 0 : index
    %67 = vector.load %arg8[%c5, %c0_29] : memref<71x64xf32, #tpu.memory_space<vmem>>, vector<1x64xf32>
    %68 = vector.shape_cast %67 : vector<1x64xf32> to vector<64xf32>
    %c6 = arith.constant 6 : index
    %c0_30 = arith.constant 0 : index
    %69 = vector.load %arg8[%c6, %c0_30] : memref<71x64xf32, #tpu.memory_space<vmem>>, vector<1x64xf32>
    %70 = vector.shape_cast %69 : vector<1x64xf32> to vector<64xf32>
    %cst_31 = arith.constant dense<0.000000e+00> : vector<8xf32>
    %71 = vector.multi_reduction <add>, %66, %cst_31 [1] : vector<8x64xf32> to vector<8xf32>
    %72 = vector.shape_cast %71 : vector<8xf32> to vector<8x1xf32>
    %cst_32 = arith.constant 6.400000e+01 : f32
    %73 = vector.broadcast %cst_32 : f32 to vector<8x1xf32>
    %74 = arith.divf %72, %73 : vector<8x1xf32>
    %75 = vector.broadcast %74 : vector<8x1xf32> to vector<8x64xf32>
    %76 = arith.subf %66, %75 : vector<8x64xf32>
    %77 = arith.mulf %76, %76 : vector<8x64xf32>
    %cst_33 = arith.constant dense<0.000000e+00> : vector<8xf32>
    %78 = vector.multi_reduction <add>, %77, %cst_33 [1] : vector<8x64xf32> to vector<8xf32>
    %79 = vector.shape_cast %78 : vector<8xf32> to vector<8x1xf32>
    %cst_34 = arith.constant 6.400000e+01 : f32
    %80 = vector.broadcast %cst_34 : f32 to vector<8x1xf32>
    %81 = arith.divf %79, %80 : vector<8x1xf32>
    %82 = vector.broadcast %74 : vector<8x1xf32> to vector<8x64xf32>
    %83 = arith.subf %66, %82 : vector<8x64xf32>
    %cst_35 = arith.constant 9.99999974E-6 : f32
    %84 = vector.broadcast %cst_35 : f32 to vector<8x1xf32>
    %85 = arith.addf %81, %84 : vector<8x1xf32>
    %86 = math.rsqrt %85 : vector<8x1xf32>
    %87 = vector.broadcast %86 : vector<8x1xf32> to vector<8x64xf32>
    %88 = arith.mulf %83, %87 : vector<8x64xf32>
    %89 = vector.shape_cast %68 : vector<64xf32> to vector<1x64xf32>
    %90 = vector.broadcast %89 : vector<1x64xf32> to vector<8x64xf32>
    %91 = arith.mulf %88, %90 : vector<8x64xf32>
    %92 = vector.shape_cast %70 : vector<64xf32> to vector<1x64xf32>
    %93 = vector.broadcast %92 : vector<1x64xf32> to vector<8x64xf32>
    %94 = arith.addf %91, %93 : vector<8x64xf32>
    %c1_36 = arith.constant 1 : index
    %c0_37 = arith.constant 0 : index
    %c0_38 = arith.constant 0 : index
    %95 = vector.load %arg2[%c1_36, %c0_37, %c0_38] : memref<8x64x64xbf16, #tpu.memory_space<vmem>>, vector<1x64x64xbf16>
    %96 = vector.shape_cast %95 : vector<1x64x64xbf16> to vector<64x64xbf16>
    %97 = arith.truncf %94 : vector<8x64xf32> to vector<8x64xbf16>
    %cst_39 = arith.constant dense<0.000000e+00> : vector<8x64xf32>
    %98 = tpu.matmul %97, %96, %cst_39 {dimension_numbers = #tpu.dot_dimension_numbers<[1], [0], [0], [1], [0, 0, 1, 1], [], []>} : vector<8x64xbf16>, vector<64x64xbf16>, vector<8x64xf32> -> vector<8x64xf32>
    %c7 = arith.constant 7 : index
    %c0_40 = arith.constant 0 : index
    %99 = vector.load %arg8[%c7, %c0_40] : memref<71x64xf32, #tpu.memory_space<vmem>>, vector<1x64xf32>
    %100 = vector.shape_cast %99 : vector<1x64xf32> to vector<64xf32>
    %101 = vector.shape_cast %100 : vector<64xf32> to vector<1x64xf32>
    %102 = vector.broadcast %101 : vector<1x64xf32> to vector<8x64xf32>
    %103 = arith.addf %98, %102 : vector<8x64xf32>
    %104 = arith.addf %94, %103 : vector<8x64xf32>
    %c8 = arith.constant 8 : index
    %c0_41 = arith.constant 0 : index
    %105 = vector.load %arg8[%c8, %c0_41] : memref<71x64xf32, #tpu.memory_space<vmem>>, vector<1x64xf32>
    %106 = vector.shape_cast %105 : vector<1x64xf32> to vector<64xf32>
    %c9 = arith.constant 9 : index
    %c0_42 = arith.constant 0 : index
    %107 = vector.load %arg8[%c9, %c0_42] : memref<71x64xf32, #tpu.memory_space<vmem>>, vector<1x64xf32>
    %108 = vector.shape_cast %107 : vector<1x64xf32> to vector<64xf32>
    %cst_43 = arith.constant dense<0.000000e+00> : vector<8xf32>
    %109 = vector.multi_reduction <add>, %104, %cst_43 [1] : vector<8x64xf32> to vector<8xf32>
    %110 = vector.shape_cast %109 : vector<8xf32> to vector<8x1xf32>
    %cst_44 = arith.constant 6.400000e+01 : f32
    %111 = vector.broadcast %cst_44 : f32 to vector<8x1xf32>
    %112 = arith.divf %110, %111 : vector<8x1xf32>
    %113 = vector.broadcast %112 : vector<8x1xf32> to vector<8x64xf32>
    %114 = arith.subf %104, %113 : vector<8x64xf32>
    %115 = arith.mulf %114, %114 : vector<8x64xf32>
    %cst_45 = arith.constant dense<0.000000e+00> : vector<8xf32>
    %116 = vector.multi_reduction <add>, %115, %cst_45 [1] : vector<8x64xf32> to vector<8xf32>
    %117 = vector.shape_cast %116 : vector<8xf32> to vector<8x1xf32>
    %cst_46 = arith.constant 6.400000e+01 : f32
    %118 = vector.broadcast %cst_46 : f32 to vector<8x1xf32>
    %119 = arith.divf %117, %118 : vector<8x1xf32>
    %120 = vector.broadcast %112 : vector<8x1xf32> to vector<8x64xf32>
    %121 = arith.subf %104, %120 : vector<8x64xf32>
    %cst_47 = arith.constant 9.99999974E-6 : f32
    %122 = vector.broadcast %cst_47 : f32 to vector<8x1xf32>
    %123 = arith.addf %119, %122 : vector<8x1xf32>
    %124 = math.rsqrt %123 : vector<8x1xf32>
    %125 = vector.broadcast %124 : vector<8x1xf32> to vector<8x64xf32>
    %126 = arith.mulf %121, %125 : vector<8x64xf32>
    %127 = vector.shape_cast %106 : vector<64xf32> to vector<1x64xf32>
    %128 = vector.broadcast %127 : vector<1x64xf32> to vector<8x64xf32>
    %129 = arith.mulf %126, %128 : vector<8x64xf32>
    %130 = vector.shape_cast %108 : vector<64xf32> to vector<1x64xf32>
    %131 = vector.broadcast %130 : vector<1x64xf32> to vector<8x64xf32>
    %132 = arith.addf %129, %131 : vector<8x64xf32>
    %c1_48 = arith.constant 1 : index
    %c0_49 = arith.constant 0 : index
    %c0_50 = arith.constant 0 : index
    %133 = vector.load %arg3[%c1_48, %c0_49, %c0_50] : memref<8x64x256xbf16, #tpu.memory_space<vmem>>, vector<1x64x256xbf16>
    %134 = vector.shape_cast %133 : vector<1x64x256xbf16> to vector<64x256xbf16>
    %135 = arith.truncf %132 : vector<8x64xf32> to vector<8x64xbf16>
    %cst_51 = arith.constant dense<0.000000e+00> : vector<8x256xf32>
    %136 = tpu.matmul %135, %134, %cst_51 {dimension_numbers = #tpu.dot_dimension_numbers<[1], [0], [0], [1], [0, 0, 1, 1], [], []>} : vector<8x64xbf16>, vector<64x256xbf16>, vector<8x256xf32> -> vector<8x256xf32>
    %c1_52 = arith.constant 1 : index
    %c0_53 = arith.constant 0 : index
    %137 = vector.load %arg9[%c1_52, %c0_53] : memref<8x256xf32, #tpu.memory_space<vmem>>, vector<1x256xf32>
    %138 = vector.shape_cast %137 : vector<1x256xf32> to vector<256xf32>
    %139 = vector.shape_cast %138 : vector<256xf32> to vector<1x256xf32>
    %140 = vector.broadcast %139 : vector<1x256xf32> to vector<8x256xf32>
    %141 = arith.addf %136, %140 : vector<8x256xf32>
    %cst_54 = arith.constant 0.000000e+00 : f32
    %142 = vector.broadcast %cst_54 : f32 to vector<8x256xf32>
    %143 = arith.maximumf %141, %142 : vector<8x256xf32>
    %c1_55 = arith.constant 1 : index
    %c0_56 = arith.constant 0 : index
    %c0_57 = arith.constant 0 : index
    %144 = vector.load %arg4[%c1_55, %c0_56, %c0_57] : memref<8x256x64xbf16, #tpu.memory_space<vmem>>, vector<1x256x64xbf16>
    %145 = vector.shape_cast %144 : vector<1x256x64xbf16> to vector<256x64xbf16>
    %146 = arith.truncf %143 : vector<8x256xf32> to vector<8x256xbf16>
    %cst_58 = arith.constant dense<0.000000e+00> : vector<8x64xf32>
    %147 = tpu.matmul %146, %145, %cst_58 {dimension_numbers = #tpu.dot_dimension_numbers<[1], [0], [0], [1], [0, 0, 1, 1], [], []>} : vector<8x256xbf16>, vector<256x64xbf16>, vector<8x64xf32> -> vector<8x64xf32>
    %c10 = arith.constant 10 : index
    %c0_59 = arith.constant 0 : index
    %148 = vector.load %arg8[%c10, %c0_59] : memref<71x64xf32, #tpu.memory_space<vmem>>, vector<1x64xf32>
    %149 = vector.shape_cast %148 : vector<1x64xf32> to vector<64xf32>
    %150 = vector.shape_cast %149 : vector<64xf32> to vector<1x64xf32>
    %151 = vector.broadcast %150 : vector<1x64xf32> to vector<8x64xf32>
    %152 = arith.addf %147, %151 : vector<8x64xf32>
    %153 = arith.addf %132, %152 : vector<8x64xf32>
    %c11 = arith.constant 11 : index
    %c0_60 = arith.constant 0 : index
    %154 = vector.load %arg8[%c11, %c0_60] : memref<71x64xf32, #tpu.memory_space<vmem>>, vector<1x64xf32>
    %155 = vector.shape_cast %154 : vector<1x64xf32> to vector<64xf32>
    %c12 = arith.constant 12 : index
    %c0_61 = arith.constant 0 : index
    %156 = vector.load %arg8[%c12, %c0_61] : memref<71x64xf32, #tpu.memory_space<vmem>>, vector<1x64xf32>
    %157 = vector.shape_cast %156 : vector<1x64xf32> to vector<64xf32>
    %cst_62 = arith.constant dense<0.000000e+00> : vector<8xf32>
    %158 = vector.multi_reduction <add>, %153, %cst_62 [1] : vector<8x64xf32> to vector<8xf32>
    %159 = vector.shape_cast %158 : vector<8xf32> to vector<8x1xf32>
    %cst_63 = arith.constant 6.400000e+01 : f32
    %160 = vector.broadcast %cst_63 : f32 to vector<8x1xf32>
    %161 = arith.divf %159, %160 : vector<8x1xf32>
    %162 = vector.broadcast %161 : vector<8x1xf32> to vector<8x64xf32>
    %163 = arith.subf %153, %162 : vector<8x64xf32>
    %164 = arith.mulf %163, %163 : vector<8x64xf32>
    %cst_64 = arith.constant dense<0.000000e+00> : vector<8xf32>
    %165 = vector.multi_reduction <add>, %164, %cst_64 [1] : vector<8x64xf32> to vector<8xf32>
    %166 = vector.shape_cast %165 : vector<8xf32> to vector<8x1xf32>
    %cst_65 = arith.constant 6.400000e+01 : f32
    %167 = vector.broadcast %cst_65 : f32 to vector<8x1xf32>
    %168 = arith.divf %166, %167 : vector<8x1xf32>
    %169 = vector.broadcast %161 : vector<8x1xf32> to vector<8x64xf32>
    %170 = arith.subf %153, %169 : vector<8x64xf32>
    %cst_66 = arith.constant 9.99999974E-6 : f32
    %171 = vector.broadcast %cst_66 : f32 to vector<8x1xf32>
    %172 = arith.addf %168, %171 : vector<8x1xf32>
    %173 = math.rsqrt %172 : vector<8x1xf32>
    %174 = vector.broadcast %173 : vector<8x1xf32> to vector<8x64xf32>
    %175 = arith.mulf %170, %174 : vector<8x64xf32>
    %176 = vector.shape_cast %155 : vector<64xf32> to vector<1x64xf32>
    %177 = vector.broadcast %176 : vector<1x64xf32> to vector<8x64xf32>
    %178 = arith.mulf %175, %177 : vector<8x64xf32>
    %179 = vector.shape_cast %157 : vector<64xf32> to vector<1x64xf32>
    %180 = vector.broadcast %179 : vector<1x64xf32> to vector<8x64xf32>
    %181 = arith.addf %178, %180 : vector<8x64xf32>
    %c13 = arith.constant 13 : index
    %c0_67 = arith.constant 0 : index
    %182 = vector.load %arg8[%c13, %c0_67] : memref<71x64xf32, #tpu.memory_space<vmem>>, vector<1x64xf32>
    %183 = vector.shape_cast %182 : vector<1x64xf32> to vector<64xf32>
    %c14 = arith.constant 14 : index
    %c0_68 = arith.constant 0 : index
    %184 = vector.load %arg8[%c14, %c0_68] : memref<71x64xf32, #tpu.memory_space<vmem>>, vector<1x64xf32>
    %185 = vector.shape_cast %184 : vector<1x64xf32> to vector<64xf32>
    %cst_69 = arith.constant dense<0.000000e+00> : vector<8xf32>
    %186 = vector.multi_reduction <add>, %181, %cst_69 [1] : vector<8x64xf32> to vector<8xf32>
    %187 = vector.shape_cast %186 : vector<8xf32> to vector<8x1xf32>
    %cst_70 = arith.constant 6.400000e+01 : f32
    %188 = vector.broadcast %cst_70 : f32 to vector<8x1xf32>
    %189 = arith.divf %187, %188 : vector<8x1xf32>
    %190 = vector.broadcast %189 : vector<8x1xf32> to vector<8x64xf32>
    %191 = arith.subf %181, %190 : vector<8x64xf32>
    %192 = arith.mulf %191, %191 : vector<8x64xf32>
    %cst_71 = arith.constant dense<0.000000e+00> : vector<8xf32>
    %193 = vector.multi_reduction <add>, %192, %cst_71 [1] : vector<8x64xf32> to vector<8xf32>
    %194 = vector.shape_cast %193 : vector<8xf32> to vector<8x1xf32>
    %cst_72 = arith.constant 6.400000e+01 : f32
    %195 = vector.broadcast %cst_72 : f32 to vector<8x1xf32>
    %196 = arith.divf %194, %195 : vector<8x1xf32>
    %197 = vector.broadcast %189 : vector<8x1xf32> to vector<8x64xf32>
    %198 = arith.subf %181, %197 : vector<8x64xf32>
    %cst_73 = arith.constant 9.99999974E-6 : f32
    %199 = vector.broadcast %cst_73 : f32 to vector<8x1xf32>
    %200 = arith.addf %196, %199 : vector<8x1xf32>
    %201 = math.rsqrt %200 : vector<8x1xf32>
    %202 = vector.broadcast %201 : vector<8x1xf32> to vector<8x64xf32>
    %203 = arith.mulf %198, %202 : vector<8x64xf32>
    %204 = vector.shape_cast %183 : vector<64xf32> to vector<1x64xf32>
    %205 = vector.broadcast %204 : vector<1x64xf32> to vector<8x64xf32>
    %206 = arith.mulf %203, %205 : vector<8x64xf32>
    %207 = vector.shape_cast %185 : vector<64xf32> to vector<1x64xf32>
    %208 = vector.broadcast %207 : vector<1x64xf32> to vector<8x64xf32>
    %209 = arith.addf %206, %208 : vector<8x64xf32>
    %c0_74 = arith.constant 0 : index
    %c0_75 = arith.constant 0 : index
    %210 = vector.load %arg5[%c0_74, %c0_75] : memref<64x384xbf16, #tpu.memory_space<vmem>>, vector<64x384xbf16>
    %211 = arith.truncf %209 : vector<8x64xf32> to vector<8x64xbf16>
    %cst_76 = arith.constant dense<0.000000e+00> : vector<8x384xf32>
    %212 = tpu.matmul %211, %210, %cst_76 {dimension_numbers = #tpu.dot_dimension_numbers<[1], [0], [0], [1], [0, 0, 1, 1], [], []>} : vector<8x64xbf16>, vector<64x384xbf16>, vector<8x384xf32> -> vector<8x384xf32>
    %c2_77 = arith.constant 2 : index
    %c0_78 = arith.constant 0 : index
    %c0_79 = arith.constant 0 : index
    %213 = vector.load %arg2[%c2_77, %c0_78, %c0_79] : memref<8x64x64xbf16, #tpu.memory_space<vmem>>, vector<1x64x64xbf16>
    %214 = vector.shape_cast %213 : vector<1x64x64xbf16> to vector<64x64xbf16>
    %215 = arith.truncf %7 : vector<8x64xf32> to vector<8x64xbf16>
    %cst_80 = arith.constant dense<0.000000e+00> : vector<8x64xf32>
    %216 = tpu.matmul %215, %214, %cst_80 {dimension_numbers = #tpu.dot_dimension_numbers<[1], [0], [0], [1], [0, 0, 1, 1], [], []>} : vector<8x64xbf16>, vector<64x64xbf16>, vector<8x64xf32> -> vector<8x64xf32>
    %c15 = arith.constant 15 : index
    %c0_81 = arith.constant 0 : index
    %217 = vector.load %arg8[%c15, %c0_81] : memref<71x64xf32, #tpu.memory_space<vmem>>, vector<1x64xf32>
    %218 = vector.shape_cast %217 : vector<1x64xf32> to vector<64xf32>
    %219 = vector.shape_cast %218 : vector<64xf32> to vector<1x64xf32>
    %220 = vector.broadcast %219 : vector<1x64xf32> to vector<8x64xf32>
    %221 = arith.addf %216, %220 : vector<8x64xf32>
    %222 = arith.addf %7, %221 : vector<8x64xf32>
    %c16 = arith.constant 16 : index
    %c0_82 = arith.constant 0 : index
    %223 = vector.load %arg8[%c16, %c0_82] : memref<71x64xf32, #tpu.memory_space<vmem>>, vector<1x64xf32>
    %224 = vector.shape_cast %223 : vector<1x64xf32> to vector<64xf32>
    %c17 = arith.constant 17 : index
    %c0_83 = arith.constant 0 : index
    %225 = vector.load %arg8[%c17, %c0_83] : memref<71x64xf32, #tpu.memory_space<vmem>>, vector<1x64xf32>
    %226 = vector.shape_cast %225 : vector<1x64xf32> to vector<64xf32>
    %cst_84 = arith.constant dense<0.000000e+00> : vector<8xf32>
    %227 = vector.multi_reduction <add>, %222, %cst_84 [1] : vector<8x64xf32> to vector<8xf32>
    %228 = vector.shape_cast %227 : vector<8xf32> to vector<8x1xf32>
    %cst_85 = arith.constant 6.400000e+01 : f32
    %229 = vector.broadcast %cst_85 : f32 to vector<8x1xf32>
    %230 = arith.divf %228, %229 : vector<8x1xf32>
    %231 = vector.broadcast %230 : vector<8x1xf32> to vector<8x64xf32>
    %232 = arith.subf %222, %231 : vector<8x64xf32>
    %233 = arith.mulf %232, %232 : vector<8x64xf32>
    %cst_86 = arith.constant dense<0.000000e+00> : vector<8xf32>
    %234 = vector.multi_reduction <add>, %233, %cst_86 [1] : vector<8x64xf32> to vector<8xf32>
    %235 = vector.shape_cast %234 : vector<8xf32> to vector<8x1xf32>
    %cst_87 = arith.constant 6.400000e+01 : f32
    %236 = vector.broadcast %cst_87 : f32 to vector<8x1xf32>
    %237 = arith.divf %235, %236 : vector<8x1xf32>
    %238 = vector.broadcast %230 : vector<8x1xf32> to vector<8x64xf32>
    %239 = arith.subf %222, %238 : vector<8x64xf32>
    %cst_88 = arith.constant 9.99999974E-6 : f32
    %240 = vector.broadcast %cst_88 : f32 to vector<8x1xf32>
    %241 = arith.addf %237, %240 : vector<8x1xf32>
    %242 = math.rsqrt %241 : vector<8x1xf32>
    %243 = vector.broadcast %242 : vector<8x1xf32> to vector<8x64xf32>
    %244 = arith.mulf %239, %243 : vector<8x64xf32>
    %245 = vector.shape_cast %224 : vector<64xf32> to vector<1x64xf32>
    %246 = vector.broadcast %245 : vector<1x64xf32> to vector<8x64xf32>
    %247 = arith.mulf %244, %246 : vector<8x64xf32>
    %248 = vector.shape_cast %226 : vector<64xf32> to vector<1x64xf32>
    %249 = vector.broadcast %248 : vector<1x64xf32> to vector<8x64xf32>
    %250 = arith.addf %247, %249 : vector<8x64xf32>
    %251 = vector.extract_strided_slice %212 {offsets = [0, 0], sizes = [8, 64], strides = [1, 1]} : vector<8x384xf32> to vector<8x64xf32>
    %c18 = arith.constant 18 : index
    %c0_89 = arith.constant 0 : index
    %252 = vector.load %arg8[%c18, %c0_89] : memref<71x64xf32, #tpu.memory_space<vmem>>, vector<1x64xf32>
    %253 = vector.shape_cast %252 : vector<1x64xf32> to vector<64xf32>
    %254 = vector.shape_cast %253 : vector<64xf32> to vector<1x64xf32>
    %255 = vector.broadcast %254 : vector<1x64xf32> to vector<8x64xf32>
    %256 = arith.addf %251, %255 : vector<8x64xf32>
    %257 = arith.addf %250, %256 : vector<8x64xf32>
    %c19 = arith.constant 19 : index
    %c0_90 = arith.constant 0 : index
    %258 = vector.load %arg8[%c19, %c0_90] : memref<71x64xf32, #tpu.memory_space<vmem>>, vector<1x64xf32>
    %259 = vector.shape_cast %258 : vector<1x64xf32> to vector<64xf32>
    %c20 = arith.constant 20 : index
    %c0_91 = arith.constant 0 : index
    %260 = vector.load %arg8[%c20, %c0_91] : memref<71x64xf32, #tpu.memory_space<vmem>>, vector<1x64xf32>
    %261 = vector.shape_cast %260 : vector<1x64xf32> to vector<64xf32>
    %cst_92 = arith.constant dense<0.000000e+00> : vector<8xf32>
    %262 = vector.multi_reduction <add>, %257, %cst_92 [1] : vector<8x64xf32> to vector<8xf32>
    %263 = vector.shape_cast %262 : vector<8xf32> to vector<8x1xf32>
    %cst_93 = arith.constant 6.400000e+01 : f32
    %264 = vector.broadcast %cst_93 : f32 to vector<8x1xf32>
    %265 = arith.divf %263, %264 : vector<8x1xf32>
    %266 = vector.broadcast %265 : vector<8x1xf32> to vector<8x64xf32>
    %267 = arith.subf %257, %266 : vector<8x64xf32>
    %268 = arith.mulf %267, %267 : vector<8x64xf32>
    %cst_94 = arith.constant dense<0.000000e+00> : vector<8xf32>
    %269 = vector.multi_reduction <add>, %268, %cst_94 [1] : vector<8x64xf32> to vector<8xf32>
    %270 = vector.shape_cast %269 : vector<8xf32> to vector<8x1xf32>
    %cst_95 = arith.constant 6.400000e+01 : f32
    %271 = vector.broadcast %cst_95 : f32 to vector<8x1xf32>
    %272 = arith.divf %270, %271 : vector<8x1xf32>
    %273 = vector.broadcast %265 : vector<8x1xf32> to vector<8x64xf32>
    %274 = arith.subf %257, %273 : vector<8x64xf32>
    %cst_96 = arith.constant 9.99999974E-6 : f32
    %275 = vector.broadcast %cst_96 : f32 to vector<8x1xf32>
    %276 = arith.addf %272, %275 : vector<8x1xf32>
    %277 = math.rsqrt %276 : vector<8x1xf32>
    %278 = vector.broadcast %277 : vector<8x1xf32> to vector<8x64xf32>
    %279 = arith.mulf %274, %278 : vector<8x64xf32>
    %280 = vector.shape_cast %259 : vector<64xf32> to vector<1x64xf32>
    %281 = vector.broadcast %280 : vector<1x64xf32> to vector<8x64xf32>
    %282 = arith.mulf %279, %281 : vector<8x64xf32>
    %283 = vector.shape_cast %261 : vector<64xf32> to vector<1x64xf32>
    %284 = vector.broadcast %283 : vector<1x64xf32> to vector<8x64xf32>
    %285 = arith.addf %282, %284 : vector<8x64xf32>
    %c2_97 = arith.constant 2 : index
    %c0_98 = arith.constant 0 : index
    %c0_99 = arith.constant 0 : index
    %286 = vector.load %arg3[%c2_97, %c0_98, %c0_99] : memref<8x64x256xbf16, #tpu.memory_space<vmem>>, vector<1x64x256xbf16>
    %287 = vector.shape_cast %286 : vector<1x64x256xbf16> to vector<64x256xbf16>
    %288 = arith.truncf %285 : vector<8x64xf32> to vector<8x64xbf16>
    %cst_100 = arith.constant dense<0.000000e+00> : vector<8x256xf32>
    %289 = tpu.matmul %288, %287, %cst_100 {dimension_numbers = #tpu.dot_dimension_numbers<[1], [0], [0], [1], [0, 0, 1, 1], [], []>} : vector<8x64xbf16>, vector<64x256xbf16>, vector<8x256xf32> -> vector<8x256xf32>
    %c2_101 = arith.constant 2 : index
    %c0_102 = arith.constant 0 : index
    %290 = vector.load %arg9[%c2_101, %c0_102] : memref<8x256xf32, #tpu.memory_space<vmem>>, vector<1x256xf32>
    %291 = vector.shape_cast %290 : vector<1x256xf32> to vector<256xf32>
    %292 = vector.shape_cast %291 : vector<256xf32> to vector<1x256xf32>
    %293 = vector.broadcast %292 : vector<1x256xf32> to vector<8x256xf32>
    %294 = arith.addf %289, %293 : vector<8x256xf32>
    %cst_103 = arith.constant 0.000000e+00 : f32
    %295 = vector.broadcast %cst_103 : f32 to vector<8x256xf32>
    %296 = arith.maximumf %294, %295 : vector<8x256xf32>
    %c2_104 = arith.constant 2 : index
    %c0_105 = arith.constant 0 : index
    %c0_106 = arith.constant 0 : index
    %297 = vector.load %arg4[%c2_104, %c0_105, %c0_106] : memref<8x256x64xbf16, #tpu.memory_space<vmem>>, vector<1x256x64xbf16>
    %298 = vector.shape_cast %297 : vector<1x256x64xbf16> to vector<256x64xbf16>
    %299 = arith.truncf %296 : vector<8x256xf32> to vector<8x256xbf16>
    %cst_107 = arith.constant dense<0.000000e+00> : vector<8x64xf32>
    %300 = tpu.matmul %299, %298, %cst_107 {dimension_numbers = #tpu.dot_dimension_numbers<[1], [0], [0], [1], [0, 0, 1, 1], [], []>} : vector<8x256xbf16>, vector<256x64xbf16>, vector<8x64xf32> -> vector<8x64xf32>
    %c21 = arith.constant 21 : index
    %c0_108 = arith.constant 0 : index
    %301 = vector.load %arg8[%c21, %c0_108] : memref<71x64xf32, #tpu.memory_space<vmem>>, vector<1x64xf32>
    %302 = vector.shape_cast %301 : vector<1x64xf32> to vector<64xf32>
    %303 = vector.shape_cast %302 : vector<64xf32> to vector<1x64xf32>
    %304 = vector.broadcast %303 : vector<1x64xf32> to vector<8x64xf32>
    %305 = arith.addf %300, %304 : vector<8x64xf32>
    %306 = arith.addf %285, %305 : vector<8x64xf32>
    %c22 = arith.constant 22 : index
    %c0_109 = arith.constant 0 : index
    %307 = vector.load %arg8[%c22, %c0_109] : memref<71x64xf32, #tpu.memory_space<vmem>>, vector<1x64xf32>
    %308 = vector.shape_cast %307 : vector<1x64xf32> to vector<64xf32>
    %c23 = arith.constant 23 : index
    %c0_110 = arith.constant 0 : index
    %309 = vector.load %arg8[%c23, %c0_110] : memref<71x64xf32, #tpu.memory_space<vmem>>, vector<1x64xf32>
    %310 = vector.shape_cast %309 : vector<1x64xf32> to vector<64xf32>
    %cst_111 = arith.constant dense<0.000000e+00> : vector<8xf32>
    %311 = vector.multi_reduction <add>, %306, %cst_111 [1] : vector<8x64xf32> to vector<8xf32>
    %312 = vector.shape_cast %311 : vector<8xf32> to vector<8x1xf32>
    %cst_112 = arith.constant 6.400000e+01 : f32
    %313 = vector.broadcast %cst_112 : f32 to vector<8x1xf32>
    %314 = arith.divf %312, %313 : vector<8x1xf32>
    %315 = vector.broadcast %314 : vector<8x1xf32> to vector<8x64xf32>
    %316 = arith.subf %306, %315 : vector<8x64xf32>
    %317 = arith.mulf %316, %316 : vector<8x64xf32>
    %cst_113 = arith.constant dense<0.000000e+00> : vector<8xf32>
    %318 = vector.multi_reduction <add>, %317, %cst_113 [1] : vector<8x64xf32> to vector<8xf32>
    %319 = vector.shape_cast %318 : vector<8xf32> to vector<8x1xf32>
    %cst_114 = arith.constant 6.400000e+01 : f32
    %320 = vector.broadcast %cst_114 : f32 to vector<8x1xf32>
    %321 = arith.divf %319, %320 : vector<8x1xf32>
    %322 = vector.broadcast %314 : vector<8x1xf32> to vector<8x64xf32>
    %323 = arith.subf %306, %322 : vector<8x64xf32>
    %cst_115 = arith.constant 9.99999974E-6 : f32
    %324 = vector.broadcast %cst_115 : f32 to vector<8x1xf32>
    %325 = arith.addf %321, %324 : vector<8x1xf32>
    %326 = math.rsqrt %325 : vector<8x1xf32>
    %327 = vector.broadcast %326 : vector<8x1xf32> to vector<8x64xf32>
    %328 = arith.mulf %323, %327 : vector<8x64xf32>
    %329 = vector.shape_cast %308 : vector<64xf32> to vector<1x64xf32>
    %330 = vector.broadcast %329 : vector<1x64xf32> to vector<8x64xf32>
    %331 = arith.mulf %328, %330 : vector<8x64xf32>
    %332 = vector.shape_cast %310 : vector<64xf32> to vector<1x64xf32>
    %333 = vector.broadcast %332 : vector<1x64xf32> to vector<8x64xf32>
    %334 = arith.addf %331, %333 : vector<8x64xf32>
    %c3_116 = arith.constant 3 : index
    %c0_117 = arith.constant 0 : index
    %c0_118 = arith.constant 0 : index
    %335 = vector.load %arg2[%c3_116, %c0_117, %c0_118] : memref<8x64x64xbf16, #tpu.memory_space<vmem>>, vector<1x64x64xbf16>
    %336 = vector.shape_cast %335 : vector<1x64x64xbf16> to vector<64x64xbf16>
    %337 = arith.truncf %334 : vector<8x64xf32> to vector<8x64xbf16>
    %cst_119 = arith.constant dense<0.000000e+00> : vector<8x64xf32>
    %338 = tpu.matmul %337, %336, %cst_119 {dimension_numbers = #tpu.dot_dimension_numbers<[1], [0], [0], [1], [0, 0, 1, 1], [], []>} : vector<8x64xbf16>, vector<64x64xbf16>, vector<8x64xf32> -> vector<8x64xf32>
    %c24 = arith.constant 24 : index
    %c0_120 = arith.constant 0 : index
    %339 = vector.load %arg8[%c24, %c0_120] : memref<71x64xf32, #tpu.memory_space<vmem>>, vector<1x64xf32>
    %340 = vector.shape_cast %339 : vector<1x64xf32> to vector<64xf32>
    %341 = vector.shape_cast %340 : vector<64xf32> to vector<1x64xf32>
    %342 = vector.broadcast %341 : vector<1x64xf32> to vector<8x64xf32>
    %343 = arith.addf %338, %342 : vector<8x64xf32>
    %344 = arith.addf %334, %343 : vector<8x64xf32>
    %c25 = arith.constant 25 : index
    %c0_121 = arith.constant 0 : index
    %345 = vector.load %arg8[%c25, %c0_121] : memref<71x64xf32, #tpu.memory_space<vmem>>, vector<1x64xf32>
    %346 = vector.shape_cast %345 : vector<1x64xf32> to vector<64xf32>
    %c26 = arith.constant 26 : index
    %c0_122 = arith.constant 0 : index
    %347 = vector.load %arg8[%c26, %c0_122] : memref<71x64xf32, #tpu.memory_space<vmem>>, vector<1x64xf32>
    %348 = vector.shape_cast %347 : vector<1x64xf32> to vector<64xf32>
    %cst_123 = arith.constant dense<0.000000e+00> : vector<8xf32>
    %349 = vector.multi_reduction <add>, %344, %cst_123 [1] : vector<8x64xf32> to vector<8xf32>
    %350 = vector.shape_cast %349 : vector<8xf32> to vector<8x1xf32>
    %cst_124 = arith.constant 6.400000e+01 : f32
    %351 = vector.broadcast %cst_124 : f32 to vector<8x1xf32>
    %352 = arith.divf %350, %351 : vector<8x1xf32>
    %353 = vector.broadcast %352 : vector<8x1xf32> to vector<8x64xf32>
    %354 = arith.subf %344, %353 : vector<8x64xf32>
    %355 = arith.mulf %354, %354 : vector<8x64xf32>
    %cst_125 = arith.constant dense<0.000000e+00> : vector<8xf32>
    %356 = vector.multi_reduction <add>, %355, %cst_125 [1] : vector<8x64xf32> to vector<8xf32>
    %357 = vector.shape_cast %356 : vector<8xf32> to vector<8x1xf32>
    %cst_126 = arith.constant 6.400000e+01 : f32
    %358 = vector.broadcast %cst_126 : f32 to vector<8x1xf32>
    %359 = arith.divf %357, %358 : vector<8x1xf32>
    %360 = vector.broadcast %352 : vector<8x1xf32> to vector<8x64xf32>
    %361 = arith.subf %344, %360 : vector<8x64xf32>
    %cst_127 = arith.constant 9.99999974E-6 : f32
    %362 = vector.broadcast %cst_127 : f32 to vector<8x1xf32>
    %363 = arith.addf %359, %362 : vector<8x1xf32>
    %364 = math.rsqrt %363 : vector<8x1xf32>
    %365 = vector.broadcast %364 : vector<8x1xf32> to vector<8x64xf32>
    %366 = arith.mulf %361, %365 : vector<8x64xf32>
    %367 = vector.shape_cast %346 : vector<64xf32> to vector<1x64xf32>
    %368 = vector.broadcast %367 : vector<1x64xf32> to vector<8x64xf32>
    %369 = arith.mulf %366, %368 : vector<8x64xf32>
    %370 = vector.shape_cast %348 : vector<64xf32> to vector<1x64xf32>
    %371 = vector.broadcast %370 : vector<1x64xf32> to vector<8x64xf32>
    %372 = arith.addf %369, %371 : vector<8x64xf32>
    %373 = vector.extract_strided_slice %212 {offsets = [0, 64], sizes = [8, 64], strides = [1, 1]} : vector<8x384xf32> to vector<8x64xf32>
    %c27 = arith.constant 27 : index
    %c0_128 = arith.constant 0 : index
    %374 = vector.load %arg8[%c27, %c0_128] : memref<71x64xf32, #tpu.memory_space<vmem>>, vector<1x64xf32>
    %375 = vector.shape_cast %374 : vector<1x64xf32> to vector<64xf32>
    %376 = vector.shape_cast %375 : vector<64xf32> to vector<1x64xf32>
    %377 = vector.broadcast %376 : vector<1x64xf32> to vector<8x64xf32>
    %378 = arith.addf %373, %377 : vector<8x64xf32>
    %379 = arith.addf %372, %378 : vector<8x64xf32>
    %c28 = arith.constant 28 : index
    %c0_129 = arith.constant 0 : index
    %380 = vector.load %arg8[%c28, %c0_129] : memref<71x64xf32, #tpu.memory_space<vmem>>, vector<1x64xf32>
    %381 = vector.shape_cast %380 : vector<1x64xf32> to vector<64xf32>
    %c29 = arith.constant 29 : index
    %c0_130 = arith.constant 0 : index
    %382 = vector.load %arg8[%c29, %c0_130] : memref<71x64xf32, #tpu.memory_space<vmem>>, vector<1x64xf32>
    %383 = vector.shape_cast %382 : vector<1x64xf32> to vector<64xf32>
    %cst_131 = arith.constant dense<0.000000e+00> : vector<8xf32>
    %384 = vector.multi_reduction <add>, %379, %cst_131 [1] : vector<8x64xf32> to vector<8xf32>
    %385 = vector.shape_cast %384 : vector<8xf32> to vector<8x1xf32>
    %cst_132 = arith.constant 6.400000e+01 : f32
    %386 = vector.broadcast %cst_132 : f32 to vector<8x1xf32>
    %387 = arith.divf %385, %386 : vector<8x1xf32>
    %388 = vector.broadcast %387 : vector<8x1xf32> to vector<8x64xf32>
    %389 = arith.subf %379, %388 : vector<8x64xf32>
    %390 = arith.mulf %389, %389 : vector<8x64xf32>
    %cst_133 = arith.constant dense<0.000000e+00> : vector<8xf32>
    %391 = vector.multi_reduction <add>, %390, %cst_133 [1] : vector<8x64xf32> to vector<8xf32>
    %392 = vector.shape_cast %391 : vector<8xf32> to vector<8x1xf32>
    %cst_134 = arith.constant 6.400000e+01 : f32
    %393 = vector.broadcast %cst_134 : f32 to vector<8x1xf32>
    %394 = arith.divf %392, %393 : vector<8x1xf32>
    %395 = vector.broadcast %387 : vector<8x1xf32> to vector<8x64xf32>
    %396 = arith.subf %379, %395 : vector<8x64xf32>
    %cst_135 = arith.constant 9.99999974E-6 : f32
    %397 = vector.broadcast %cst_135 : f32 to vector<8x1xf32>
    %398 = arith.addf %394, %397 : vector<8x1xf32>
    %399 = math.rsqrt %398 : vector<8x1xf32>
    %400 = vector.broadcast %399 : vector<8x1xf32> to vector<8x64xf32>
    %401 = arith.mulf %396, %400 : vector<8x64xf32>
    %402 = vector.shape_cast %381 : vector<64xf32> to vector<1x64xf32>
    %403 = vector.broadcast %402 : vector<1x64xf32> to vector<8x64xf32>
    %404 = arith.mulf %401, %403 : vector<8x64xf32>
    %405 = vector.shape_cast %383 : vector<64xf32> to vector<1x64xf32>
    %406 = vector.broadcast %405 : vector<1x64xf32> to vector<8x64xf32>
    %407 = arith.addf %404, %406 : vector<8x64xf32>
    %c3_136 = arith.constant 3 : index
    %c0_137 = arith.constant 0 : index
    %c0_138 = arith.constant 0 : index
    %408 = vector.load %arg3[%c3_136, %c0_137, %c0_138] : memref<8x64x256xbf16, #tpu.memory_space<vmem>>, vector<1x64x256xbf16>
    %409 = vector.shape_cast %408 : vector<1x64x256xbf16> to vector<64x256xbf16>
    %410 = arith.truncf %407 : vector<8x64xf32> to vector<8x64xbf16>
    %cst_139 = arith.constant dense<0.000000e+00> : vector<8x256xf32>
    %411 = tpu.matmul %410, %409, %cst_139 {dimension_numbers = #tpu.dot_dimension_numbers<[1], [0], [0], [1], [0, 0, 1, 1], [], []>} : vector<8x64xbf16>, vector<64x256xbf16>, vector<8x256xf32> -> vector<8x256xf32>
    %c3_140 = arith.constant 3 : index
    %c0_141 = arith.constant 0 : index
    %412 = vector.load %arg9[%c3_140, %c0_141] : memref<8x256xf32, #tpu.memory_space<vmem>>, vector<1x256xf32>
    %413 = vector.shape_cast %412 : vector<1x256xf32> to vector<256xf32>
    %414 = vector.shape_cast %413 : vector<256xf32> to vector<1x256xf32>
    %415 = vector.broadcast %414 : vector<1x256xf32> to vector<8x256xf32>
    %416 = arith.addf %411, %415 : vector<8x256xf32>
    %cst_142 = arith.constant 0.000000e+00 : f32
    %417 = vector.broadcast %cst_142 : f32 to vector<8x256xf32>
    %418 = arith.maximumf %416, %417 : vector<8x256xf32>
    %c3_143 = arith.constant 3 : index
    %c0_144 = arith.constant 0 : index
    %c0_145 = arith.constant 0 : index
    %419 = vector.load %arg4[%c3_143, %c0_144, %c0_145] : memref<8x256x64xbf16, #tpu.memory_space<vmem>>, vector<1x256x64xbf16>
    %420 = vector.shape_cast %419 : vector<1x256x64xbf16> to vector<256x64xbf16>
    %421 = arith.truncf %418 : vector<8x256xf32> to vector<8x256xbf16>
    %cst_146 = arith.constant dense<0.000000e+00> : vector<8x64xf32>
    %422 = tpu.matmul %421, %420, %cst_146 {dimension_numbers = #tpu.dot_dimension_numbers<[1], [0], [0], [1], [0, 0, 1, 1], [], []>} : vector<8x256xbf16>, vector<256x64xbf16>, vector<8x64xf32> -> vector<8x64xf32>
    %c30 = arith.constant 30 : index
    %c0_147 = arith.constant 0 : index
    %423 = vector.load %arg8[%c30, %c0_147] : memref<71x64xf32, #tpu.memory_space<vmem>>, vector<1x64xf32>
    %424 = vector.shape_cast %423 : vector<1x64xf32> to vector<64xf32>
    %425 = vector.shape_cast %424 : vector<64xf32> to vector<1x64xf32>
    %426 = vector.broadcast %425 : vector<1x64xf32> to vector<8x64xf32>
    %427 = arith.addf %422, %426 : vector<8x64xf32>
    %428 = arith.addf %407, %427 : vector<8x64xf32>
    %c31 = arith.constant 31 : index
    %c0_148 = arith.constant 0 : index
    %429 = vector.load %arg8[%c31, %c0_148] : memref<71x64xf32, #tpu.memory_space<vmem>>, vector<1x64xf32>
    %430 = vector.shape_cast %429 : vector<1x64xf32> to vector<64xf32>
    %c32 = arith.constant 32 : index
    %c0_149 = arith.constant 0 : index
    %431 = vector.load %arg8[%c32, %c0_149] : memref<71x64xf32, #tpu.memory_space<vmem>>, vector<1x64xf32>
    %432 = vector.shape_cast %431 : vector<1x64xf32> to vector<64xf32>
    %cst_150 = arith.constant dense<0.000000e+00> : vector<8xf32>
    %433 = vector.multi_reduction <add>, %428, %cst_150 [1] : vector<8x64xf32> to vector<8xf32>
    %434 = vector.shape_cast %433 : vector<8xf32> to vector<8x1xf32>
    %cst_151 = arith.constant 6.400000e+01 : f32
    %435 = vector.broadcast %cst_151 : f32 to vector<8x1xf32>
    %436 = arith.divf %434, %435 : vector<8x1xf32>
    %437 = vector.broadcast %436 : vector<8x1xf32> to vector<8x64xf32>
    %438 = arith.subf %428, %437 : vector<8x64xf32>
    %439 = arith.mulf %438, %438 : vector<8x64xf32>
    %cst_152 = arith.constant dense<0.000000e+00> : vector<8xf32>
    %440 = vector.multi_reduction <add>, %439, %cst_152 [1] : vector<8x64xf32> to vector<8xf32>
    %441 = vector.shape_cast %440 : vector<8xf32> to vector<8x1xf32>
    %cst_153 = arith.constant 6.400000e+01 : f32
    %442 = vector.broadcast %cst_153 : f32 to vector<8x1xf32>
    %443 = arith.divf %441, %442 : vector<8x1xf32>
    %444 = vector.broadcast %436 : vector<8x1xf32> to vector<8x64xf32>
    %445 = arith.subf %428, %444 : vector<8x64xf32>
    %cst_154 = arith.constant 9.99999974E-6 : f32
    %446 = vector.broadcast %cst_154 : f32 to vector<8x1xf32>
    %447 = arith.addf %443, %446 : vector<8x1xf32>
    %448 = math.rsqrt %447 : vector<8x1xf32>
    %449 = vector.broadcast %448 : vector<8x1xf32> to vector<8x64xf32>
    %450 = arith.mulf %445, %449 : vector<8x64xf32>
    %451 = vector.shape_cast %430 : vector<64xf32> to vector<1x64xf32>
    %452 = vector.broadcast %451 : vector<1x64xf32> to vector<8x64xf32>
    %453 = arith.mulf %450, %452 : vector<8x64xf32>
    %454 = vector.shape_cast %432 : vector<64xf32> to vector<1x64xf32>
    %455 = vector.broadcast %454 : vector<1x64xf32> to vector<8x64xf32>
    %456 = arith.addf %453, %455 : vector<8x64xf32>
    %c4_155 = arith.constant 4 : index
    %c0_156 = arith.constant 0 : index
    %c0_157 = arith.constant 0 : index
    %457 = vector.load %arg2[%c4_155, %c0_156, %c0_157] : memref<8x64x64xbf16, #tpu.memory_space<vmem>>, vector<1x64x64xbf16>
    %458 = vector.shape_cast %457 : vector<1x64x64xbf16> to vector<64x64xbf16>
    %459 = arith.truncf %456 : vector<8x64xf32> to vector<8x64xbf16>
    %cst_158 = arith.constant dense<0.000000e+00> : vector<8x64xf32>
    %460 = tpu.matmul %459, %458, %cst_158 {dimension_numbers = #tpu.dot_dimension_numbers<[1], [0], [0], [1], [0, 0, 1, 1], [], []>} : vector<8x64xbf16>, vector<64x64xbf16>, vector<8x64xf32> -> vector<8x64xf32>
    %c33 = arith.constant 33 : index
    %c0_159 = arith.constant 0 : index
    %461 = vector.load %arg8[%c33, %c0_159] : memref<71x64xf32, #tpu.memory_space<vmem>>, vector<1x64xf32>
    %462 = vector.shape_cast %461 : vector<1x64xf32> to vector<64xf32>
    %463 = vector.shape_cast %462 : vector<64xf32> to vector<1x64xf32>
    %464 = vector.broadcast %463 : vector<1x64xf32> to vector<8x64xf32>
    %465 = arith.addf %460, %464 : vector<8x64xf32>
    %466 = arith.addf %456, %465 : vector<8x64xf32>
    %c34 = arith.constant 34 : index
    %c0_160 = arith.constant 0 : index
    %467 = vector.load %arg8[%c34, %c0_160] : memref<71x64xf32, #tpu.memory_space<vmem>>, vector<1x64xf32>
    %468 = vector.shape_cast %467 : vector<1x64xf32> to vector<64xf32>
    %c35 = arith.constant 35 : index
    %c0_161 = arith.constant 0 : index
    %469 = vector.load %arg8[%c35, %c0_161] : memref<71x64xf32, #tpu.memory_space<vmem>>, vector<1x64xf32>
    %470 = vector.shape_cast %469 : vector<1x64xf32> to vector<64xf32>
    %cst_162 = arith.constant dense<0.000000e+00> : vector<8xf32>
    %471 = vector.multi_reduction <add>, %466, %cst_162 [1] : vector<8x64xf32> to vector<8xf32>
    %472 = vector.shape_cast %471 : vector<8xf32> to vector<8x1xf32>
    %cst_163 = arith.constant 6.400000e+01 : f32
    %473 = vector.broadcast %cst_163 : f32 to vector<8x1xf32>
    %474 = arith.divf %472, %473 : vector<8x1xf32>
    %475 = vector.broadcast %474 : vector<8x1xf32> to vector<8x64xf32>
    %476 = arith.subf %466, %475 : vector<8x64xf32>
    %477 = arith.mulf %476, %476 : vector<8x64xf32>
    %cst_164 = arith.constant dense<0.000000e+00> : vector<8xf32>
    %478 = vector.multi_reduction <add>, %477, %cst_164 [1] : vector<8x64xf32> to vector<8xf32>
    %479 = vector.shape_cast %478 : vector<8xf32> to vector<8x1xf32>
    %cst_165 = arith.constant 6.400000e+01 : f32
    %480 = vector.broadcast %cst_165 : f32 to vector<8x1xf32>
    %481 = arith.divf %479, %480 : vector<8x1xf32>
    %482 = vector.broadcast %474 : vector<8x1xf32> to vector<8x64xf32>
    %483 = arith.subf %466, %482 : vector<8x64xf32>
    %cst_166 = arith.constant 9.99999974E-6 : f32
    %484 = vector.broadcast %cst_166 : f32 to vector<8x1xf32>
    %485 = arith.addf %481, %484 : vector<8x1xf32>
    %486 = math.rsqrt %485 : vector<8x1xf32>
    %487 = vector.broadcast %486 : vector<8x1xf32> to vector<8x64xf32>
    %488 = arith.mulf %483, %487 : vector<8x64xf32>
    %489 = vector.shape_cast %468 : vector<64xf32> to vector<1x64xf32>
    %490 = vector.broadcast %489 : vector<1x64xf32> to vector<8x64xf32>
    %491 = arith.mulf %488, %490 : vector<8x64xf32>
    %492 = vector.shape_cast %470 : vector<64xf32> to vector<1x64xf32>
    %493 = vector.broadcast %492 : vector<1x64xf32> to vector<8x64xf32>
    %494 = arith.addf %491, %493 : vector<8x64xf32>
    %495 = vector.extract_strided_slice %212 {offsets = [0, 128], sizes = [8, 64], strides = [1, 1]} : vector<8x384xf32> to vector<8x64xf32>
    %c36 = arith.constant 36 : index
    %c0_167 = arith.constant 0 : index
    %496 = vector.load %arg8[%c36, %c0_167] : memref<71x64xf32, #tpu.memory_space<vmem>>, vector<1x64xf32>
    %497 = vector.shape_cast %496 : vector<1x64xf32> to vector<64xf32>
    %498 = vector.shape_cast %497 : vector<64xf32> to vector<1x64xf32>
    %499 = vector.broadcast %498 : vector<1x64xf32> to vector<8x64xf32>
    %500 = arith.addf %495, %499 : vector<8x64xf32>
    %501 = arith.addf %494, %500 : vector<8x64xf32>
    %c37 = arith.constant 37 : index
    %c0_168 = arith.constant 0 : index
    %502 = vector.load %arg8[%c37, %c0_168] : memref<71x64xf32, #tpu.memory_space<vmem>>, vector<1x64xf32>
    %503 = vector.shape_cast %502 : vector<1x64xf32> to vector<64xf32>
    %c38 = arith.constant 38 : index
    %c0_169 = arith.constant 0 : index
    %504 = vector.load %arg8[%c38, %c0_169] : memref<71x64xf32, #tpu.memory_space<vmem>>, vector<1x64xf32>
    %505 = vector.shape_cast %504 : vector<1x64xf32> to vector<64xf32>
    %cst_170 = arith.constant dense<0.000000e+00> : vector<8xf32>
    %506 = vector.multi_reduction <add>, %501, %cst_170 [1] : vector<8x64xf32> to vector<8xf32>
    %507 = vector.shape_cast %506 : vector<8xf32> to vector<8x1xf32>
    %cst_171 = arith.constant 6.400000e+01 : f32
    %508 = vector.broadcast %cst_171 : f32 to vector<8x1xf32>
    %509 = arith.divf %507, %508 : vector<8x1xf32>
    %510 = vector.broadcast %509 : vector<8x1xf32> to vector<8x64xf32>
    %511 = arith.subf %501, %510 : vector<8x64xf32>
    %512 = arith.mulf %511, %511 : vector<8x64xf32>
    %cst_172 = arith.constant dense<0.000000e+00> : vector<8xf32>
    %513 = vector.multi_reduction <add>, %512, %cst_172 [1] : vector<8x64xf32> to vector<8xf32>
    %514 = vector.shape_cast %513 : vector<8xf32> to vector<8x1xf32>
    %cst_173 = arith.constant 6.400000e+01 : f32
    %515 = vector.broadcast %cst_173 : f32 to vector<8x1xf32>
    %516 = arith.divf %514, %515 : vector<8x1xf32>
    %517 = vector.broadcast %509 : vector<8x1xf32> to vector<8x64xf32>
    %518 = arith.subf %501, %517 : vector<8x64xf32>
    %cst_174 = arith.constant 9.99999974E-6 : f32
    %519 = vector.broadcast %cst_174 : f32 to vector<8x1xf32>
    %520 = arith.addf %516, %519 : vector<8x1xf32>
    %521 = math.rsqrt %520 : vector<8x1xf32>
    %522 = vector.broadcast %521 : vector<8x1xf32> to vector<8x64xf32>
    %523 = arith.mulf %518, %522 : vector<8x64xf32>
    %524 = vector.shape_cast %503 : vector<64xf32> to vector<1x64xf32>
    %525 = vector.broadcast %524 : vector<1x64xf32> to vector<8x64xf32>
    %526 = arith.mulf %523, %525 : vector<8x64xf32>
    %527 = vector.shape_cast %505 : vector<64xf32> to vector<1x64xf32>
    %528 = vector.broadcast %527 : vector<1x64xf32> to vector<8x64xf32>
    %529 = arith.addf %526, %528 : vector<8x64xf32>
    %c4_175 = arith.constant 4 : index
    %c0_176 = arith.constant 0 : index
    %c0_177 = arith.constant 0 : index
    %530 = vector.load %arg3[%c4_175, %c0_176, %c0_177] : memref<8x64x256xbf16, #tpu.memory_space<vmem>>, vector<1x64x256xbf16>
    %531 = vector.shape_cast %530 : vector<1x64x256xbf16> to vector<64x256xbf16>
    %532 = arith.truncf %529 : vector<8x64xf32> to vector<8x64xbf16>
    %cst_178 = arith.constant dense<0.000000e+00> : vector<8x256xf32>
    %533 = tpu.matmul %532, %531, %cst_178 {dimension_numbers = #tpu.dot_dimension_numbers<[1], [0], [0], [1], [0, 0, 1, 1], [], []>} : vector<8x64xbf16>, vector<64x256xbf16>, vector<8x256xf32> -> vector<8x256xf32>
    %c4_179 = arith.constant 4 : index
    %c0_180 = arith.constant 0 : index
    %534 = vector.load %arg9[%c4_179, %c0_180] : memref<8x256xf32, #tpu.memory_space<vmem>>, vector<1x256xf32>
    %535 = vector.shape_cast %534 : vector<1x256xf32> to vector<256xf32>
    %536 = vector.shape_cast %535 : vector<256xf32> to vector<1x256xf32>
    %537 = vector.broadcast %536 : vector<1x256xf32> to vector<8x256xf32>
    %538 = arith.addf %533, %537 : vector<8x256xf32>
    %cst_181 = arith.constant 0.000000e+00 : f32
    %539 = vector.broadcast %cst_181 : f32 to vector<8x256xf32>
    %540 = arith.maximumf %538, %539 : vector<8x256xf32>
    %c4_182 = arith.constant 4 : index
    %c0_183 = arith.constant 0 : index
    %c0_184 = arith.constant 0 : index
    %541 = vector.load %arg4[%c4_182, %c0_183, %c0_184] : memref<8x256x64xbf16, #tpu.memory_space<vmem>>, vector<1x256x64xbf16>
    %542 = vector.shape_cast %541 : vector<1x256x64xbf16> to vector<256x64xbf16>
    %543 = arith.truncf %540 : vector<8x256xf32> to vector<8x256xbf16>
    %cst_185 = arith.constant dense<0.000000e+00> : vector<8x64xf32>
    %544 = tpu.matmul %543, %542, %cst_185 {dimension_numbers = #tpu.dot_dimension_numbers<[1], [0], [0], [1], [0, 0, 1, 1], [], []>} : vector<8x256xbf16>, vector<256x64xbf16>, vector<8x64xf32> -> vector<8x64xf32>
    %c39 = arith.constant 39 : index
    %c0_186 = arith.constant 0 : index
    %545 = vector.load %arg8[%c39, %c0_186] : memref<71x64xf32, #tpu.memory_space<vmem>>, vector<1x64xf32>
    %546 = vector.shape_cast %545 : vector<1x64xf32> to vector<64xf32>
    %547 = vector.shape_cast %546 : vector<64xf32> to vector<1x64xf32>
    %548 = vector.broadcast %547 : vector<1x64xf32> to vector<8x64xf32>
    %549 = arith.addf %544, %548 : vector<8x64xf32>
    %550 = arith.addf %529, %549 : vector<8x64xf32>
    %c40 = arith.constant 40 : index
    %c0_187 = arith.constant 0 : index
    %551 = vector.load %arg8[%c40, %c0_187] : memref<71x64xf32, #tpu.memory_space<vmem>>, vector<1x64xf32>
    %552 = vector.shape_cast %551 : vector<1x64xf32> to vector<64xf32>
    %c41 = arith.constant 41 : index
    %c0_188 = arith.constant 0 : index
    %553 = vector.load %arg8[%c41, %c0_188] : memref<71x64xf32, #tpu.memory_space<vmem>>, vector<1x64xf32>
    %554 = vector.shape_cast %553 : vector<1x64xf32> to vector<64xf32>
    %cst_189 = arith.constant dense<0.000000e+00> : vector<8xf32>
    %555 = vector.multi_reduction <add>, %550, %cst_189 [1] : vector<8x64xf32> to vector<8xf32>
    %556 = vector.shape_cast %555 : vector<8xf32> to vector<8x1xf32>
    %cst_190 = arith.constant 6.400000e+01 : f32
    %557 = vector.broadcast %cst_190 : f32 to vector<8x1xf32>
    %558 = arith.divf %556, %557 : vector<8x1xf32>
    %559 = vector.broadcast %558 : vector<8x1xf32> to vector<8x64xf32>
    %560 = arith.subf %550, %559 : vector<8x64xf32>
    %561 = arith.mulf %560, %560 : vector<8x64xf32>
    %cst_191 = arith.constant dense<0.000000e+00> : vector<8xf32>
    %562 = vector.multi_reduction <add>, %561, %cst_191 [1] : vector<8x64xf32> to vector<8xf32>
    %563 = vector.shape_cast %562 : vector<8xf32> to vector<8x1xf32>
    %cst_192 = arith.constant 6.400000e+01 : f32
    %564 = vector.broadcast %cst_192 : f32 to vector<8x1xf32>
    %565 = arith.divf %563, %564 : vector<8x1xf32>
    %566 = vector.broadcast %558 : vector<8x1xf32> to vector<8x64xf32>
    %567 = arith.subf %550, %566 : vector<8x64xf32>
    %cst_193 = arith.constant 9.99999974E-6 : f32
    %568 = vector.broadcast %cst_193 : f32 to vector<8x1xf32>
    %569 = arith.addf %565, %568 : vector<8x1xf32>
    %570 = math.rsqrt %569 : vector<8x1xf32>
    %571 = vector.broadcast %570 : vector<8x1xf32> to vector<8x64xf32>
    %572 = arith.mulf %567, %571 : vector<8x64xf32>
    %573 = vector.shape_cast %552 : vector<64xf32> to vector<1x64xf32>
    %574 = vector.broadcast %573 : vector<1x64xf32> to vector<8x64xf32>
    %575 = arith.mulf %572, %574 : vector<8x64xf32>
    %576 = vector.shape_cast %554 : vector<64xf32> to vector<1x64xf32>
    %577 = vector.broadcast %576 : vector<1x64xf32> to vector<8x64xf32>
    %578 = arith.addf %575, %577 : vector<8x64xf32>
    %c5_194 = arith.constant 5 : index
    %c0_195 = arith.constant 0 : index
    %c0_196 = arith.constant 0 : index
    %579 = vector.load %arg2[%c5_194, %c0_195, %c0_196] : memref<8x64x64xbf16, #tpu.memory_space<vmem>>, vector<1x64x64xbf16>
    %580 = vector.shape_cast %579 : vector<1x64x64xbf16> to vector<64x64xbf16>
    %581 = arith.truncf %578 : vector<8x64xf32> to vector<8x64xbf16>
    %cst_197 = arith.constant dense<0.000000e+00> : vector<8x64xf32>
    %582 = tpu.matmul %581, %580, %cst_197 {dimension_numbers = #tpu.dot_dimension_numbers<[1], [0], [0], [1], [0, 0, 1, 1], [], []>} : vector<8x64xbf16>, vector<64x64xbf16>, vector<8x64xf32> -> vector<8x64xf32>
    %c42 = arith.constant 42 : index
    %c0_198 = arith.constant 0 : index
    %583 = vector.load %arg8[%c42, %c0_198] : memref<71x64xf32, #tpu.memory_space<vmem>>, vector<1x64xf32>
    %584 = vector.shape_cast %583 : vector<1x64xf32> to vector<64xf32>
    %585 = vector.shape_cast %584 : vector<64xf32> to vector<1x64xf32>
    %586 = vector.broadcast %585 : vector<1x64xf32> to vector<8x64xf32>
    %587 = arith.addf %582, %586 : vector<8x64xf32>
    %588 = arith.addf %578, %587 : vector<8x64xf32>
    %c43 = arith.constant 43 : index
    %c0_199 = arith.constant 0 : index
    %589 = vector.load %arg8[%c43, %c0_199] : memref<71x64xf32, #tpu.memory_space<vmem>>, vector<1x64xf32>
    %590 = vector.shape_cast %589 : vector<1x64xf32> to vector<64xf32>
    %c44 = arith.constant 44 : index
    %c0_200 = arith.constant 0 : index
    %591 = vector.load %arg8[%c44, %c0_200] : memref<71x64xf32, #tpu.memory_space<vmem>>, vector<1x64xf32>
    %592 = vector.shape_cast %591 : vector<1x64xf32> to vector<64xf32>
    %cst_201 = arith.constant dense<0.000000e+00> : vector<8xf32>
    %593 = vector.multi_reduction <add>, %588, %cst_201 [1] : vector<8x64xf32> to vector<8xf32>
    %594 = vector.shape_cast %593 : vector<8xf32> to vector<8x1xf32>
    %cst_202 = arith.constant 6.400000e+01 : f32
    %595 = vector.broadcast %cst_202 : f32 to vector<8x1xf32>
    %596 = arith.divf %594, %595 : vector<8x1xf32>
    %597 = vector.broadcast %596 : vector<8x1xf32> to vector<8x64xf32>
    %598 = arith.subf %588, %597 : vector<8x64xf32>
    %599 = arith.mulf %598, %598 : vector<8x64xf32>
    %cst_203 = arith.constant dense<0.000000e+00> : vector<8xf32>
    %600 = vector.multi_reduction <add>, %599, %cst_203 [1] : vector<8x64xf32> to vector<8xf32>
    %601 = vector.shape_cast %600 : vector<8xf32> to vector<8x1xf32>
    %cst_204 = arith.constant 6.400000e+01 : f32
    %602 = vector.broadcast %cst_204 : f32 to vector<8x1xf32>
    %603 = arith.divf %601, %602 : vector<8x1xf32>
    %604 = vector.broadcast %596 : vector<8x1xf32> to vector<8x64xf32>
    %605 = arith.subf %588, %604 : vector<8x64xf32>
    %cst_205 = arith.constant 9.99999974E-6 : f32
    %606 = vector.broadcast %cst_205 : f32 to vector<8x1xf32>
    %607 = arith.addf %603, %606 : vector<8x1xf32>
    %608 = math.rsqrt %607 : vector<8x1xf32>
    %609 = vector.broadcast %608 : vector<8x1xf32> to vector<8x64xf32>
    %610 = arith.mulf %605, %609 : vector<8x64xf32>
    %611 = vector.shape_cast %590 : vector<64xf32> to vector<1x64xf32>
    %612 = vector.broadcast %611 : vector<1x64xf32> to vector<8x64xf32>
    %613 = arith.mulf %610, %612 : vector<8x64xf32>
    %614 = vector.shape_cast %592 : vector<64xf32> to vector<1x64xf32>
    %615 = vector.broadcast %614 : vector<1x64xf32> to vector<8x64xf32>
    %616 = arith.addf %613, %615 : vector<8x64xf32>
    %617 = vector.extract_strided_slice %212 {offsets = [0, 192], sizes = [8, 64], strides = [1, 1]} : vector<8x384xf32> to vector<8x64xf32>
    %c45 = arith.constant 45 : index
    %c0_206 = arith.constant 0 : index
    %618 = vector.load %arg8[%c45, %c0_206] : memref<71x64xf32, #tpu.memory_space<vmem>>, vector<1x64xf32>
    %619 = vector.shape_cast %618 : vector<1x64xf32> to vector<64xf32>
    %620 = vector.shape_cast %619 : vector<64xf32> to vector<1x64xf32>
    %621 = vector.broadcast %620 : vector<1x64xf32> to vector<8x64xf32>
    %622 = arith.addf %617, %621 : vector<8x64xf32>
    %623 = arith.addf %616, %622 : vector<8x64xf32>
    %c46 = arith.constant 46 : index
    %c0_207 = arith.constant 0 : index
    %624 = vector.load %arg8[%c46, %c0_207] : memref<71x64xf32, #tpu.memory_space<vmem>>, vector<1x64xf32>
    %625 = vector.shape_cast %624 : vector<1x64xf32> to vector<64xf32>
    %c47 = arith.constant 47 : index
    %c0_208 = arith.constant 0 : index
    %626 = vector.load %arg8[%c47, %c0_208] : memref<71x64xf32, #tpu.memory_space<vmem>>, vector<1x64xf32>
    %627 = vector.shape_cast %626 : vector<1x64xf32> to vector<64xf32>
    %cst_209 = arith.constant dense<0.000000e+00> : vector<8xf32>
    %628 = vector.multi_reduction <add>, %623, %cst_209 [1] : vector<8x64xf32> to vector<8xf32>
    %629 = vector.shape_cast %628 : vector<8xf32> to vector<8x1xf32>
    %cst_210 = arith.constant 6.400000e+01 : f32
    %630 = vector.broadcast %cst_210 : f32 to vector<8x1xf32>
    %631 = arith.divf %629, %630 : vector<8x1xf32>
    %632 = vector.broadcast %631 : vector<8x1xf32> to vector<8x64xf32>
    %633 = arith.subf %623, %632 : vector<8x64xf32>
    %634 = arith.mulf %633, %633 : vector<8x64xf32>
    %cst_211 = arith.constant dense<0.000000e+00> : vector<8xf32>
    %635 = vector.multi_reduction <add>, %634, %cst_211 [1] : vector<8x64xf32> to vector<8xf32>
    %636 = vector.shape_cast %635 : vector<8xf32> to vector<8x1xf32>
    %cst_212 = arith.constant 6.400000e+01 : f32
    %637 = vector.broadcast %cst_212 : f32 to vector<8x1xf32>
    %638 = arith.divf %636, %637 : vector<8x1xf32>
    %639 = vector.broadcast %631 : vector<8x1xf32> to vector<8x64xf32>
    %640 = arith.subf %623, %639 : vector<8x64xf32>
    %cst_213 = arith.constant 9.99999974E-6 : f32
    %641 = vector.broadcast %cst_213 : f32 to vector<8x1xf32>
    %642 = arith.addf %638, %641 : vector<8x1xf32>
    %643 = math.rsqrt %642 : vector<8x1xf32>
    %644 = vector.broadcast %643 : vector<8x1xf32> to vector<8x64xf32>
    %645 = arith.mulf %640, %644 : vector<8x64xf32>
    %646 = vector.shape_cast %625 : vector<64xf32> to vector<1x64xf32>
    %647 = vector.broadcast %646 : vector<1x64xf32> to vector<8x64xf32>
    %648 = arith.mulf %645, %647 : vector<8x64xf32>
    %649 = vector.shape_cast %627 : vector<64xf32> to vector<1x64xf32>
    %650 = vector.broadcast %649 : vector<1x64xf32> to vector<8x64xf32>
    %651 = arith.addf %648, %650 : vector<8x64xf32>
    %c5_214 = arith.constant 5 : index
    %c0_215 = arith.constant 0 : index
    %c0_216 = arith.constant 0 : index
    %652 = vector.load %arg3[%c5_214, %c0_215, %c0_216] : memref<8x64x256xbf16, #tpu.memory_space<vmem>>, vector<1x64x256xbf16>
    %653 = vector.shape_cast %652 : vector<1x64x256xbf16> to vector<64x256xbf16>
    %654 = arith.truncf %651 : vector<8x64xf32> to vector<8x64xbf16>
    %cst_217 = arith.constant dense<0.000000e+00> : vector<8x256xf32>
    %655 = tpu.matmul %654, %653, %cst_217 {dimension_numbers = #tpu.dot_dimension_numbers<[1], [0], [0], [1], [0, 0, 1, 1], [], []>} : vector<8x64xbf16>, vector<64x256xbf16>, vector<8x256xf32> -> vector<8x256xf32>
    %c5_218 = arith.constant 5 : index
    %c0_219 = arith.constant 0 : index
    %656 = vector.load %arg9[%c5_218, %c0_219] : memref<8x256xf32, #tpu.memory_space<vmem>>, vector<1x256xf32>
    %657 = vector.shape_cast %656 : vector<1x256xf32> to vector<256xf32>
    %658 = vector.shape_cast %657 : vector<256xf32> to vector<1x256xf32>
    %659 = vector.broadcast %658 : vector<1x256xf32> to vector<8x256xf32>
    %660 = arith.addf %655, %659 : vector<8x256xf32>
    %cst_220 = arith.constant 0.000000e+00 : f32
    %661 = vector.broadcast %cst_220 : f32 to vector<8x256xf32>
    %662 = arith.maximumf %660, %661 : vector<8x256xf32>
    %c5_221 = arith.constant 5 : index
    %c0_222 = arith.constant 0 : index
    %c0_223 = arith.constant 0 : index
    %663 = vector.load %arg4[%c5_221, %c0_222, %c0_223] : memref<8x256x64xbf16, #tpu.memory_space<vmem>>, vector<1x256x64xbf16>
    %664 = vector.shape_cast %663 : vector<1x256x64xbf16> to vector<256x64xbf16>
    %665 = arith.truncf %662 : vector<8x256xf32> to vector<8x256xbf16>
    %cst_224 = arith.constant dense<0.000000e+00> : vector<8x64xf32>
    %666 = tpu.matmul %665, %664, %cst_224 {dimension_numbers = #tpu.dot_dimension_numbers<[1], [0], [0], [1], [0, 0, 1, 1], [], []>} : vector<8x256xbf16>, vector<256x64xbf16>, vector<8x64xf32> -> vector<8x64xf32>
    %c48 = arith.constant 48 : index
    %c0_225 = arith.constant 0 : index
    %667 = vector.load %arg8[%c48, %c0_225] : memref<71x64xf32, #tpu.memory_space<vmem>>, vector<1x64xf32>
    %668 = vector.shape_cast %667 : vector<1x64xf32> to vector<64xf32>
    %669 = vector.shape_cast %668 : vector<64xf32> to vector<1x64xf32>
    %670 = vector.broadcast %669 : vector<1x64xf32> to vector<8x64xf32>
    %671 = arith.addf %666, %670 : vector<8x64xf32>
    %672 = arith.addf %651, %671 : vector<8x64xf32>
    %c49 = arith.constant 49 : index
    %c0_226 = arith.constant 0 : index
    %673 = vector.load %arg8[%c49, %c0_226] : memref<71x64xf32, #tpu.memory_space<vmem>>, vector<1x64xf32>
    %674 = vector.shape_cast %673 : vector<1x64xf32> to vector<64xf32>
    %c50 = arith.constant 50 : index
    %c0_227 = arith.constant 0 : index
    %675 = vector.load %arg8[%c50, %c0_227] : memref<71x64xf32, #tpu.memory_space<vmem>>, vector<1x64xf32>
    %676 = vector.shape_cast %675 : vector<1x64xf32> to vector<64xf32>
    %cst_228 = arith.constant dense<0.000000e+00> : vector<8xf32>
    %677 = vector.multi_reduction <add>, %672, %cst_228 [1] : vector<8x64xf32> to vector<8xf32>
    %678 = vector.shape_cast %677 : vector<8xf32> to vector<8x1xf32>
    %cst_229 = arith.constant 6.400000e+01 : f32
    %679 = vector.broadcast %cst_229 : f32 to vector<8x1xf32>
    %680 = arith.divf %678, %679 : vector<8x1xf32>
    %681 = vector.broadcast %680 : vector<8x1xf32> to vector<8x64xf32>
    %682 = arith.subf %672, %681 : vector<8x64xf32>
    %683 = arith.mulf %682, %682 : vector<8x64xf32>
    %cst_230 = arith.constant dense<0.000000e+00> : vector<8xf32>
    %684 = vector.multi_reduction <add>, %683, %cst_230 [1] : vector<8x64xf32> to vector<8xf32>
    %685 = vector.shape_cast %684 : vector<8xf32> to vector<8x1xf32>
    %cst_231 = arith.constant 6.400000e+01 : f32
    %686 = vector.broadcast %cst_231 : f32 to vector<8x1xf32>
    %687 = arith.divf %685, %686 : vector<8x1xf32>
    %688 = vector.broadcast %680 : vector<8x1xf32> to vector<8x64xf32>
    %689 = arith.subf %672, %688 : vector<8x64xf32>
    %cst_232 = arith.constant 9.99999974E-6 : f32
    %690 = vector.broadcast %cst_232 : f32 to vector<8x1xf32>
    %691 = arith.addf %687, %690 : vector<8x1xf32>
    %692 = math.rsqrt %691 : vector<8x1xf32>
    %693 = vector.broadcast %692 : vector<8x1xf32> to vector<8x64xf32>
    %694 = arith.mulf %689, %693 : vector<8x64xf32>
    %695 = vector.shape_cast %674 : vector<64xf32> to vector<1x64xf32>
    %696 = vector.broadcast %695 : vector<1x64xf32> to vector<8x64xf32>
    %697 = arith.mulf %694, %696 : vector<8x64xf32>
    %698 = vector.shape_cast %676 : vector<64xf32> to vector<1x64xf32>
    %699 = vector.broadcast %698 : vector<1x64xf32> to vector<8x64xf32>
    %700 = arith.addf %697, %699 : vector<8x64xf32>
    %c6_233 = arith.constant 6 : index
    %c0_234 = arith.constant 0 : index
    %c0_235 = arith.constant 0 : index
    %701 = vector.load %arg2[%c6_233, %c0_234, %c0_235] : memref<8x64x64xbf16, #tpu.memory_space<vmem>>, vector<1x64x64xbf16>
    %702 = vector.shape_cast %701 : vector<1x64x64xbf16> to vector<64x64xbf16>
    %703 = arith.truncf %700 : vector<8x64xf32> to vector<8x64xbf16>
    %cst_236 = arith.constant dense<0.000000e+00> : vector<8x64xf32>
    %704 = tpu.matmul %703, %702, %cst_236 {dimension_numbers = #tpu.dot_dimension_numbers<[1], [0], [0], [1], [0, 0, 1, 1], [], []>} : vector<8x64xbf16>, vector<64x64xbf16>, vector<8x64xf32> -> vector<8x64xf32>
    %c51 = arith.constant 51 : index
    %c0_237 = arith.constant 0 : index
    %705 = vector.load %arg8[%c51, %c0_237] : memref<71x64xf32, #tpu.memory_space<vmem>>, vector<1x64xf32>
    %706 = vector.shape_cast %705 : vector<1x64xf32> to vector<64xf32>
    %707 = vector.shape_cast %706 : vector<64xf32> to vector<1x64xf32>
    %708 = vector.broadcast %707 : vector<1x64xf32> to vector<8x64xf32>
    %709 = arith.addf %704, %708 : vector<8x64xf32>
    %710 = arith.addf %700, %709 : vector<8x64xf32>
    %c52 = arith.constant 52 : index
    %c0_238 = arith.constant 0 : index
    %711 = vector.load %arg8[%c52, %c0_238] : memref<71x64xf32, #tpu.memory_space<vmem>>, vector<1x64xf32>
    %712 = vector.shape_cast %711 : vector<1x64xf32> to vector<64xf32>
    %c53 = arith.constant 53 : index
    %c0_239 = arith.constant 0 : index
    %713 = vector.load %arg8[%c53, %c0_239] : memref<71x64xf32, #tpu.memory_space<vmem>>, vector<1x64xf32>
    %714 = vector.shape_cast %713 : vector<1x64xf32> to vector<64xf32>
    %cst_240 = arith.constant dense<0.000000e+00> : vector<8xf32>
    %715 = vector.multi_reduction <add>, %710, %cst_240 [1] : vector<8x64xf32> to vector<8xf32>
    %716 = vector.shape_cast %715 : vector<8xf32> to vector<8x1xf32>
    %cst_241 = arith.constant 6.400000e+01 : f32
    %717 = vector.broadcast %cst_241 : f32 to vector<8x1xf32>
    %718 = arith.divf %716, %717 : vector<8x1xf32>
    %719 = vector.broadcast %718 : vector<8x1xf32> to vector<8x64xf32>
    %720 = arith.subf %710, %719 : vector<8x64xf32>
    %721 = arith.mulf %720, %720 : vector<8x64xf32>
    %cst_242 = arith.constant dense<0.000000e+00> : vector<8xf32>
    %722 = vector.multi_reduction <add>, %721, %cst_242 [1] : vector<8x64xf32> to vector<8xf32>
    %723 = vector.shape_cast %722 : vector<8xf32> to vector<8x1xf32>
    %cst_243 = arith.constant 6.400000e+01 : f32
    %724 = vector.broadcast %cst_243 : f32 to vector<8x1xf32>
    %725 = arith.divf %723, %724 : vector<8x1xf32>
    %726 = vector.broadcast %718 : vector<8x1xf32> to vector<8x64xf32>
    %727 = arith.subf %710, %726 : vector<8x64xf32>
    %cst_244 = arith.constant 9.99999974E-6 : f32
    %728 = vector.broadcast %cst_244 : f32 to vector<8x1xf32>
    %729 = arith.addf %725, %728 : vector<8x1xf32>
    %730 = math.rsqrt %729 : vector<8x1xf32>
    %731 = vector.broadcast %730 : vector<8x1xf32> to vector<8x64xf32>
    %732 = arith.mulf %727, %731 : vector<8x64xf32>
    %733 = vector.shape_cast %712 : vector<64xf32> to vector<1x64xf32>
    %734 = vector.broadcast %733 : vector<1x64xf32> to vector<8x64xf32>
    %735 = arith.mulf %732, %734 : vector<8x64xf32>
    %736 = vector.shape_cast %714 : vector<64xf32> to vector<1x64xf32>
    %737 = vector.broadcast %736 : vector<1x64xf32> to vector<8x64xf32>
    %738 = arith.addf %735, %737 : vector<8x64xf32>
    %739 = vector.extract_strided_slice %212 {offsets = [0, 256], sizes = [8, 64], strides = [1, 1]} : vector<8x384xf32> to vector<8x64xf32>
    %c54 = arith.constant 54 : index
    %c0_245 = arith.constant 0 : index
    %740 = vector.load %arg8[%c54, %c0_245] : memref<71x64xf32, #tpu.memory_space<vmem>>, vector<1x64xf32>
    %741 = vector.shape_cast %740 : vector<1x64xf32> to vector<64xf32>
    %742 = vector.shape_cast %741 : vector<64xf32> to vector<1x64xf32>
    %743 = vector.broadcast %742 : vector<1x64xf32> to vector<8x64xf32>
    %744 = arith.addf %739, %743 : vector<8x64xf32>
    %745 = arith.addf %738, %744 : vector<8x64xf32>
    %c55 = arith.constant 55 : index
    %c0_246 = arith.constant 0 : index
    %746 = vector.load %arg8[%c55, %c0_246] : memref<71x64xf32, #tpu.memory_space<vmem>>, vector<1x64xf32>
    %747 = vector.shape_cast %746 : vector<1x64xf32> to vector<64xf32>
    %c56 = arith.constant 56 : index
    %c0_247 = arith.constant 0 : index
    %748 = vector.load %arg8[%c56, %c0_247] : memref<71x64xf32, #tpu.memory_space<vmem>>, vector<1x64xf32>
    %749 = vector.shape_cast %748 : vector<1x64xf32> to vector<64xf32>
    %cst_248 = arith.constant dense<0.000000e+00> : vector<8xf32>
    %750 = vector.multi_reduction <add>, %745, %cst_248 [1] : vector<8x64xf32> to vector<8xf32>
    %751 = vector.shape_cast %750 : vector<8xf32> to vector<8x1xf32>
    %cst_249 = arith.constant 6.400000e+01 : f32
    %752 = vector.broadcast %cst_249 : f32 to vector<8x1xf32>
    %753 = arith.divf %751, %752 : vector<8x1xf32>
    %754 = vector.broadcast %753 : vector<8x1xf32> to vector<8x64xf32>
    %755 = arith.subf %745, %754 : vector<8x64xf32>
    %756 = arith.mulf %755, %755 : vector<8x64xf32>
    %cst_250 = arith.constant dense<0.000000e+00> : vector<8xf32>
    %757 = vector.multi_reduction <add>, %756, %cst_250 [1] : vector<8x64xf32> to vector<8xf32>
    %758 = vector.shape_cast %757 : vector<8xf32> to vector<8x1xf32>
    %cst_251 = arith.constant 6.400000e+01 : f32
    %759 = vector.broadcast %cst_251 : f32 to vector<8x1xf32>
    %760 = arith.divf %758, %759 : vector<8x1xf32>
    %761 = vector.broadcast %753 : vector<8x1xf32> to vector<8x64xf32>
    %762 = arith.subf %745, %761 : vector<8x64xf32>
    %cst_252 = arith.constant 9.99999974E-6 : f32
    %763 = vector.broadcast %cst_252 : f32 to vector<8x1xf32>
    %764 = arith.addf %760, %763 : vector<8x1xf32>
    %765 = math.rsqrt %764 : vector<8x1xf32>
    %766 = vector.broadcast %765 : vector<8x1xf32> to vector<8x64xf32>
    %767 = arith.mulf %762, %766 : vector<8x64xf32>
    %768 = vector.shape_cast %747 : vector<64xf32> to vector<1x64xf32>
    %769 = vector.broadcast %768 : vector<1x64xf32> to vector<8x64xf32>
    %770 = arith.mulf %767, %769 : vector<8x64xf32>
    %771 = vector.shape_cast %749 : vector<64xf32> to vector<1x64xf32>
    %772 = vector.broadcast %771 : vector<1x64xf32> to vector<8x64xf32>
    %773 = arith.addf %770, %772 : vector<8x64xf32>
    %c6_253 = arith.constant 6 : index
    %c0_254 = arith.constant 0 : index
    %c0_255 = arith.constant 0 : index
    %774 = vector.load %arg3[%c6_253, %c0_254, %c0_255] : memref<8x64x256xbf16, #tpu.memory_space<vmem>>, vector<1x64x256xbf16>
    %775 = vector.shape_cast %774 : vector<1x64x256xbf16> to vector<64x256xbf16>
    %776 = arith.truncf %773 : vector<8x64xf32> to vector<8x64xbf16>
    %cst_256 = arith.constant dense<0.000000e+00> : vector<8x256xf32>
    %777 = tpu.matmul %776, %775, %cst_256 {dimension_numbers = #tpu.dot_dimension_numbers<[1], [0], [0], [1], [0, 0, 1, 1], [], []>} : vector<8x64xbf16>, vector<64x256xbf16>, vector<8x256xf32> -> vector<8x256xf32>
    %c6_257 = arith.constant 6 : index
    %c0_258 = arith.constant 0 : index
    %778 = vector.load %arg9[%c6_257, %c0_258] : memref<8x256xf32, #tpu.memory_space<vmem>>, vector<1x256xf32>
    %779 = vector.shape_cast %778 : vector<1x256xf32> to vector<256xf32>
    %780 = vector.shape_cast %779 : vector<256xf32> to vector<1x256xf32>
    %781 = vector.broadcast %780 : vector<1x256xf32> to vector<8x256xf32>
    %782 = arith.addf %777, %781 : vector<8x256xf32>
    %cst_259 = arith.constant 0.000000e+00 : f32
    %783 = vector.broadcast %cst_259 : f32 to vector<8x256xf32>
    %784 = arith.maximumf %782, %783 : vector<8x256xf32>
    %c6_260 = arith.constant 6 : index
    %c0_261 = arith.constant 0 : index
    %c0_262 = arith.constant 0 : index
    %785 = vector.load %arg4[%c6_260, %c0_261, %c0_262] : memref<8x256x64xbf16, #tpu.memory_space<vmem>>, vector<1x256x64xbf16>
    %786 = vector.shape_cast %785 : vector<1x256x64xbf16> to vector<256x64xbf16>
    %787 = arith.truncf %784 : vector<8x256xf32> to vector<8x256xbf16>
    %cst_263 = arith.constant dense<0.000000e+00> : vector<8x64xf32>
    %788 = tpu.matmul %787, %786, %cst_263 {dimension_numbers = #tpu.dot_dimension_numbers<[1], [0], [0], [1], [0, 0, 1, 1], [], []>} : vector<8x256xbf16>, vector<256x64xbf16>, vector<8x64xf32> -> vector<8x64xf32>
    %c57 = arith.constant 57 : index
    %c0_264 = arith.constant 0 : index
    %789 = vector.load %arg8[%c57, %c0_264] : memref<71x64xf32, #tpu.memory_space<vmem>>, vector<1x64xf32>
    %790 = vector.shape_cast %789 : vector<1x64xf32> to vector<64xf32>
    %791 = vector.shape_cast %790 : vector<64xf32> to vector<1x64xf32>
    %792 = vector.broadcast %791 : vector<1x64xf32> to vector<8x64xf32>
    %793 = arith.addf %788, %792 : vector<8x64xf32>
    %794 = arith.addf %773, %793 : vector<8x64xf32>
    %c58 = arith.constant 58 : index
    %c0_265 = arith.constant 0 : index
    %795 = vector.load %arg8[%c58, %c0_265] : memref<71x64xf32, #tpu.memory_space<vmem>>, vector<1x64xf32>
    %796 = vector.shape_cast %795 : vector<1x64xf32> to vector<64xf32>
    %c59 = arith.constant 59 : index
    %c0_266 = arith.constant 0 : index
    %797 = vector.load %arg8[%c59, %c0_266] : memref<71x64xf32, #tpu.memory_space<vmem>>, vector<1x64xf32>
    %798 = vector.shape_cast %797 : vector<1x64xf32> to vector<64xf32>
    %cst_267 = arith.constant dense<0.000000e+00> : vector<8xf32>
    %799 = vector.multi_reduction <add>, %794, %cst_267 [1] : vector<8x64xf32> to vector<8xf32>
    %800 = vector.shape_cast %799 : vector<8xf32> to vector<8x1xf32>
    %cst_268 = arith.constant 6.400000e+01 : f32
    %801 = vector.broadcast %cst_268 : f32 to vector<8x1xf32>
    %802 = arith.divf %800, %801 : vector<8x1xf32>
    %803 = vector.broadcast %802 : vector<8x1xf32> to vector<8x64xf32>
    %804 = arith.subf %794, %803 : vector<8x64xf32>
    %805 = arith.mulf %804, %804 : vector<8x64xf32>
    %cst_269 = arith.constant dense<0.000000e+00> : vector<8xf32>
    %806 = vector.multi_reduction <add>, %805, %cst_269 [1] : vector<8x64xf32> to vector<8xf32>
    %807 = vector.shape_cast %806 : vector<8xf32> to vector<8x1xf32>
    %cst_270 = arith.constant 6.400000e+01 : f32
    %808 = vector.broadcast %cst_270 : f32 to vector<8x1xf32>
    %809 = arith.divf %807, %808 : vector<8x1xf32>
    %810 = vector.broadcast %802 : vector<8x1xf32> to vector<8x64xf32>
    %811 = arith.subf %794, %810 : vector<8x64xf32>
    %cst_271 = arith.constant 9.99999974E-6 : f32
    %812 = vector.broadcast %cst_271 : f32 to vector<8x1xf32>
    %813 = arith.addf %809, %812 : vector<8x1xf32>
    %814 = math.rsqrt %813 : vector<8x1xf32>
    %815 = vector.broadcast %814 : vector<8x1xf32> to vector<8x64xf32>
    %816 = arith.mulf %811, %815 : vector<8x64xf32>
    %817 = vector.shape_cast %796 : vector<64xf32> to vector<1x64xf32>
    %818 = vector.broadcast %817 : vector<1x64xf32> to vector<8x64xf32>
    %819 = arith.mulf %816, %818 : vector<8x64xf32>
    %820 = vector.shape_cast %798 : vector<64xf32> to vector<1x64xf32>
    %821 = vector.broadcast %820 : vector<1x64xf32> to vector<8x64xf32>
    %822 = arith.addf %819, %821 : vector<8x64xf32>
    %c7_272 = arith.constant 7 : index
    %c0_273 = arith.constant 0 : index
    %c0_274 = arith.constant 0 : index
    %823 = vector.load %arg2[%c7_272, %c0_273, %c0_274] : memref<8x64x64xbf16, #tpu.memory_space<vmem>>, vector<1x64x64xbf16>
    %824 = vector.shape_cast %823 : vector<1x64x64xbf16> to vector<64x64xbf16>
    %825 = arith.truncf %822 : vector<8x64xf32> to vector<8x64xbf16>
    %cst_275 = arith.constant dense<0.000000e+00> : vector<8x64xf32>
    %826 = tpu.matmul %825, %824, %cst_275 {dimension_numbers = #tpu.dot_dimension_numbers<[1], [0], [0], [1], [0, 0, 1, 1], [], []>} : vector<8x64xbf16>, vector<64x64xbf16>, vector<8x64xf32> -> vector<8x64xf32>
    %c60 = arith.constant 60 : index
    %c0_276 = arith.constant 0 : index
    %827 = vector.load %arg8[%c60, %c0_276] : memref<71x64xf32, #tpu.memory_space<vmem>>, vector<1x64xf32>
    %828 = vector.shape_cast %827 : vector<1x64xf32> to vector<64xf32>
    %829 = vector.shape_cast %828 : vector<64xf32> to vector<1x64xf32>
    %830 = vector.broadcast %829 : vector<1x64xf32> to vector<8x64xf32>
    %831 = arith.addf %826, %830 : vector<8x64xf32>
    %832 = arith.addf %822, %831 : vector<8x64xf32>
    %c61 = arith.constant 61 : index
    %c0_277 = arith.constant 0 : index
    %833 = vector.load %arg8[%c61, %c0_277] : memref<71x64xf32, #tpu.memory_space<vmem>>, vector<1x64xf32>
    %834 = vector.shape_cast %833 : vector<1x64xf32> to vector<64xf32>
    %c62 = arith.constant 62 : index
    %c0_278 = arith.constant 0 : index
    %835 = vector.load %arg8[%c62, %c0_278] : memref<71x64xf32, #tpu.memory_space<vmem>>, vector<1x64xf32>
    %836 = vector.shape_cast %835 : vector<1x64xf32> to vector<64xf32>
    %cst_279 = arith.constant dense<0.000000e+00> : vector<8xf32>
    %837 = vector.multi_reduction <add>, %832, %cst_279 [1] : vector<8x64xf32> to vector<8xf32>
    %838 = vector.shape_cast %837 : vector<8xf32> to vector<8x1xf32>
    %cst_280 = arith.constant 6.400000e+01 : f32
    %839 = vector.broadcast %cst_280 : f32 to vector<8x1xf32>
    %840 = arith.divf %838, %839 : vector<8x1xf32>
    %841 = vector.broadcast %840 : vector<8x1xf32> to vector<8x64xf32>
    %842 = arith.subf %832, %841 : vector<8x64xf32>
    %843 = arith.mulf %842, %842 : vector<8x64xf32>
    %cst_281 = arith.constant dense<0.000000e+00> : vector<8xf32>
    %844 = vector.multi_reduction <add>, %843, %cst_281 [1] : vector<8x64xf32> to vector<8xf32>
    %845 = vector.shape_cast %844 : vector<8xf32> to vector<8x1xf32>
    %cst_282 = arith.constant 6.400000e+01 : f32
    %846 = vector.broadcast %cst_282 : f32 to vector<8x1xf32>
    %847 = arith.divf %845, %846 : vector<8x1xf32>
    %848 = vector.broadcast %840 : vector<8x1xf32> to vector<8x64xf32>
    %849 = arith.subf %832, %848 : vector<8x64xf32>
    %cst_283 = arith.constant 9.99999974E-6 : f32
    %850 = vector.broadcast %cst_283 : f32 to vector<8x1xf32>
    %851 = arith.addf %847, %850 : vector<8x1xf32>
    %852 = math.rsqrt %851 : vector<8x1xf32>
    %853 = vector.broadcast %852 : vector<8x1xf32> to vector<8x64xf32>
    %854 = arith.mulf %849, %853 : vector<8x64xf32>
    %855 = vector.shape_cast %834 : vector<64xf32> to vector<1x64xf32>
    %856 = vector.broadcast %855 : vector<1x64xf32> to vector<8x64xf32>
    %857 = arith.mulf %854, %856 : vector<8x64xf32>
    %858 = vector.shape_cast %836 : vector<64xf32> to vector<1x64xf32>
    %859 = vector.broadcast %858 : vector<1x64xf32> to vector<8x64xf32>
    %860 = arith.addf %857, %859 : vector<8x64xf32>
    %861 = vector.extract_strided_slice %212 {offsets = [0, 320], sizes = [8, 64], strides = [1, 1]} : vector<8x384xf32> to vector<8x64xf32>
    %c63 = arith.constant 63 : index
    %c0_284 = arith.constant 0 : index
    %862 = vector.load %arg8[%c63, %c0_284] : memref<71x64xf32, #tpu.memory_space<vmem>>, vector<1x64xf32>
    %863 = vector.shape_cast %862 : vector<1x64xf32> to vector<64xf32>
    %864 = vector.shape_cast %863 : vector<64xf32> to vector<1x64xf32>
    %865 = vector.broadcast %864 : vector<1x64xf32> to vector<8x64xf32>
    %866 = arith.addf %861, %865 : vector<8x64xf32>
    %867 = arith.addf %860, %866 : vector<8x64xf32>
    %c64 = arith.constant 64 : index
    %c0_285 = arith.constant 0 : index
    %868 = vector.load %arg8[%c64, %c0_285] : memref<71x64xf32, #tpu.memory_space<vmem>>, vector<1x64xf32>
    %869 = vector.shape_cast %868 : vector<1x64xf32> to vector<64xf32>
    %c65 = arith.constant 65 : index
    %c0_286 = arith.constant 0 : index
    %870 = vector.load %arg8[%c65, %c0_286] : memref<71x64xf32, #tpu.memory_space<vmem>>, vector<1x64xf32>
    %871 = vector.shape_cast %870 : vector<1x64xf32> to vector<64xf32>
    %cst_287 = arith.constant dense<0.000000e+00> : vector<8xf32>
    %872 = vector.multi_reduction <add>, %867, %cst_287 [1] : vector<8x64xf32> to vector<8xf32>
    %873 = vector.shape_cast %872 : vector<8xf32> to vector<8x1xf32>
    %cst_288 = arith.constant 6.400000e+01 : f32
    %874 = vector.broadcast %cst_288 : f32 to vector<8x1xf32>
    %875 = arith.divf %873, %874 : vector<8x1xf32>
    %876 = vector.broadcast %875 : vector<8x1xf32> to vector<8x64xf32>
    %877 = arith.subf %867, %876 : vector<8x64xf32>
    %878 = arith.mulf %877, %877 : vector<8x64xf32>
    %cst_289 = arith.constant dense<0.000000e+00> : vector<8xf32>
    %879 = vector.multi_reduction <add>, %878, %cst_289 [1] : vector<8x64xf32> to vector<8xf32>
    %880 = vector.shape_cast %879 : vector<8xf32> to vector<8x1xf32>
    %cst_290 = arith.constant 6.400000e+01 : f32
    %881 = vector.broadcast %cst_290 : f32 to vector<8x1xf32>
    %882 = arith.divf %880, %881 : vector<8x1xf32>
    %883 = vector.broadcast %875 : vector<8x1xf32> to vector<8x64xf32>
    %884 = arith.subf %867, %883 : vector<8x64xf32>
    %cst_291 = arith.constant 9.99999974E-6 : f32
    %885 = vector.broadcast %cst_291 : f32 to vector<8x1xf32>
    %886 = arith.addf %882, %885 : vector<8x1xf32>
    %887 = math.rsqrt %886 : vector<8x1xf32>
    %888 = vector.broadcast %887 : vector<8x1xf32> to vector<8x64xf32>
    %889 = arith.mulf %884, %888 : vector<8x64xf32>
    %890 = vector.shape_cast %869 : vector<64xf32> to vector<1x64xf32>
    %891 = vector.broadcast %890 : vector<1x64xf32> to vector<8x64xf32>
    %892 = arith.mulf %889, %891 : vector<8x64xf32>
    %893 = vector.shape_cast %871 : vector<64xf32> to vector<1x64xf32>
    %894 = vector.broadcast %893 : vector<1x64xf32> to vector<8x64xf32>
    %895 = arith.addf %892, %894 : vector<8x64xf32>
    %c7_292 = arith.constant 7 : index
    %c0_293 = arith.constant 0 : index
    %c0_294 = arith.constant 0 : index
    %896 = vector.load %arg3[%c7_292, %c0_293, %c0_294] : memref<8x64x256xbf16, #tpu.memory_space<vmem>>, vector<1x64x256xbf16>
    %897 = vector.shape_cast %896 : vector<1x64x256xbf16> to vector<64x256xbf16>
    %898 = arith.truncf %895 : vector<8x64xf32> to vector<8x64xbf16>
    %cst_295 = arith.constant dense<0.000000e+00> : vector<8x256xf32>
    %899 = tpu.matmul %898, %897, %cst_295 {dimension_numbers = #tpu.dot_dimension_numbers<[1], [0], [0], [1], [0, 0, 1, 1], [], []>} : vector<8x64xbf16>, vector<64x256xbf16>, vector<8x256xf32> -> vector<8x256xf32>
    %c7_296 = arith.constant 7 : index
    %c0_297 = arith.constant 0 : index
    %900 = vector.load %arg9[%c7_296, %c0_297] : memref<8x256xf32, #tpu.memory_space<vmem>>, vector<1x256xf32>
    %901 = vector.shape_cast %900 : vector<1x256xf32> to vector<256xf32>
    %902 = vector.shape_cast %901 : vector<256xf32> to vector<1x256xf32>
    %903 = vector.broadcast %902 : vector<1x256xf32> to vector<8x256xf32>
    %904 = arith.addf %899, %903 : vector<8x256xf32>
    %cst_298 = arith.constant 0.000000e+00 : f32
    %905 = vector.broadcast %cst_298 : f32 to vector<8x256xf32>
    %906 = arith.maximumf %904, %905 : vector<8x256xf32>
    %c7_299 = arith.constant 7 : index
    %c0_300 = arith.constant 0 : index
    %c0_301 = arith.constant 0 : index
    %907 = vector.load %arg4[%c7_299, %c0_300, %c0_301] : memref<8x256x64xbf16, #tpu.memory_space<vmem>>, vector<1x256x64xbf16>
    %908 = vector.shape_cast %907 : vector<1x256x64xbf16> to vector<256x64xbf16>
    %909 = arith.truncf %906 : vector<8x256xf32> to vector<8x256xbf16>
    %cst_302 = arith.constant dense<0.000000e+00> : vector<8x64xf32>
    %910 = tpu.matmul %909, %908, %cst_302 {dimension_numbers = #tpu.dot_dimension_numbers<[1], [0], [0], [1], [0, 0, 1, 1], [], []>} : vector<8x256xbf16>, vector<256x64xbf16>, vector<8x64xf32> -> vector<8x64xf32>
    %c66 = arith.constant 66 : index
    %c0_303 = arith.constant 0 : index
    %911 = vector.load %arg8[%c66, %c0_303] : memref<71x64xf32, #tpu.memory_space<vmem>>, vector<1x64xf32>
    %912 = vector.shape_cast %911 : vector<1x64xf32> to vector<64xf32>
    %913 = vector.shape_cast %912 : vector<64xf32> to vector<1x64xf32>
    %914 = vector.broadcast %913 : vector<1x64xf32> to vector<8x64xf32>
    %915 = arith.addf %910, %914 : vector<8x64xf32>
    %916 = arith.addf %895, %915 : vector<8x64xf32>
    %c67 = arith.constant 67 : index
    %c0_304 = arith.constant 0 : index
    %917 = vector.load %arg8[%c67, %c0_304] : memref<71x64xf32, #tpu.memory_space<vmem>>, vector<1x64xf32>
    %918 = vector.shape_cast %917 : vector<1x64xf32> to vector<64xf32>
    %c68 = arith.constant 68 : index
    %c0_305 = arith.constant 0 : index
    %919 = vector.load %arg8[%c68, %c0_305] : memref<71x64xf32, #tpu.memory_space<vmem>>, vector<1x64xf32>
    %920 = vector.shape_cast %919 : vector<1x64xf32> to vector<64xf32>
    %cst_306 = arith.constant dense<0.000000e+00> : vector<8xf32>
    %921 = vector.multi_reduction <add>, %916, %cst_306 [1] : vector<8x64xf32> to vector<8xf32>
    %922 = vector.shape_cast %921 : vector<8xf32> to vector<8x1xf32>
    %cst_307 = arith.constant 6.400000e+01 : f32
    %923 = vector.broadcast %cst_307 : f32 to vector<8x1xf32>
    %924 = arith.divf %922, %923 : vector<8x1xf32>
    %925 = vector.broadcast %924 : vector<8x1xf32> to vector<8x64xf32>
    %926 = arith.subf %916, %925 : vector<8x64xf32>
    %927 = arith.mulf %926, %926 : vector<8x64xf32>
    %cst_308 = arith.constant dense<0.000000e+00> : vector<8xf32>
    %928 = vector.multi_reduction <add>, %927, %cst_308 [1] : vector<8x64xf32> to vector<8xf32>
    %929 = vector.shape_cast %928 : vector<8xf32> to vector<8x1xf32>
    %cst_309 = arith.constant 6.400000e+01 : f32
    %930 = vector.broadcast %cst_309 : f32 to vector<8x1xf32>
    %931 = arith.divf %929, %930 : vector<8x1xf32>
    %932 = vector.broadcast %924 : vector<8x1xf32> to vector<8x64xf32>
    %933 = arith.subf %916, %932 : vector<8x64xf32>
    %cst_310 = arith.constant 9.99999974E-6 : f32
    %934 = vector.broadcast %cst_310 : f32 to vector<8x1xf32>
    %935 = arith.addf %931, %934 : vector<8x1xf32>
    %936 = math.rsqrt %935 : vector<8x1xf32>
    %937 = vector.broadcast %936 : vector<8x1xf32> to vector<8x64xf32>
    %938 = arith.mulf %933, %937 : vector<8x64xf32>
    %939 = vector.shape_cast %918 : vector<64xf32> to vector<1x64xf32>
    %940 = vector.broadcast %939 : vector<1x64xf32> to vector<8x64xf32>
    %941 = arith.mulf %938, %940 : vector<8x64xf32>
    %942 = vector.shape_cast %920 : vector<64xf32> to vector<1x64xf32>
    %943 = vector.broadcast %942 : vector<1x64xf32> to vector<8x64xf32>
    %944 = arith.addf %941, %943 : vector<8x64xf32>
    %c69 = arith.constant 69 : index
    %c0_311 = arith.constant 0 : index
    %945 = vector.load %arg8[%c69, %c0_311] : memref<71x64xf32, #tpu.memory_space<vmem>>, vector<1x64xf32>
    %946 = vector.shape_cast %945 : vector<1x64xf32> to vector<64xf32>
    %c70 = arith.constant 70 : index
    %c0_312 = arith.constant 0 : index
    %947 = vector.load %arg8[%c70, %c0_312] : memref<71x64xf32, #tpu.memory_space<vmem>>, vector<1x64xf32>
    %948 = vector.shape_cast %947 : vector<1x64xf32> to vector<64xf32>
    %cst_313 = arith.constant dense<0.000000e+00> : vector<8xf32>
    %949 = vector.multi_reduction <add>, %944, %cst_313 [1] : vector<8x64xf32> to vector<8xf32>
    %950 = vector.shape_cast %949 : vector<8xf32> to vector<8x1xf32>
    %cst_314 = arith.constant 6.400000e+01 : f32
    %951 = vector.broadcast %cst_314 : f32 to vector<8x1xf32>
    %952 = arith.divf %950, %951 : vector<8x1xf32>
    %953 = vector.broadcast %952 : vector<8x1xf32> to vector<8x64xf32>
    %954 = arith.subf %944, %953 : vector<8x64xf32>
    %955 = arith.mulf %954, %954 : vector<8x64xf32>
    %cst_315 = arith.constant dense<0.000000e+00> : vector<8xf32>
    %956 = vector.multi_reduction <add>, %955, %cst_315 [1] : vector<8x64xf32> to vector<8xf32>
    %957 = vector.shape_cast %956 : vector<8xf32> to vector<8x1xf32>
    %cst_316 = arith.constant 6.400000e+01 : f32
    %958 = vector.broadcast %cst_316 : f32 to vector<8x1xf32>
    %959 = arith.divf %957, %958 : vector<8x1xf32>
    %960 = vector.broadcast %952 : vector<8x1xf32> to vector<8x64xf32>
    %961 = arith.subf %944, %960 : vector<8x64xf32>
    %cst_317 = arith.constant 9.99999974E-6 : f32
    %962 = vector.broadcast %cst_317 : f32 to vector<8x1xf32>
    %963 = arith.addf %959, %962 : vector<8x1xf32>
    %964 = math.rsqrt %963 : vector<8x1xf32>
    %965 = vector.broadcast %964 : vector<8x1xf32> to vector<8x64xf32>
    %966 = arith.mulf %961, %965 : vector<8x64xf32>
    %967 = vector.shape_cast %946 : vector<64xf32> to vector<1x64xf32>
    %968 = vector.broadcast %967 : vector<1x64xf32> to vector<8x64xf32>
    %969 = arith.mulf %966, %968 : vector<8x64xf32>
    %970 = vector.shape_cast %948 : vector<64xf32> to vector<1x64xf32>
    %971 = vector.broadcast %970 : vector<1x64xf32> to vector<8x64xf32>
    %972 = arith.addf %969, %971 : vector<8x64xf32>
    %c0_318 = arith.constant 0 : index
    %c0_319 = arith.constant 0 : index
    %973 = vector.load %arg7[%c0_318, %c0_319] : memref<64x1xf32, #tpu.memory_space<vmem>>, vector<64x1xf32>
    %cst_320 = arith.constant dense<0.000000e+00> : vector<8x1xf32>
    %974 = tpu.matmul %972, %973, %cst_320 {dimension_numbers = #tpu.dot_dimension_numbers<[1], [0], [0], [1], [0, 0, 1, 1], [], []>} : vector<8x64xf32>, vector<64x1xf32>, vector<8x1xf32> -> vector<8x1xf32>
    %c0_321 = arith.constant 0 : index
    %c0_322 = arith.constant 0 : index
    %975 = vector.load %arg10[%c0_321, %c0_322] : memref<1x1xf32, #tpu.memory_space<vmem>>, vector<1x1xf32>
    %976 = vector.broadcast %975 : vector<1x1xf32> to vector<8x1xf32>
    %977 = arith.addf %974, %976 : vector<8x1xf32>
    %c0_323 = arith.constant 0 : index
    %c0_324 = arith.constant 0 : index
    %978 = vector.load %arg11[%c0_323, %c0_324] : memref<8x1xf32, #tpu.memory_space<vmem>>, vector<8x1xf32>
    tpu.vector_store %arg11[%c0_323, %c0_324], %977 {strides = array<i32>} : memref<8x1xf32, #tpu.memory_space<vmem>>, vector<8x1xf32>,
    return
  }
  func.func @transform_0(%arg0: i32) -> (i32, i32) {
    %c0_i32 = arith.constant 0 : i32
    %c0_i32_0 = arith.constant 0 : i32
    return %arg0, %c0_i32 : i32, i32
  }
  func.func @transform_1(%arg0: i32) -> (i32, i32, i32) {
    %c0_i32 = arith.constant 0 : i32
    %c0_i32_0 = arith.constant 0 : i32
    %c0_i32_1 = arith.constant 0 : i32
    %c0_i32_2 = arith.constant 0 : i32
    return %c0_i32, %c0_i32_0, %c0_i32_1 : i32, i32, i32
  }
  func.func @transform_2(%arg0: i32) -> (i32, i32, i32) {
    %c0_i32 = arith.constant 0 : i32
    %c0_i32_0 = arith.constant 0 : i32
    %c0_i32_1 = arith.constant 0 : i32
    %c0_i32_2 = arith.constant 0 : i32
    return %c0_i32, %c0_i32_0, %c0_i32_1 : i32, i32, i32
  }
  func.func @transform_3(%arg0: i32) -> (i32, i32, i32) {
    %c0_i32 = arith.constant 0 : i32
    %c0_i32_0 = arith.constant 0 : i32
    %c0_i32_1 = arith.constant 0 : i32
    %c0_i32_2 = arith.constant 0 : i32
    return %c0_i32, %c0_i32_0, %c0_i32_1 : i32, i32, i32
  }
  func.func @transform_4(%arg0: i32) -> (i32, i32) {
    %c0_i32 = arith.constant 0 : i32
    %c0_i32_0 = arith.constant 0 : i32
    %c0_i32_1 = arith.constant 0 : i32
    return %c0_i32, %c0_i32_0 : i32, i32
  }
  func.func @transform_5(%arg0: i32) -> (i32, i32) {
    %c0_i32 = arith.constant 0 : i32
    %c0_i32_0 = arith.constant 0 : i32
    %c0_i32_1 = arith.constant 0 : i32
    return %c0_i32, %c0_i32_0 : i32, i32
  }
  func.func @transform_6(%arg0: i32) -> (i32, i32) {
    %c0_i32 = arith.constant 0 : i32
    %c0_i32_0 = arith.constant 0 : i32
    %c0_i32_1 = arith.constant 0 : i32
    return %c0_i32, %c0_i32_0 : i32, i32
  }
  func.func @transform_7(%arg0: i32) -> (i32, i32) {
    %c0_i32 = arith.constant 0 : i32
    %c0_i32_0 = arith.constant 0 : i32
    %c0_i32_1 = arith.constant 0 : i32
    return %c0_i32, %c0_i32_0 : i32, i32
  }
  func.func @transform_8(%arg0: i32) -> (i32, i32) {
    %c0_i32 = arith.constant 0 : i32
    %c0_i32_0 = arith.constant 0 : i32
    %c0_i32_1 = arith.constant 0 : i32
    return %c0_i32, %c0_i32_0 : i32, i32
  }
  func.func @transform_9(%arg0: i32) -> (i32, i32) {
    %c0_i32 = arith.constant 0 : i32
    %c0_i32_0 = arith.constant 0 : i32
    %c0_i32_1 = arith.constant 0 : i32
    return %c0_i32, %c0_i32_0 : i32, i32
  }
  func.func @transform_10(%arg0: i32) -> (i32, i32) {
    %c0_i32 = arith.constant 0 : i32
    %c0_i32_0 = arith.constant 0 : i32
    return %arg0, %c0_i32 : i32, i32
  }
}

</mosaic_0001>

<bundles_post_ra>
// kernel: tpu_custom_call.1
= control target key start
LH: loop header
LB: loop body
LE: loop exit
PB: predicated region body
PF: predicated region fallthrough
CT: control target
= control target key end

     0   :  { %v5369_v0 = vmov 0.0|0.0   ;;  %vm5370_vm0 = vmmov 0   ;;  %v5371_v3 = vmov 0.0   ;;  %vm46_vm1 = vcmask 130048   ;;  %s5373_s18 = smov 64   ;;  %s6600_s5 = inlined_call_operand.vmem [shape: f32[16,64], index: 5, kind: input, shape index: {}]   ;;  %s6601_s0 = inlined_call_operand.vmem [shape: f32[8,16], index: 0, kind: input, shape index: {}]   ;;  %s6602_s1 = inlined_call_operand.vmem [shape: bf16[8,64,64], index: 1, kind: input, shape index: {}]   ;;  %s6603_s7 = inlined_call_operand.vmem [shape: f32[71,64], index: 7, kind: input, shape index: {}]   ;;  %s6604_s2 = inlined_call_operand.vmem [shape: bf16[8,64,256], index: 2, kind: input, shape index: {}]   ;;  %s6605_s3 = inlined_call_operand.vmem [shape: bf16[8,256,64], index: 3, kind: input, shape index: {}]   ;;  %s6606_s8 = inlined_call_operand.vmem [shape: f32[8,256], index: 8, kind: input, shape index: {}]   ;;  %s6607_s4 = inlined_call_operand.vmem [shape: bf16[64,384], index: 4, kind: input, shape index: {}]   ;;  %s6608_s6 = inlined_call_operand.vmem [shape: f32[64,1], index: 6, kind: input, shape index: {}]   ;;  %s6609_s9 = inlined_call_operand.<no memory space> [shape: f32[1,1], index: 9, kind: input, shape index: {}]   ;;  %s6610_s10 = inlined_call_operand.vmem [shape: f32[8,1], index: 10, kind: output, shape index: {}]  }
   0x1   :  { %5029 = vmatprep.subr.bf16.mxu0 %v5369_v0  ;;  %v39_v1 = vld [vmem:[%s6600_s5] sm:$0xff]  ;;  %v40_v2 = vld [vmem:[%s6600_s5 + $0x8] sm:$0xff]  ;;  %4899 = vmatprep.mubr.msk.f32.mxu0 %vm5370_vm0, %v5371_v3  ;;  %v5051_v8 = vld [vmem:[%s6602_s1 + $0x10] sm:$0xff]   ;;  %vm158_vm2 = vcmask 523264   ;;  %v5372_v36 = vmov 0   ;;  %v240_v63 = vlaneseq  ;;  %vm3985_vm3 = vcmask 7168  }
   0x2   :  { %v5030_v4 = vpack.c.bf16 %v40_v2, %v39_v1  ;;  %4902 = vmatprep.subr.bf16.mxu1 %v5371_v3  ;;  %v5049_v5 = vld [vmem:[%s6602_s1] sm:$0xff]   ;;  %4910 = vmatprep.mubr.msk.bf16.mxu1 %vm5370_vm0, %v5371_v3  ;;  %v5050_v7 = vld [vmem:[%s6602_s1 + $0x8] sm:$0xff]   ;;  %v5052_v9 = vld [vmem:[%s6602_s1 + $0x18] sm:$0xff]  }
   0x3   :  { %v38_v6 = vld [vmem:[%s6601_s0] sm:$0xff]  ;;  %4903 = vmatpush3.bf16.msra.mxu1 %v5049_v5  ;;  %v5058_v30 = vld [vmem:[%s6604_s2 + $0x14] ss:$8 sps:$4 sm:$0xff]   ;;  %v5056_v31 = vld [vmem:[%s6604_s2 + $0x10] ss:$8 sps:$4 sm:$0xff]   ;;  %v241_v1 = vshrl.u32 %v240_v63, 7 }
   0x4   :  { %5031 = vmatpush3.bf16.msra.mxu0 %v5030_v4  ;;  %4904 = vmatprep.subr.bf16.mxu1 %v5371_v3  ;;  %v3991_v10 = vld [vmem:[%s6603_s7] ss:$0 sm:$0xff]  ;;  %v3993_v15 = vld [vmem:[%s6603_s7 + $0x1] ss:$0 sm:$0xff]  ;;  %v5055_v28 = vld [vmem:[%s6604_s2 + $0x4] ss:$8 sps:$4 sm:$0xff]  }
   0x5   :  { %v5053_v29 = vld [vmem:[%s6604_s2] ss:$8 sps:$4 sm:$0xff]   ;;  %293 = vmatprep.subr.bf16.mxu0 %v5055_v28  ;;  %v5061_v32 = vld [vmem:[%s6604_s2 + $0x24] ss:$8 sps:$4 sm:$0xff]   ;;  %v5062_v34 = vld [vmem:[%s6604_s2 + $0x30] ss:$8 sps:$4 sm:$0xff]  }
   0x6   :  { %v5059_v33 = vld [vmem:[%s6604_s2 + $0x20] ss:$8 sps:$4 sm:$0xff]   ;;  %v5064_v35 = vld [vmem:[%s6604_s2 + $0x34] ss:$8 sps:$4 sm:$0xff]   ;;  %v5559_v2 = vsub.s32 0, %v241_v1  ;;  %v5564_v5 = vsub.s32 1, %v241_v1 }
   0x7   :  { %4900 = vmatmul.mubr.msk.f32.vlgmr.msra.gmra.mrb[0].mxu0 %vm46_vm1, %v38_v6  ;;  %4905 = vmatpush3.bf16.msra.mxu1 %v5050_v7  ;;  %v5065_v37 = vld [vmem:[%s6605_s3 + $0x40] sm:$0xff]   ;;  %v5067_v39 = vld [vmem:[%s6605_s3 + $0x48] sm:$0xff]   ;;  %v5069_v41 = vld [vmem:[%s6605_s3 + $0x50] sm:$0xff]  }
   0x8   :  { %4906 = vmatprep.subr.bf16.mxu1 %v5371_v3  ;;  %294 = vmatpush1.bf16.msra.mxu0 %v5053_v29  ;;  %v5066_v38 = vld [vmem:[%s6605_s3] sm:$0xff]   ;;  %v5068_v40 = vld [vmem:[%s6605_s3 + $0x8] sm:$0xff]   ;;  %v5070_v42 = vld [vmem:[%s6605_s3 + $0x10] sm:$0xff]  }
   0x9   :  { %295 = vmatprep.subr.bf16.mxu0 %v5058_v30  ;;  %325 = vmatprep.mubr.bf16.mxu0 %v5372_v36  ;;  %v5071_v43 = vld [vmem:[%s6605_s3 + $0x58] sm:$0xff]   ;;  %v5073_v45 = vld [vmem:[%s6605_s3 + $0x60] sm:$0xff]   ;;  %v5075_v47 = vld [vmem:[%s6605_s3 + $0x68] sm:$0xff]  }
   0xa   :  { %v5072_v44 = vld [vmem:[%s6605_s3 + $0x18] sm:$0xff]   ;;  %v5074_v46 = vld [vmem:[%s6605_s3 + $0x20] sm:$0xff]   ;;  %v5076_v48 = vld [vmem:[%s6605_s3 + $0x28] sm:$0xff]  }
   0xb   :  { %4907 = vmatpush3.bf16.msra.mxu1 %v5051_v8  ;;  %v3999_v53 = vld [vmem:[%s6603_s7 + $0x2] ss:$0 sm:$0xff]  ;;  %v4000_v55 = vld [vmem:[%s6603_s7 + $0x3] ss:$0 sm:$0xff]  ;;  %v5077_v59 = vld [vmem:[%s6605_s3 + $0x70] sm:$0xff]  }
   0xc   :  { %4908 = vmatprep.subr.bf16.mxu1 %v5371_v3  ;;  %296 = vmatpush1.bf16.msra.mxu0 %v5056_v31  ;;  %v5078_v60 = vld [vmem:[%s6605_s3 + $0x30] sm:$0xff]   ;;  %v5079_v61 = vld [vmem:[%s6605_s3 + $0x78] sm:$0xff]   ;;  %v238_v4 = vld [vmem:[%s6606_s8] ss:$8 sm:$0x3] }
   0xd   :  { %297 = vmatprep.subr.bf16.mxu0 %v5061_v32  ;;  %v5080_v62 = vld [vmem:[%s6605_s3 + $0x38] sm:$0xff]   ;;  %v243_v6 = vrot.slane %v238_v4, %v5559_v2  ;;  %v247_v7 = vrot.slane %v238_v4, %v5564_v5  ;;  %v5085_v63 = vld [vmem:[%s6604_s2 + $0x40] ss:$8 sps:$4 sm:$0xff]  }
   0xe   :  { %v5090_v1 = vld [vmem:[%s6604_s2 + $0x54] ss:$8 sps:$4 sm:$0xff]   ;;  %v5088_v4 = vld [vmem:[%s6604_s2 + $0x50] ss:$8 sps:$4 sm:$0xff]  }
   0xf   :  { %4909 = vmatpush3.bf16.msra.mxu1 %v5052_v9 }
  0x10   :  { %298 = vmatpush1.bf16.msra.mxu0 %v5059_v33  ;;  %4670 = vmatprep.subr.bf16.mxu1 %v5065_v37  ;;  %v5083_v37 = vld [vmem:[%s6602_s1 + $0x30] sm:$0xff]  }
  0x11   :  { %299 = vmatprep.subr.bf16.mxu0 %v5064_v35  ;;  %v5082_v35 = vld [vmem:[%s6602_s1 + $0x28] sm:$0xff]  }
  0x14   :  { %300 = vmatpush1.bf16.msra.mxu0 %v5062_v34  ;;  %v5081_v34 = vld [vmem:[%s6602_s1 + $0x20] sm:$0xff]  }
  0x15   :  { %4914 = vmatprep.subr.bf16.mxu0 %v5371_v3 }
  0xda   :  { %v116_v11 = vpop.f32.mrb[0].mxu0 }
  0xdb   :  { %v5462_v12 = vadd.f32 %v3991_v10, %v116_v11  ;;  %v4901_v13 = vpop.f32.mrb[1].mxu0 }
  0xdd   :  { %v5466_v14 = vpack.c.bf16 %v5462_v12, %v5462_v12 }
  0xdf   :  { %4911 = vmatmul.mubr.msk.bf16.vlgmr.msra.gmra.mrb[0].mxu1 %vm158_vm2, %v5466_v14 }
  0xe0   :  { %4671 = vmatpush3.bf16.msra.mxu1 %v5066_v38  ;;  %v5084_v38 = vld [vmem:[%s6602_s1 + $0x38] sm:$0xff]  }
  0xe1   :  { %4672 = vmatprep.subr.bf16.mxu1 %v5067_v39 }
  0xe4   :  { %4673 = vmatpush3.bf16.msra.mxu1 %v5068_v40 }
  0xe5   :  { %4674 = vmatprep.subr.bf16.mxu1 %v5069_v41 }
  0xe8   :  { %4675 = vmatpush3.bf16.msra.mxu1 %v5070_v42 }
  0xe9   :  { %4676 = vmatprep.subr.bf16.mxu1 %v5071_v43  ;;  %v4027_v43 = vld [vmem:[%s6603_s7 + $0x5] ss:$0 sm:$0xff] }
  0xec   :  { %4677 = vmatpush3.bf16.msra.mxu1 %v5072_v44 }
  0xed   :  { %4678 = vmatprep.subr.bf16.mxu1 %v5073_v45  ;;  %v4028_v45 = vld [vmem:[%s6603_s7 + $0x6] ss:$0 sm:$0xff] }
  0xf0   :  { %4679 = vmatpush3.bf16.msra.mxu1 %v5074_v46 }
  0xf1   :  { %4680 = vmatprep.subr.bf16.mxu1 %v5075_v47 }
  0xf4   :  { %4681 = vmatpush3.bf16.msra.mxu1 %v5076_v48 }
  0xf5   :  { %4682 = vmatprep.subr.bf16.mxu1 %v5077_v59 }
  0xf8   :  { %4683 = vmatpush3.bf16.msra.mxu1 %v5078_v60 }
  0xf9   :  { %4684 = vmatprep.subr.bf16.mxu1 %v5079_v61 }
  0xfc   :  { %4685 = vmatpush3.bf16.msra.mxu1 %v5080_v62  ;;  %v5087_v62 = vld [vmem:[%s6604_s2 + $0x44] ss:$8 sps:$4 sm:$0xff]  }
 0x1b2   :  { %v196_v16 = vpop.f32.mrb[0].mxu1 }
 0x1b3   :  { %v197_v17 = vadd.f32 %v3993_v15, %v196_v16  ;;  %v4912_v18 = vpop.f32.mrb[1].mxu1 }
 0x1b4   :  { %v199_v19 = vpop.f32.mrb[2].mxu1 }
 0x1b5   :  { %v4913_v20 = vpop.f32.mrb[3].mxu1  ;;  %v202_v21 = vadd.f32 %v197_v17, %v5462_v12 }
 0x1b7   :  { %v205_v22 = vsel %vm158_vm2, %v202_v21, 0.0 }
 0x1b8   :  { %206 = vadd.xlane.f32.xlu0 %v205_v22 }
 0x245   :  { %v207_v23 = vpop.xlane.xlu0 %206 }
 0x246   :  { %v209_v24 = vmul.f32 0.015625, %v207_v23 }
 0x248   :  { %v210_v25 = vsub.f32 %v202_v21, %v209_v24  ;;  %v4010_v21 = vld [vmem:[%s6603_s7 + $0x4] ss:$0 sm:$0xff] }
 0x24a   :  { %v211_v26 = vmul.f32 %v210_v25, %v210_v25 }
 0x24c   :  { %v212_v27 = vsel %vm158_vm2, %v211_v26, 0.0 }
 0x24d   :  { %213 = vadd.xlane.f32.xlu0 %v212_v27 }
 0x2da   :  { %v214_v49 = vpop.xlane.xlu0 %213 }
 0x2db   :  { %v215_v50 = vmul.f32 0.015625, %v214_v49  ;;  %v4037_v49 = vld [vmem:[%s6603_s7 + $0x7] ss:$0 sm:$0xff] }
 0x2dd   :  { %v216_v51 = vadd.f32 1e-05, %v215_v50 }
 0x2df   :  { %5321 = vrsqrt.f32 %v216_v51 }
 0x2e9   :  { %v5322_v52 = vpop.eup %5321 }
 0x2ea   :  { %v218_v54 = vmul.f32 %v5322_v52, %v210_v25 }
 0x2ec   :  { %v223_v56 = vmul.f32 %v3999_v53, %v218_v54 }
 0x2ee   :  { %v228_v57 = vadd.f32 %v4000_v55, %v223_v56 }
 0x2f0   :  { %v237_v58 = vpack.c.bf16 %v228_v57, %v228_v57 }
 0x2f2   :  { %4009 = vmatmul.mubr.msk.bf16.vlgmr.msra.gmra.mrb[4].mxu0 %vm158_vm2, %v237_v58 }
 0x2f3   :  { %4922 = vmatprep.mubr.msk.bf16.mxu0 %vm5370_vm0, %v5371_v3  ;;  %4915 = vmatpush3.bf16.msra.mxu0 %v5081_v34  ;;  %v5109_v34 = vld [vmem:[%s6605_s3 + $0xf0] sm:$0xff]  }
 0x2f4   :  { %4916 = vmatprep.subr.bf16.mxu0 %v5371_v3 }
 0x2f7   :  { %4917 = vmatpush3.bf16.msra.mxu0 %v5082_v35  ;;  %v5110_v35 = vld [vmem:[%s6605_s3 + $0xb0] sm:$0xff]  }
 0x2f8   :  { %4918 = vmatprep.subr.bf16.mxu0 %v5371_v3 }
 0x2fb   :  { %4919 = vmatpush3.bf16.msra.mxu0 %v5083_v37  ;;  %v5111_v37 = vld [vmem:[%s6605_s3 + $0xf8] sm:$0xff]  }
 0x2fc   :  { %4920 = vmatprep.subr.bf16.mxu0 %v5371_v3 }
 0x2ff   :  { %4921 = vmatpush3.bf16.msra.mxu0 %v5084_v38  ;;  %v5112_v38 = vld [vmem:[%s6605_s3 + $0xb8] sm:$0xff]  }
 0x300   :  { %711 = vmatprep.subr.bf16.mxu0 %v5087_v62 }
 0x3c5   :  { %v327_v8 = vpop.f32.mrb[4].mxu0 }
 0x3c6   :  { %v328_v9 = vadd.f32 %v327_v8, %v243_v6  ;;  %v329_v10 = vpop.f32.mrb[5].mxu0  ;;  %v5093_v6 = vld [vmem:[%s6604_s2 + $0x64] ss:$8 sps:$4 sm:$0xff]   ;;  %v5094_v8 = vld [vmem:[%s6604_s2 + $0x70] ss:$8 sps:$4 sm:$0xff]  }
 0x3c7   :  { %v330_v11 = vadd.f32 %v329_v10, %v247_v7  ;;  %v331_v13 = vpop.f32.mrb[6].mxu0  ;;  %v5091_v7 = vld [vmem:[%s6604_s2 + $0x60] ss:$8 sps:$4 sm:$0xff]  }
 0x3c8   :  { %v334_v15 = vmax.f32 %v328_v9, 0.0  ;;  %v332_v16 = vpop.f32.mrb[7].mxu0  ;;  %v5096_v9 = vld [vmem:[%s6604_s2 + $0x74] ss:$8 sps:$4 sm:$0xff]   ;;  %v5097_v10 = vld [vmem:[%s6605_s3 + $0xc0] sm:$0xff]   ;;  %v5099_v13 = vld [vmem:[%s6605_s3 + $0xc8] sm:$0xff]  }
 0x3c9   :  { %v335_v17 = vmax.f32 %v330_v11, 0.0  ;;  %v5098_v11 = vld [vmem:[%s6605_s3 + $0x80] sm:$0xff]   ;;  %4697 = vmatprep.subr.bf16.mxu1 %v5097_v10  ;;  %v5101_v16 = vld [vmem:[%s6605_s3 + $0xd0] sm:$0xff]  }
 0x3ca   :  { %v368_v19 = vpack.c.bf16 %v334_v15, %v334_v15  ;;  %v5100_v15 = vld [vmem:[%s6605_s3 + $0x88] sm:$0xff]  }
 0x3cb   :  { %v369_v18 = vpack.c.bf16 %v335_v17, %v335_v17  ;;  %v5102_v17 = vld [vmem:[%s6605_s3 + $0x90] sm:$0xff]  }
 0x3cd   :  { %503 = vmatprep.mubr.bf16.mxu1 %v369_v18  ;;  %v5103_v18 = vld [vmem:[%s6605_s3 + $0xd8] sm:$0xff]  }
 0x3ce   :  { %504 = vmatmul.mubr.bf16.vlgmr.msra.gmra.mrb[4].mxu1 %v368_v19  ;;  %v5104_v19 = vld [vmem:[%s6605_s3 + $0x98] sm:$0xff]  }
 0x3cf   :  { %4698 = vmatpush3.bf16.msra.mxu1 %v5098_v11 }
 0x3d0   :  { %4699 = vmatprep.subr.bf16.mxu1 %v5099_v13 }
 0x3d3   :  { %4700 = vmatpush3.bf16.msra.mxu1 %v5100_v15 }
 0x3d4   :  { %4701 = vmatprep.subr.bf16.mxu1 %v5101_v16 }
 0x3d7   :  { %4702 = vmatpush3.bf16.msra.mxu1 %v5102_v17 }
 0x3d8   :  { %4703 = vmatprep.subr.bf16.mxu1 %v5103_v18 }
 0x3db   :  { %4704 = vmatpush3.bf16.msra.mxu1 %v5104_v19  ;;  %v4138_v19 = vld [vmem:[%s6603_s7 + $0xf] ss:$0 sm:$0xff] }
 0x4a1   :  { %v4686_v20 = vpop.f32.mrb[4].mxu1 }
 0x4a2   :  { %v4687_v22 = vpop.f32.mrb[5].mxu1 }
 0x4a3   :  { %v4688_v23 = vadd.f32 %v4687_v22, %v4686_v20  ;;  %v4689_v24 = vpop.f32.mrb[6].mxu1  ;;  %v5105_v20 = vld [vmem:[%s6605_s3 + $0xe0] sm:$0xff]   ;;  %v5107_v22 = vld [vmem:[%s6605_s3 + $0xe8] sm:$0xff]  }
 0x4a4   :  { %v4690_v25 = vpop.f32.mrb[7].mxu1  ;;  %4705 = vmatprep.subr.bf16.mxu1 %v5105_v20  ;;  %v4112_v20 = vld [vmem:[%s6603_s7 + $0xb] ss:$0 sm:$0xff] }
 0x4a5   :  { %v506_v26 = vadd.f32 %v4688_v23, %v4010_v21  ;;  %v5106_v21 = vld [vmem:[%s6605_s3 + $0xa0] sm:$0xff]   ;;  %v5108_v23 = vld [vmem:[%s6605_s3 + $0xa8] sm:$0xff]  }
 0x4a6   :  { %4706 = vmatpush3.bf16.msra.mxu1 %v5106_v21 }
 0x4a7   :  { %v511_v27 = vadd.f32 %v506_v26, %v228_v57  ;;  %4707 = vmatprep.subr.bf16.mxu1 %v5107_v22  ;;  %v4113_v22 = vld [vmem:[%s6603_s7 + $0xc] ss:$0 sm:$0xff] }
 0x4a9   :  { %v514_v28 = vsel %vm158_vm2, %v511_v27, 0.0 }
 0x4aa   :  { %515 = vadd.xlane.f32.xlu1 %v514_v28  ;;  %4708 = vmatpush3.bf16.msra.mxu1 %v5108_v23  ;;  %v4043_v28 = vld [vmem:[%s6603_s7 + $0x8] ss:$0 sm:$0xff] }
 0x4ab   :  { %4709 = vmatprep.subr.bf16.mxu1 %v5109_v34 }
 0x4ae   :  { %4710 = vmatpush3.bf16.msra.mxu1 %v5110_v35 }
 0x4af   :  { %4711 = vmatprep.subr.bf16.mxu1 %v5111_v37 }
 0x4b2   :  { %4712 = vmatpush3.bf16.msra.mxu1 %v5112_v38 }
 0x4b3   :  { %4938 = vmatprep.subr.bf16.mxu1 %v5371_v3 }
 0x537   :  { %v516_v29 = vpop.xlane.xlu1 %515 }
 0x538   :  { %v517_v30 = vmul.f32 0.015625, %v516_v29 }
 0x53a   :  { %v518_v31 = vsub.f32 %v511_v27, %v517_v30  ;;  %v4044_v30 = vld [vmem:[%s6603_s7 + $0x9] ss:$0 sm:$0xff] }
 0x53c   :  { %v519_v32 = vmul.f32 %v518_v31, %v518_v31 }
 0x53e   :  { %v520_v33 = vsel %vm158_vm2, %v519_v32, 0.0 }
 0x53f   :  { %521 = vadd.xlane.f32.xlu1 %v520_v33 }
 0x5cc   :  { %v522_v39 = vpop.xlane.xlu1 %521 }
 0x5cd   :  { %v523_v40 = vmul.f32 0.015625, %v522_v39  ;;  %v4053_v39 = vld [vmem:[%s6606_s8 + $0x1] ss:$8 sm:$0x3] }
 0x5cf   :  { %v524_v41 = vadd.f32 1e-05, %v523_v40  ;;  %v661_v40 = vrot.slane %v4053_v39, %v5559_v2 }
 0x5d1   :  { %5323 = vrsqrt.f32 %v524_v41  ;;  %v665_v41 = vrot.slane %v4053_v39, %v5564_v5 }
 0x5db   :  { %v5324_v42 = vpop.eup %5323 }
 0x5dc   :  { %v526_v44 = vmul.f32 %v5324_v42, %v518_v31 }
 0x5de   :  { %v531_v46 = vmul.f32 %v4027_v43, %v526_v44 }
 0x5e0   :  { %v536_v47 = vadd.f32 %v4028_v45, %v531_v46 }
 0x5e2   :  { %v546_v48 = vpack.c.bf16 %v536_v47, %v536_v47 }
 0x5e4   :  { %4923 = vmatmul.mubr.msk.bf16.vlgmr.msra.gmra.mrb[8].mxu0 %vm158_vm2, %v546_v48 }
 0x5e5   :  { %743 = vmatprep.mubr.bf16.mxu0 %v5372_v36  ;;  %712 = vmatpush1.bf16.msra.mxu0 %v5085_v63 }
 0x5e6   :  { %713 = vmatprep.subr.bf16.mxu0 %v5090_v1 }
 0x5e9   :  { %714 = vmatpush1.bf16.msra.mxu0 %v5088_v4 }
 0x5ea   :  { %715 = vmatprep.subr.bf16.mxu0 %v5093_v6 }
 0x5ed   :  { %716 = vmatpush1.bf16.msra.mxu0 %v5091_v7 }
 0x5ee   :  { %717 = vmatprep.subr.bf16.mxu0 %v5096_v9 }
 0x5f1   :  { %718 = vmatpush1.bf16.msra.mxu0 %v5094_v8 }
 0x6b7   :  { %v613_v50 = vpop.f32.mrb[8].mxu0 }
 0x6b8   :  { %v614_v51 = vadd.f32 %v4037_v49, %v613_v50  ;;  %v4924_v52 = vpop.f32.mrb[9].mxu0 }
 0x6b9   :  { %v616_v53 = vpop.f32.mrb[10].mxu0 }
 0x6ba   :  { %v4925_v54 = vpop.f32.mrb[11].mxu0  ;;  %v619_v55 = vadd.f32 %v614_v51, %v536_v47  ;;  %v5113_v51 = vld [vmem:[%s6602_s1 + $0x40] sm:$0xff]   ;;  %v5114_v53 = vld [vmem:[%s6602_s1 + $0x48] sm:$0xff]  }
 0x6bb   :  { %v5115_v54 = vld [vmem:[%s6602_s1 + $0x50] sm:$0xff]  }
 0x6bc   :  { %v622_v56 = vsel %vm158_vm2, %v619_v55, 0.0 }
 0x6bd   :  { %623 = vadd.xlane.f32.xlu0 %v622_v56 }
 0x74a   :  { %v624_v57 = vpop.xlane.xlu0 %623 }
 0x74b   :  { %v625_v58 = vmul.f32 0.015625, %v624_v57  ;;  %v4095_v57 = vld [vmem:[%s6603_s7 + $0xa] ss:$0 sm:$0xff] }
 0x74d   :  { %v626_v59 = vsub.f32 %v619_v55, %v625_v58  ;;  %v5116_v55 = vld [vmem:[%s6602_s1 + $0x58] sm:$0xff]  }
 0x74f   :  { %v627_v60 = vmul.f32 %v626_v59, %v626_v59 }
 0x751   :  { %v628_v61 = vsel %vm158_vm2, %v627_v60, 0.0 }
 0x752   :  { %629 = vadd.xlane.f32.xlu1 %v628_v61 }
 0x7df   :  { %v630_v24 = vpop.xlane.xlu1 %629 }
 0x7e0   :  { %v631_v25 = vmul.f32 0.015625, %v630_v24 }
 0x7e2   :  { %v632_v26 = vadd.f32 1e-05, %v631_v25 }
 0x7e4   :  { %5325 = vrsqrt.f32 %v632_v26 }
 0x7ee   :  { %v5326_v27 = vpop.eup %5325 }
 0x7ef   :  { %v634_v29 = vmul.f32 %v5326_v27, %v626_v59 }
 0x7f1   :  { %v639_v31 = vmul.f32 %v4043_v28, %v634_v29 }
 0x7f3   :  { %v644_v32 = vadd.f32 %v4044_v30, %v639_v31 }
 0x7f5   :  { %v654_v33 = vpack.c.bf16 %v644_v32, %v644_v32 }
 0x7f7   :  { %4062 = vmatmul.mubr.msk.bf16.vlgmr.msra.gmra.mrb[12].mxu0 %vm158_vm2, %v654_v33 }
 0x7f8   :  { %1097 = vmatprep.mubr.bf16.mxu0 %v5372_v36 }
 0x8ca   :  { %v745_v42 = vpop.f32.mrb[12].mxu0 }
 0x8cb   :  { %v746_v43 = vadd.f32 %v745_v42, %v661_v40  ;;  %v747_v44 = vpop.f32.mrb[13].mxu0  ;;  %v5117_v40 = vld [vmem:[%s6607_s4] ss:$12 sps:$4 sm:$0xff]   ;;  %v5120_v42 = vld [vmem:[%s6607_s4 + $0x18] ss:$12 sps:$4 sm:$0xff]  }
 0x8cc   :  { %v748_v45 = vadd.f32 %v747_v44, %v665_v41  ;;  %v749_v46 = vpop.f32.mrb[14].mxu0  ;;  %v5122_v41 = vld [vmem:[%s6607_s4 + $0x1c] ss:$12 sps:$4 sm:$0xff]  }
 0x8cd   :  { %v752_v47 = vmax.f32 %v746_v43, 0.0  ;;  %v750_v48 = vpop.f32.mrb[15].mxu0  ;;  %v5125_v43 = vld [vmem:[%s6607_s4 + $0x34] ss:$12 sps:$4 sm:$0xff]   ;;  %v5123_v44 = vld [vmem:[%s6607_s4 + $0x30] ss:$12 sps:$4 sm:$0xff]  }
 0x8ce   :  { %v753_v49 = vmax.f32 %v748_v45, 0.0  ;;  %v5128_v45 = vld [vmem:[%s6607_s4 + $0x4c] ss:$12 sps:$4 sm:$0xff]   ;;  %v5126_v46 = vld [vmem:[%s6607_s4 + $0x48] ss:$12 sps:$4 sm:$0xff]  }
 0x8cf   :  { %v787_v52 = vpack.c.bf16 %v752_v47, %v752_v47 }
 0x8d0   :  { %v788_v50 = vpack.c.bf16 %v753_v49, %v753_v49 }
 0x8d2   :  { %922 = vmatprep.mubr.bf16.mxu1 %v788_v50 }
 0x8d3   :  { %923 = vmatmul.mubr.bf16.vlgmr.msra.gmra.mrb[8].mxu1 %v787_v52 }
 0x8d4   :  { %4939 = vmatpush3.bf16.msra.mxu1 %v5113_v51  ;;  %4946 = vmatprep.mubr.msk.bf16.mxu1 %vm5370_vm0, %v5371_v3  ;;  %v4114_v51 = vld [vmem:[%s6603_s7 + $0xd] ss:$0 sm:$0xff] }
 0x8d5   :  { %4940 = vmatprep.subr.bf16.mxu1 %v5371_v3 }
 0x8d8   :  { %4941 = vmatpush3.bf16.msra.mxu1 %v5114_v53  ;;  %v4115_v53 = vld [vmem:[%s6603_s7 + $0xe] ss:$0 sm:$0xff] }
 0x8d9   :  { %4942 = vmatprep.subr.bf16.mxu1 %v5371_v3 }
 0x8dc   :  { %4943 = vmatpush3.bf16.msra.mxu1 %v5115_v54 }
 0x8dd   :  { %4944 = vmatprep.subr.bf16.mxu1 %v5371_v3 }
 0x8e0   :  { %4945 = vmatpush3.bf16.msra.mxu1 %v5116_v55 }
 0x8e3   :  { %4947 = vmatmul.mubr.msk.bf16.vlgmr.msra.gmra.mrb[12].mxu1 %vm158_vm2, %v5466_v14 }
 0x9a6   :  { %v4713_v56 = vpop.f32.mrb[8].mxu1 }
 0x9a7   :  { %v4714_v58 = vpop.f32.mrb[9].mxu1 }
 0x9a8   :  { %v4715_v59 = vadd.f32 %v4714_v58, %v4713_v56  ;;  %v4716_v60 = vpop.f32.mrb[10].mxu1  ;;  %v5129_v56 = vld [vmem:[%s6607_s4 + $0x8] ss:$12 sps:$4 sm:$0xff]   ;;  %v5130_v58 = vld [vmem:[%s6607_s4 + $0x20] ss:$12 sps:$4 sm:$0xff]  }
 0x9a9   :  { %v4717_v61 = vpop.f32.mrb[11].mxu1  ;;  %v5132_v60 = vld [vmem:[%s6607_s4 + $0x50] ss:$12 sps:$4 sm:$0xff]  }
 0x9aa   :  { %v925_v62 = vadd.f32 %v4715_v59, %v4095_v57  ;;  %v5131_v59 = vld [vmem:[%s6607_s4 + $0x38] ss:$12 sps:$4 sm:$0xff]  }
 0x9ac   :  { %v930_v63 = vadd.f32 %v925_v62, %v644_v32 }
 0x9ae   :  { %v933_v1 = vsel %vm158_vm2, %v930_v63, 0.0 }
 0x9af   :  { %934 = vadd.xlane.f32.xlu0 %v933_v1 }
 0x9b6   :  { %v1218_v4 = vpop.f32.mrb[12].mxu1 }
 0x9b7   :  { %v4948_v6 = vpop.f32.mrb[13].mxu1  ;;  %v1219_v23 = vadd.f32 %v4138_v19, %v1218_v4 }
 0x9b8   :  { %v1221_v7 = vpop.f32.mrb[14].mxu1  ;;  %v4144_v6 = vld [vmem:[%s6603_s7 + $0x10] ss:$0 sm:$0xff] }
 0x9b9   :  { %v4949_v8 = vpop.f32.mrb[15].mxu1  ;;  %v1224_v27 = vadd.f32 %v1219_v23, %v5462_v12  ;;  %v5119_v12 = vld [vmem:[%s6607_s4 + $0x4] ss:$12 sps:$4 sm:$0xff]  }
 0x9ba   :  { %1065 = vmatprep.subr.bf16.mxu0 %v5119_v12  ;;  %v4146_v8 = vld [vmem:[%s6603_s7 + $0x12] ss:$0 sm:$0xff]  ;;  %v5148_v12 = vld [vmem:[%s6605_s3 + $0x108] sm:$0xff]  }
 0x9bb   :  { %v1227_v28 = vsel %vm158_vm2, %v1224_v27, 0.0  ;;  %1066 = vmatpush1.bf16.msra.mxu0 %v5117_v40  ;;  %v5149_v40 = vld [vmem:[%s6605_s3 + $0x150] sm:$0xff]  }
 0x9bc   :  { %1067 = vmatprep.subr.bf16.mxu0 %v5122_v41  ;;  %v5150_v41 = vld [vmem:[%s6605_s3 + $0x110] sm:$0xff]  }
 0x9bf   :  { %1068 = vmatpush1.bf16.msra.mxu0 %v5120_v42  ;;  %v5151_v42 = vld [vmem:[%s6605_s3 + $0x158] sm:$0xff]  }
 0x9c0   :  { %1069 = vmatprep.subr.bf16.mxu0 %v5125_v43  ;;  %v5152_v43 = vld [vmem:[%s6605_s3 + $0x118] sm:$0xff]  }
 0x9c3   :  { %1070 = vmatpush1.bf16.msra.mxu0 %v5123_v44  ;;  %v5153_v44 = vld [vmem:[%s6605_s3 + $0x160] sm:$0xff]  }
 0x9c4   :  { %1071 = vmatprep.subr.bf16.mxu0 %v5128_v45  ;;  %v5154_v45 = vld [vmem:[%s6605_s3 + $0x120] sm:$0xff]  }
 0x9c7   :  { %1072 = vmatpush1.bf16.msra.mxu0 %v5126_v46  ;;  %v5155_v46 = vld [vmem:[%s6605_s3 + $0x168] sm:$0xff]  }
 0x9c8   :  { %4926 = vmatprep.subr.bf16.mxu0 %v5371_v3 }
 0xa3c   :  { %v935_v9 = vpop.xlane.xlu0 %934 }
 0xa3d   :  { %v936_v14 = vmul.f32 0.015625, %v935_v9  ;;  %v4145_v9 = vld [vmem:[%s6603_s7 + $0x11] ss:$0 sm:$0xff] }
 0xa3f   :  { %v937_v10 = vsub.f32 %v930_v63, %v936_v14 }
 0xa41   :  { %v938_v11 = vmul.f32 %v937_v10, %v937_v10 }
 0xa43   :  { %v939_v13 = vsel %vm158_vm2, %v938_v11, 0.0 }
 0xa44   :  { %940 = vadd.xlane.f32.xlu1 %v939_v13 }
 0xad1   :  { %v941_v15 = vpop.xlane.xlu1 %940 }
 0xad2   :  { %v942_v16 = vmul.f32 0.015625, %v941_v15 }
 0xad4   :  { %v943_v17 = vadd.f32 1e-05, %v942_v16 }
 0xad6   :  { %5327 = vrsqrt.f32 %v943_v17 }
 0xae0   :  { %v5328_v18 = vpop.eup %5327 }
 0xae1   :  { %v945_v21 = vmul.f32 %v5328_v18, %v937_v10 }
 0xae3   :  { %v950_v24 = vmul.f32 %v4112_v20, %v945_v21 }
 0xae5   :  { %v955_v25 = vadd.f32 %v4113_v22, %v950_v24 }
 0xae7   :  { %v958_v26 = vsel %vm158_vm2, %v955_v25, 0.0 }
 0xae8   :  { %959 = vadd.xlane.f32.xlu0 %v958_v26 }
 0xaec   :  { %1228 = vadd.xlane.f32.xlu0 %v1227_v28  ;;  %v5135_v28 = vld [vmem:[%s6604_s2 + $0x84] ss:$8 sps:$4 sm:$0xff]  }
 0xb75   :  { %v960_v29 = vpop.xlane.xlu0 %959 }
 0xb76   :  { %v961_v30 = vmul.f32 0.015625, %v960_v29  ;;  %v5133_v29 = vld [vmem:[%s6604_s2 + $0x80] ss:$8 sps:$4 sm:$0xff]  }
 0xb78   :  { %v962_v31 = vsub.f32 %v955_v25, %v961_v30  ;;  %v5138_v30 = vld [vmem:[%s6604_s2 + $0x94] ss:$8 sps:$4 sm:$0xff]  }
 0xb79   :  { %v1229_v32 = vpop.xlane.xlu0 %1228 }
 0xb7a   :  { %v1230_v33 = vmul.f32 0.015625, %v1229_v32  ;;  %v963_v34 = vmul.f32 %v962_v31, %v962_v31  ;;  %v5141_v32 = vld [vmem:[%s6604_s2 + $0xa4] ss:$8 sps:$4 sm:$0xff]  }
 0xb7c   :  { %v1231_v35 = vsub.f32 %v1224_v27, %v1230_v33  ;;  %v964_v37 = vsel %vm158_vm2, %v963_v34, 0.0  ;;  %v5139_v33 = vld [vmem:[%s6604_s2 + $0xa0] ss:$8 sps:$4 sm:$0xff]   ;;  %v5142_v34 = vld [vmem:[%s6604_s2 + $0xb0] ss:$8 sps:$4 sm:$0xff]  }
 0xb7d   :  { %965 = vadd.xlane.f32.xlu1 %v964_v37  ;;  %v5145_v37 = vld [vmem:[%s6605_s3 + $0x140] sm:$0xff]  }
 0xb7e   :  { %v1232_v38 = vmul.f32 %v1231_v35, %v1231_v35  ;;  %4729 = vmatprep.subr.bf16.mxu1 %v5145_v37  ;;  %v5163_v37 = vld [vmem:[%s6602_s1 + $0x70] sm:$0xff]  }
 0xb80   :  { %v1233_v39 = vsel %vm158_vm2, %v1232_v38, 0.0  ;;  %v5146_v38 = vld [vmem:[%s6605_s3 + $0x100] sm:$0xff]  }
 0xb81   :  { %1234 = vadd.xlane.f32.xlu1 %v1233_v39  ;;  %v5147_v39 = vld [vmem:[%s6605_s3 + $0x148] sm:$0xff]   ;;  %4730 = vmatpush3.bf16.msra.mxu1 %v5146_v38  ;;  %v5164_v38 = vld [vmem:[%s6602_s1 + $0x78] sm:$0xff]  }
 0xb82   :  { %4731 = vmatprep.subr.bf16.mxu1 %v5147_v39 }
 0xb85   :  { %4732 = vmatpush3.bf16.msra.mxu1 %v5148_v12 }
 0xb86   :  { %4733 = vmatprep.subr.bf16.mxu1 %v5149_v40 }
 0xb89   :  { %4734 = vmatpush3.bf16.msra.mxu1 %v5150_v41 }
 0xb8a   :  { %4735 = vmatprep.subr.bf16.mxu1 %v5151_v42  ;;  %v4216_v42 = vld [vmem:[%s6603_s7 + $0x16] ss:$0 sm:$0xff] }
 0xb8d   :  { %4736 = vmatpush3.bf16.msra.mxu1 %v5152_v43 }
 0xb8e   :  { %4737 = vmatprep.subr.bf16.mxu1 %v5153_v44  ;;  %v4217_v44 = vld [vmem:[%s6603_s7 + $0x17] ss:$0 sm:$0xff] }
 0xb91   :  { %4738 = vmatpush3.bf16.msra.mxu1 %v5154_v45 }
 0xb92   :  { %4739 = vmatprep.subr.bf16.mxu1 %v5155_v46 }
 0xc0a   :  { %v966_v47 = vpop.xlane.xlu1 %965 }
 0xc0b   :  { %v967_v48 = vmul.f32 0.015625, %v966_v47  ;;  %v5156_v47 = vld [vmem:[%s6605_s3 + $0x128] sm:$0xff]  }
 0xc0c   :  { %4740 = vmatpush3.bf16.msra.mxu1 %v5156_v47 }
 0xc0d   :  { %v968_v49 = vadd.f32 1e-05, %v967_v48 }
 0xc0e   :  { %v1235_v61 = vpop.xlane.xlu1 %1234 }
 0xc0f   :  { %5329 = vrsqrt.f32 %v968_v49  ;;  %v1236_v62 = vmul.f32 0.015625, %v1235_v61  ;;  %v5160_v61 = vld [vmem:[%s6605_s3 + $0x138] sm:$0xff]  }
 0xc11   :  { %v1237_v63 = vadd.f32 1e-05, %v1236_v62  ;;  %v4157_v62 = vld [vmem:[%s6606_s8 + $0x2] ss:$8 sm:$0x3] }
 0xc13   :  { %5331 = vrsqrt.f32 %v1237_v63  ;;  %v1298_v63 = vrot.slane %v4157_v62, %v5559_v2 }
 0xc19   :  { %v5330_v50 = vpop.eup %5329 }
 0xc1a   :  { %v970_v52 = vmul.f32 %v5330_v50, %v962_v31  ;;  %v5136_v31 = vld [vmem:[%s6604_s2 + $0x90] ss:$8 sps:$4 sm:$0xff]  }
 0xc1c   :  { %v975_v54 = vmul.f32 %v4114_v51, %v970_v52  ;;  %v4147_v52 = vld [vmem:[%s6603_s7 + $0x13] ss:$0 sm:$0xff] }
 0xc1d   :  { %v5332_v1 = vpop.eup %5331 }
 0xc1e   :  { %v980_v55 = vadd.f32 %v4115_v53, %v975_v54  ;;  %v1239_v4 = vmul.f32 %v5332_v1, %v1231_v35  ;;  %v5144_v35 = vld [vmem:[%s6604_s2 + $0xb4] ss:$8 sps:$4 sm:$0xff]   ;;  %v1302_v1 = vrot.slane %v4157_v62, %v5564_v5 }
 0xc1f   :  { %v4148_v54 = vld [vmem:[%s6603_s7 + $0x14] ss:$0 sm:$0xff] }
 0xc20   :  { %v997_v57 = vpack.c.bf16 %v980_v55, %v980_v55  ;;  %v1244_v7 = vmul.f32 %v4144_v6, %v1239_v4 }
 0xc22   :  { %4128 = vmatmul.mubr.msk.bf16.vlgmr.msra.gmra.mrb[16].mxu0 %vm158_vm2, %v997_v57  ;;  %v1249_v13 = vadd.f32 %v4145_v9, %v1244_v7 }
 0xc23   :  { %4927 = vmatpush3.bf16.msra.mxu0 %v5129_v56  ;;  %4934 = vmatprep.mubr.msk.bf16.mxu0 %vm5370_vm0, %v5371_v3 }
 0xc24   :  { %4928 = vmatprep.subr.bf16.mxu0 %v5371_v3 }
 0xc27   :  { %4929 = vmatpush3.bf16.msra.mxu0 %v5130_v58  ;;  %v5157_v58 = vld [vmem:[%s6605_s3 + $0x170] sm:$0xff]  }
 0xc28   :  { %4930 = vmatprep.subr.bf16.mxu0 %v5371_v3  ;;  %4741 = vmatprep.subr.bf16.mxu1 %v5157_v58 }
 0xc2b   :  { %4931 = vmatpush3.bf16.msra.mxu0 %v5131_v59  ;;  %v5158_v59 = vld [vmem:[%s6605_s3 + $0x130] sm:$0xff]  }
 0xc2c   :  { %4932 = vmatprep.subr.bf16.mxu0 %v5371_v3  ;;  %4742 = vmatpush3.bf16.msra.mxu1 %v5158_v59 }
 0xc2f   :  { %4933 = vmatpush3.bf16.msra.mxu0 %v5132_v60  ;;  %v5159_v60 = vld [vmem:[%s6605_s3 + $0x178] sm:$0xff]  }
 0xc30   :  { %1348 = vmatprep.subr.bf16.mxu0 %v5135_v28  ;;  %4743 = vmatprep.subr.bf16.mxu1 %v5159_v60 }
 0xc31   :  { %4744 = vmatpush3.bf16.msra.mxu1 %v5160_v61 }
 0xc32   :  { %4935 = vmatmul.mubr.msk.bf16.vlgmr.msra.gmra.mrb[20].mxu0 %vm158_vm2, %v997_v57 }
 0xc33   :  { %1380 = vmatprep.mubr.bf16.mxu0 %v5372_v36  ;;  %1349 = vmatpush1.bf16.msra.mxu0 %v5133_v29 }
 0xc34   :  { %1350 = vmatprep.subr.bf16.mxu0 %v5138_v30 }
 0xc37   :  { %1351 = vmatpush1.bf16.msra.mxu0 %v5136_v31 }
 0xc38   :  { %1352 = vmatprep.subr.bf16.mxu0 %v5141_v32 }
 0xc3b   :  { %1353 = vmatpush1.bf16.msra.mxu0 %v5139_v33  ;;  %v4234_v33 = vld [vmem:[%s6603_s7 + $0x1b] ss:$0 sm:$0xff] }
 0xc3c   :  { %1354 = vmatprep.subr.bf16.mxu0 %v5144_v35  ;;  %v5162_v35 = vld [vmem:[%s6602_s1 + $0x68] sm:$0xff]  }
 0xc3f   :  { %1355 = vmatpush1.bf16.msra.mxu0 %v5142_v34  ;;  %v5161_v34 = vld [vmem:[%s6602_s1 + $0x60] sm:$0xff]  }
 0xc40   :  { %4950 = vmatprep.subr.bf16.mxu0 %v5371_v3 }
 0xcf5   :  { %v5785_v14 = vpop.f32.mrb[16].mxu0 }
 0xcf6   :  { %v1255_v10 = vadd.f32 %v4146_v8, %v5785_v14  ;;  %v5788_v11 = vpop.f32.mrb[17].mxu0 }
 0xcf7   :  { %v1103_v15 = vpop.f32.mrb[18].mxu0 }
 0xcf8   :  { %v1104_v16 = vpop.f32.mrb[19].mxu0  ;;  %v1256_v17 = vadd.f32 %v1255_v10, %v1249_v13 }
 0xcfa   :  { %v1259_v18 = vsel %vm158_vm2, %v1256_v17, 0.0 }
 0xcfb   :  { %1260 = vadd.xlane.f32.xlu0 %v1259_v18 }
 0xd05   :  { %v5791_v19 = vpop.f32.mrb[20].mxu0 }
 0xd06   :  { %v4936_v20 = vpop.f32.mrb[21].mxu0 }
 0xd07   :  { %v1143_v21 = vpop.f32.mrb[22].mxu0  ;;  %v4199_v20 = vld [vmem:[%s6603_s7 + $0x15] ss:$0 sm:$0xff] }
 0xd08   :  { %v4937_v22 = vpop.f32.mrb[23].mxu0 }
 0xd88   :  { %v1261_v23 = vpop.xlane.xlu0 %1260 }
 0xd89   :  { %v1262_v24 = vmul.f32 0.015625, %v1261_v23 }
 0xd8b   :  { %v1263_v25 = vsub.f32 %v1256_v17, %v1262_v24 }
 0xd8d   :  { %v1264_v26 = vmul.f32 %v1263_v25, %v1263_v25 }
 0xd8f   :  { %v1265_v27 = vsel %vm158_vm2, %v1264_v26, 0.0 }
 0xd90   :  { %1266 = vadd.xlane.f32.xlu1 %v1265_v27 }
 0xe1d   :  { %v1267_v48 = vpop.xlane.xlu1 %1266 }
 0xe1e   :  { %v1268_v49 = vmul.f32 0.015625, %v1267_v48  ;;  %v4226_v48 = vld [vmem:[%s6603_s7 + $0x18] ss:$0 sm:$0xff] }
 0xe20   :  { %v1269_v50 = vadd.f32 1e-05, %v1268_v49 }
 0xe22   :  { %5333 = vrsqrt.f32 %v1269_v50 }
 0xe2c   :  { %v5334_v51 = vpop.eup %5333 }
 0xe2d   :  { %v1271_v53 = vmul.f32 %v5334_v51, %v1263_v25 }
 0xe2f   :  { %v1276_v55 = vmul.f32 %v4147_v52, %v1271_v53 }
 0xe31   :  { %v1281_v56 = vadd.f32 %v4148_v54, %v1276_v55 }
 0xe33   :  { %v1291_v57 = vpack.c.bf16 %v1281_v56, %v1281_v56 }
 0xe35   :  { %4166 = vmatmul.mubr.msk.bf16.vlgmr.msra.gmra.mrb[24].mxu0 %vm158_vm2, %v1291_v57 }
 0xe36   :  { %4958 = vmatprep.mubr.msk.bf16.mxu0 %vm5370_vm0, %v5371_v3  ;;  %4951 = vmatpush3.bf16.msra.mxu0 %v5161_v34  ;;  %v5180_v34 = vld [vmem:[%s6605_s3 + $0x188] sm:$0xff]  }
 0xe37   :  { %4952 = vmatprep.subr.bf16.mxu0 %v5371_v3 }
 0xe3a   :  { %4953 = vmatpush3.bf16.msra.mxu0 %v5162_v35  ;;  %v5181_v35 = vld [vmem:[%s6605_s3 + $0x1d0] sm:$0xff]  }
 0xe3b   :  { %4954 = vmatprep.subr.bf16.mxu0 %v5371_v3 }
 0xe3e   :  { %4955 = vmatpush3.bf16.msra.mxu0 %v5163_v37  ;;  %v5182_v37 = vld [vmem:[%s6605_s3 + $0x190] sm:$0xff]  }
 0xe3f   :  { %4956 = vmatprep.subr.bf16.mxu0 %v5371_v3 }
 0xe42   :  { %4957 = vmatpush3.bf16.msra.mxu0 %v5164_v38  ;;  %v5183_v38 = vld [vmem:[%s6605_s3 + $0x1d8] sm:$0xff]  }
 0xf08   :  { %v1382_v4 = vpop.f32.mrb[24].mxu0 }
 0xf09   :  { %v1383_v6 = vadd.f32 %v1382_v4, %v1298_v63  ;;  %v1384_v7 = vpop.f32.mrb[25].mxu0 }
 0xf0a   :  { %v1385_v8 = vadd.f32 %v1384_v7, %v1302_v1  ;;  %v1386_v9 = vpop.f32.mrb[26].mxu0  ;;  %v4232_v7 = vld [vmem:[%s6603_s7 + $0x19] ss:$0 sm:$0xff] }
 0xf0b   :  { %v1389_v10 = vmax.f32 %v1383_v6, 0.0  ;;  %v1387_v13 = vpop.f32.mrb[27].mxu0  ;;  %v4233_v9 = vld [vmem:[%s6603_s7 + $0x1a] ss:$0 sm:$0xff] }
 0xf0c   :  { %v1390_v15 = vmax.f32 %v1385_v8, 0.0 }
 0xf0d   :  { %v1424_v17 = vpack.c.bf16 %v1389_v10, %v1389_v10 }
 0xf0e   :  { %v1425_v16 = vpack.c.bf16 %v1390_v15, %v1390_v15 }
 0xf10   :  { %1559 = vmatprep.mubr.bf16.mxu1 %v1425_v16 }
 0xf11   :  { %1560 = vmatmul.mubr.bf16.vlgmr.msra.gmra.mrb[16].mxu1 %v1424_v17 }
 0xfe4   :  { %v4745_v18 = vpop.f32.mrb[16].mxu1 }
 0xfe5   :  { %v4746_v21 = vpop.f32.mrb[17].mxu1 }
 0xfe6   :  { %v4747_v22 = vadd.f32 %v4746_v21, %v4745_v18  ;;  %v4748_v23 = vpop.f32.mrb[18].mxu1 }
 0xfe7   :  { %v4749_v24 = vpop.f32.mrb[19].mxu1  ;;  %v5167_v23 = vld [vmem:[%s6604_s2 + $0xc4] ss:$8 sps:$4 sm:$0xff]  }
 0xfe8   :  { %v1562_v25 = vadd.f32 %v4747_v22, %v4199_v20  ;;  %v5165_v24 = vld [vmem:[%s6604_s2 + $0xc0] ss:$8 sps:$4 sm:$0xff]   ;;  %1807 = vmatprep.subr.bf16.mxu0 %v5167_v23 }
 0xfea   :  { %v1567_v26 = vadd.f32 %v1562_v25, %v1281_v56  ;;  %v5170_v25 = vld [vmem:[%s6604_s2 + $0xd4] ss:$8 sps:$4 sm:$0xff]  }
 0xfec   :  { %v1570_v27 = vsel %vm158_vm2, %v1567_v26, 0.0 }
 0xfed   :  { %1571 = vadd.xlane.f32.xlu0 %v1570_v27  ;;  %v5173_v27 = vld [vmem:[%s6604_s2 + $0xe4] ss:$8 sps:$4 sm:$0xff]  }
0x107a   :  { %v1572_v28 = vpop.xlane.xlu0 %1571 }
0x107b   :  { %v1573_v29 = vmul.f32 0.015625, %v1572_v28  ;;  %v5171_v28 = vld [vmem:[%s6604_s2 + $0xe0] ss:$8 sps:$4 sm:$0xff]  }
0x107d   :  { %v1574_v30 = vsub.f32 %v1567_v26, %v1573_v29  ;;  %v5168_v26 = vld [vmem:[%s6604_s2 + $0xd0] ss:$8 sps:$4 sm:$0xff]  }
0x107e   :  { %v5174_v29 = vld [vmem:[%s6604_s2 + $0xf0] ss:$8 sps:$4 sm:$0xff]  }
0x107f   :  { %v1575_v31 = vmul.f32 %v1574_v30, %v1574_v30 }
0x1081   :  { %v1576_v32 = vsel %vm158_vm2, %v1575_v31, 0.0  ;;  %v5177_v31 = vld [vmem:[%s6605_s3 + $0x1c0] sm:$0xff]  }
0x1082   :  { %1577 = vadd.xlane.f32.xlu1 %v1576_v32  ;;  %v5178_v32 = vld [vmem:[%s6605_s3 + $0x180] sm:$0xff]   ;;  %4756 = vmatprep.subr.bf16.mxu1 %v5177_v31 }
0x1083   :  { %4757 = vmatpush3.bf16.msra.mxu1 %v5178_v32 }
0x1093   :  { %1707 = vrot.lane.b32.xlu1 %v4234_v33, %s5373_s18  ;;  %v5179_v33 = vld [vmem:[%s6605_s3 + $0x1c8] sm:$0xff]  }
0x1094   :  { %4758 = vmatprep.subr.bf16.mxu1 %v5179_v33 }
0x1095   :  { %4759 = vmatpush3.bf16.msra.mxu1 %v5180_v34 }
0x1096   :  { %4760 = vmatprep.subr.bf16.mxu1 %v5181_v35  ;;  %v4304_v35 = vld [vmem:[%s6603_s7 + $0x1f] ss:$0 sm:$0xff] }
0x1099   :  { %4761 = vmatpush3.bf16.msra.mxu1 %v5182_v37 }
0x109a   :  { %4762 = vmatprep.subr.bf16.mxu1 %v5183_v38  ;;  %v4305_v38 = vld [vmem:[%s6603_s7 + $0x20] ss:$0 sm:$0xff] }
0x110f   :  { %v1578_v39 = vpop.xlane.xlu1 %1577 }
0x1110   :  { %v1579_v12 = vmul.f32 0.015625, %v1578_v39  ;;  %v5184_v39 = vld [vmem:[%s6605_s3 + $0x198] sm:$0xff]  }
0x1111   :  { %4763 = vmatpush3.bf16.msra.mxu1 %v5184_v39 }
0x1112   :  { %v1580_v40 = vadd.f32 1e-05, %v1579_v12  ;;  %v5185_v12 = vld [vmem:[%s6605_s3 + $0x1e0] sm:$0xff]  }
0x1113   :  { %v1708_v61 = vpop.permute.xlu1 %1707  ;;  %4764 = vmatprep.subr.bf16.mxu1 %v5185_v12 }
0x1114   :  { %5335 = vrsqrt.f32 %v1580_v40  ;;  %v1710_v62 = vadd.f32 %v1708_v61, %v5785_v14  ;;  %v5186_v40 = vld [vmem:[%s6605_s3 + $0x1a0] sm:$0xff]  }
0x1115   :  { %4765 = vmatpush3.bf16.msra.mxu1 %v5186_v40 }
0x111e   :  { %v5336_v41 = vpop.eup %5335 }
0x111f   :  { %v1582_v43 = vmul.f32 %v5336_v41, %v1574_v30  ;;  %v5176_v30 = vld [vmem:[%s6604_s2 + $0xf4] ss:$8 sps:$4 sm:$0xff]   ;;  %v5187_v41 = vld [vmem:[%s6605_s3 + $0x1e8] sm:$0xff]  }
0x1120   :  { %4766 = vmatprep.subr.bf16.mxu1 %v5187_v41  ;;  %v4314_v41 = vld [vmem:[%s6603_s7 + $0x21] ss:$0 sm:$0xff] }
0x1121   :  { %v1587_v45 = vmul.f32 %v4216_v42, %v1582_v43  ;;  %v5188_v42 = vld [vmem:[%s6605_s3 + $0x1a8] sm:$0xff]  }
0x1122   :  { %4767 = vmatpush3.bf16.msra.mxu1 %v5188_v42 }
0x1123   :  { %v1592_v46 = vadd.f32 %v4217_v44, %v1587_v45 }
0x1125   :  { %v1602_v47 = vpack.c.bf16 %v1592_v46, %v1592_v46 }
0x1127   :  { %4959 = vmatmul.mubr.msk.bf16.vlgmr.msra.gmra.mrb[28].mxu0 %vm158_vm2, %v1602_v47  ;;  %v4235_v47 = vld [vmem:[%s6603_s7 + $0x1c] ss:$0 sm:$0xff] }
0x1128   :  { %1839 = vmatprep.mubr.bf16.mxu0 %v5372_v36  ;;  %1808 = vmatpush1.bf16.msra.mxu0 %v5165_v24 }
0x1129   :  { %1809 = vmatprep.subr.bf16.mxu0 %v5170_v25 }
0x112c   :  { %1810 = vmatpush1.bf16.msra.mxu0 %v5168_v26 }
0x112d   :  { %1811 = vmatprep.subr.bf16.mxu0 %v5173_v27  ;;  %v5193_v27 = vld [vmem:[%s6602_s1 + $0x80] sm:$0xff]  }
0x1130   :  { %1812 = vmatpush1.bf16.msra.mxu0 %v5171_v28  ;;  %v5194_v28 = vld [vmem:[%s6602_s1 + $0x88] sm:$0xff]  }
0x1131   :  { %1813 = vmatprep.subr.bf16.mxu0 %v5176_v30  ;;  %v5196_v30 = vld [vmem:[%s6602_s1 + $0x98] sm:$0xff]  }
0x1134   :  { %1814 = vmatpush1.bf16.msra.mxu0 %v5174_v29  ;;  %v5195_v29 = vld [vmem:[%s6602_s1 + $0x90] sm:$0xff]  }
0x1135   :  { %4962 = vmatprep.subr.bf16.mxu0 %v5371_v3 }
0x11fa   :  { %v1669_v49 = vpop.f32.mrb[28].mxu0 }
0x11fb   :  { %v1670_v50 = vadd.f32 %v4226_v48, %v1669_v49  ;;  %v4960_v51 = vpop.f32.mrb[29].mxu0  ;;  %v4236_v49 = vld [vmem:[%s6603_s7 + $0x1d] ss:$0 sm:$0xff] }
0x11fc   :  { %v1672_v52 = vpop.f32.mrb[30].mxu0 }
0x11fd   :  { %v4961_v53 = vpop.f32.mrb[31].mxu0  ;;  %v1675_v54 = vadd.f32 %v1670_v50, %v1592_v46 }
0x11fe   :  { %v5189_v53 = vld [vmem:[%s6605_s3 + $0x1f0] sm:$0xff]  }
0x11ff   :  { %v1678_v55 = vsel %vm158_vm2, %v1675_v54, 0.0  ;;  %4768 = vmatprep.subr.bf16.mxu1 %v5189_v53 }
0x1200   :  { %1679 = vadd.xlane.f32.xlu0 %v1678_v55  ;;  %v5191_v55 = vld [vmem:[%s6605_s3 + $0x1f8] sm:$0xff]  }
0x128d   :  { %v1680_v56 = vpop.xlane.xlu0 %1679 }
0x128e   :  { %v1681_v57 = vmul.f32 0.015625, %v1680_v56  ;;  %v5192_v56 = vld [vmem:[%s6605_s3 + $0x1b8] sm:$0xff]  }
0x1290   :  { %v1682_v58 = vsub.f32 %v1675_v54, %v1681_v57  ;;  %v5190_v54 = vld [vmem:[%s6605_s3 + $0x1b0] sm:$0xff]   ;;  %v4245_v57 = vld [vmem:[%s6606_s8 + $0x3] ss:$8 sm:$0x3] }
0x1291   :  { %4769 = vmatpush3.bf16.msra.mxu1 %v5190_v54 }
0x1292   :  { %v1683_v59 = vmul.f32 %v1682_v58, %v1682_v58  ;;  %4770 = vmatprep.subr.bf16.mxu1 %v5191_v55 }
0x1294   :  { %v1684_v60 = vsel %vm158_vm2, %v1683_v59, 0.0  ;;  %v1761_v59 = vrot.slane %v4245_v57, %v5564_v5 }
0x1295   :  { %1685 = vadd.xlane.f32.xlu0 %v1684_v60  ;;  %4771 = vmatpush3.bf16.msra.mxu1 %v5192_v56 }
0x12ab   :  { %1712 = vrot.lane.b32.xlu0 %v1710_v62, %s5373_s18 }
0x1322   :  { %v1686_v63 = vpop.xlane.xlu0 %1685 }
0x1323   :  { %v1687_v1 = vmul.f32 0.015625, %v1686_v63 }
0x1325   :  { %v1688_v4 = vadd.f32 1e-05, %v1687_v1 }
0x1326   :  { %v1713_v15 = vpop.permute.xlu0 %1712 }
0x1327   :  { %5337 = vrsqrt.f32 %v1688_v4 }
0x1331   :  { %v5338_v6 = vpop.eup %5337 }
0x1332   :  { %v1690_v8 = vmul.f32 %v5338_v6, %v1682_v58  ;;  %v1757_v58 = vrot.slane %v4245_v57, %v5559_v2 }
0x1334   :  { %v1695_v10 = vmul.f32 %v4232_v7, %v1690_v8 }
0x1336   :  { %v1700_v13 = vadd.f32 %v4233_v9, %v1695_v10 }
0x1338   :  { %v1715_v14 = vadd.f32 %v1713_v15, %v1700_v13  ;;  %v4287_v13 = vld [vmem:[%s6603_s7 + $0x1e] ss:$0 sm:$0xff] }
0x133a   :  { %v1718_v16 = vsel %vm158_vm2, %v1715_v14, 0.0 }
0x133b   :  { %1719 = vadd.xlane.f32.xlu1 %v1718_v16 }
0x13c8   :  { %v1720_v17 = vpop.xlane.xlu1 %1719 }
0x13c9   :  { %v1721_v18 = vmul.f32 0.015625, %v1720_v17 }
0x13cb   :  { %v1722_v20 = vsub.f32 %v1715_v14, %v1721_v18 }
0x13cd   :  { %v1723_v21 = vmul.f32 %v1722_v20, %v1722_v20 }
0x13cf   :  { %v1724_v22 = vsel %vm158_vm2, %v1723_v21, 0.0 }
0x13d0   :  { %1725 = vadd.xlane.f32.xlu0 %v1724_v22 }
0x145d   :  { %v1726_v43 = vpop.xlane.xlu0 %1725 }
0x145e   :  { %v1727_v44 = vmul.f32 0.015625, %v1726_v43 }
0x1460   :  { %v1728_v45 = vadd.f32 1e-05, %v1727_v44 }
0x1462   :  { %5339 = vrsqrt.f32 %v1728_v45 }
0x146c   :  { %v5340_v46 = vpop.eup %5339 }
0x146d   :  { %v1730_v48 = vmul.f32 %v5340_v46, %v1722_v20 }
0x146f   :  { %v1735_v50 = vmul.f32 %v4235_v47, %v1730_v48 }
0x1471   :  { %v1740_v51 = vadd.f32 %v4236_v49, %v1735_v50 }
0x1473   :  { %v1750_v52 = vpack.c.bf16 %v1740_v51, %v1740_v51 }
0x1475   :  { %4254 = vmatmul.mubr.msk.bf16.vlgmr.msra.gmra.mrb[32].mxu0 %vm158_vm2, %v1750_v52 }
0x1476   :  { %4970 = vmatprep.mubr.msk.bf16.mxu0 %vm5370_vm0, %v5371_v3  ;;  %4963 = vmatpush3.bf16.msra.mxu0 %v5193_v27  ;;  %v5213_v27 = vld [vmem:[%s6605_s3 + $0x250] sm:$0xff]  }
0x1477   :  { %4964 = vmatprep.subr.bf16.mxu0 %v5371_v3 }
0x147a   :  { %4965 = vmatpush3.bf16.msra.mxu0 %v5194_v28  ;;  %v5214_v28 = vld [vmem:[%s6605_s3 + $0x210] sm:$0xff]  }
0x147b   :  { %4966 = vmatprep.subr.bf16.mxu0 %v5371_v3 }
0x147e   :  { %4967 = vmatpush3.bf16.msra.mxu0 %v5195_v29  ;;  %v5215_v29 = vld [vmem:[%s6605_s3 + $0x258] sm:$0xff]  }
0x147f   :  { %4968 = vmatprep.subr.bf16.mxu0 %v5371_v3 }
0x1482   :  { %4969 = vmatpush3.bf16.msra.mxu0 %v5196_v30  ;;  %v5216_v30 = vld [vmem:[%s6605_s3 + $0x218] sm:$0xff]  }
0x1548   :  { %v1841_v60 = vpop.f32.mrb[32].mxu0 }
0x1549   :  { %v1842_v61 = vadd.f32 %v1841_v60, %v1757_v58  ;;  %v1843_v62 = vpop.f32.mrb[33].mxu0  ;;  %v4320_v58 = vld [vmem:[%s6603_s7 + $0x22] ss:$0 sm:$0xff]  ;;  %v4322_v60 = vld [vmem:[%s6603_s7 + $0x24] ss:$0 sm:$0xff] }
0x154a   :  { %v1844_v63 = vadd.f32 %v1843_v62, %v1761_v59  ;;  %v1845_v1 = vpop.f32.mrb[34].mxu0 }
0x154b   :  { %v1848_v4 = vmax.f32 %v1842_v61, 0.0  ;;  %v1846_v6 = vpop.f32.mrb[35].mxu0  ;;  %v4321_v61 = vld [vmem:[%s6603_s7 + $0x23] ss:$0 sm:$0xff] }
0x154c   :  { %v1849_v7 = vmax.f32 %v1844_v63, 0.0  ;;  %v2165_v63 = vadd.f32 %v4322_v60, %v5788_v11 }
0x154d   :  { %v1883_v9 = vpack.c.bf16 %v1848_v4, %v1848_v4 }
0x154e   :  { %v1884_v8 = vpack.c.bf16 %v1849_v7, %v1849_v7 }
0x1550   :  { %2018 = vmatprep.mubr.bf16.mxu1 %v1884_v8 }
0x1551   :  { %2019 = vmatmul.mubr.bf16.vlgmr.msra.gmra.mrb[20].mxu1 %v1883_v9 }
0x1624   :  { %v4772_v10 = vpop.f32.mrb[20].mxu1 }
0x1625   :  { %v4773_v15 = vpop.f32.mrb[21].mxu1 }
0x1626   :  { %v4774_v14 = vadd.f32 %v4773_v15, %v4772_v10  ;;  %v4775_v16 = vpop.f32.mrb[22].mxu1  ;;  %v5199_v15 = vld [vmem:[%s6604_s2 + $0x104] ss:$8 sps:$4 sm:$0xff]  }
0x1627   :  { %v4776_v17 = vpop.f32.mrb[23].mxu1  ;;  %2258 = vmatprep.subr.bf16.mxu0 %v5199_v15  ;;  %v5202_v16 = vld [vmem:[%s6604_s2 + $0x114] ss:$8 sps:$4 sm:$0xff]  }
0x1628   :  { %v2021_v18 = vadd.f32 %v4774_v14, %v4287_v13  ;;  %v5197_v14 = vld [vmem:[%s6604_s2 + $0x100] ss:$8 sps:$4 sm:$0xff]   ;;  %v5200_v17 = vld [vmem:[%s6604_s2 + $0x110] ss:$8 sps:$4 sm:$0xff]  }
0x162a   :  { %v2026_v20 = vadd.f32 %v2021_v18, %v1740_v51  ;;  %v5205_v18 = vld [vmem:[%s6604_s2 + $0x124] ss:$8 sps:$4 sm:$0xff]  }
0x162c   :  { %v2029_v21 = vsel %vm158_vm2, %v2026_v20, 0.0 }
0x162d   :  { %2030 = vadd.xlane.f32.xlu1 %v2029_v21  ;;  %v5206_v21 = vld [vmem:[%s6604_s2 + $0x130] ss:$8 sps:$4 sm:$0xff]  }
0x16ba   :  { %v2031_v22 = vpop.xlane.xlu1 %2030 }
0x16bb   :  { %v2032_v23 = vmul.f32 0.015625, %v2031_v22  ;;  %v5208_v22 = vld [vmem:[%s6604_s2 + $0x134] ss:$8 sps:$4 sm:$0xff]  }
0x16bd   :  { %v2033_v24 = vsub.f32 %v2026_v20, %v2032_v23  ;;  %v5203_v20 = vld [vmem:[%s6604_s2 + $0x120] ss:$8 sps:$4 sm:$0xff]  }
0x16be   :  { %v5209_v23 = vld [vmem:[%s6605_s3 + $0x240] sm:$0xff]  }
0x16bf   :  { %v2034_v25 = vmul.f32 %v2033_v24, %v2033_v24  ;;  %4783 = vmatprep.subr.bf16.mxu1 %v5209_v23  ;;  %v5228_v23 = vld [vmem:[%s6602_s1 + $0xb8] sm:$0xff]  }
0x16c1   :  { %v2035_v26 = vsel %vm158_vm2, %v2034_v25, 0.0  ;;  %v5211_v25 = vld [vmem:[%s6605_s3 + $0x248] sm:$0xff]  }
0x16c2   :  { %2036 = vadd.xlane.f32.xlu1 %v2035_v26  ;;  %v5212_v26 = vld [vmem:[%s6605_s3 + $0x208] sm:$0xff]  }
0x174f   :  { %v2037_v31 = vpop.xlane.xlu1 %2036 }
0x1750   :  { %v2038_v32 = vmul.f32 0.015625, %v2037_v31  ;;  %v5217_v31 = vld [vmem:[%s6605_s3 + $0x260] sm:$0xff]  }
0x1752   :  { %v2039_v33 = vadd.f32 1e-05, %v2038_v32  ;;  %v5218_v32 = vld [vmem:[%s6605_s3 + $0x220] sm:$0xff]  }
0x1754   :  { %5341 = vrsqrt.f32 %v2039_v33  ;;  %v5219_v33 = vld [vmem:[%s6605_s3 + $0x268] sm:$0xff]  }
0x175e   :  { %v5342_v34 = vpop.eup %5341 }
0x175f   :  { %v2041_v37 = vmul.f32 %v5342_v34, %v2033_v24  ;;  %v5210_v24 = vld [vmem:[%s6605_s3 + $0x200] sm:$0xff]   ;;  %v5220_v34 = vld [vmem:[%s6605_s3 + $0x228] sm:$0xff]  }
0x1760   :  { %4784 = vmatpush3.bf16.msra.mxu1 %v5210_v24 }
0x1761   :  { %v2046_v39 = vmul.f32 %v4304_v35, %v2041_v37  ;;  %4785 = vmatprep.subr.bf16.mxu1 %v5211_v25 }
0x1763   :  { %v2051_v12 = vadd.f32 %v4305_v38, %v2046_v39 }
0x1764   :  { %4786 = vmatpush3.bf16.msra.mxu1 %v5212_v26 }
0x1765   :  { %v2061_v40 = vpack.c.bf16 %v2051_v12, %v2051_v12  ;;  %4787 = vmatprep.subr.bf16.mxu1 %v5213_v27 }
0x1767   :  { %4971 = vmatmul.mubr.msk.bf16.vlgmr.msra.gmra.mrb[36].mxu0 %vm158_vm2, %v2061_v40 }
0x1768   :  { %2290 = vmatprep.mubr.bf16.mxu0 %v5372_v36  ;;  %2259 = vmatpush1.bf16.msra.mxu0 %v5197_v14 }
0x1769   :  { %2260 = vmatprep.subr.bf16.mxu0 %v5202_v16  ;;  %4788 = vmatpush3.bf16.msra.mxu1 %v5214_v28  ;;  %v4392_v28 = vld [vmem:[%s6603_s7 + $0x28] ss:$0 sm:$0xff] }
0x176a   :  { %4789 = vmatprep.subr.bf16.mxu1 %v5215_v29 }
0x176c   :  { %2261 = vmatpush1.bf16.msra.mxu0 %v5200_v17 }
0x176d   :  { %2262 = vmatprep.subr.bf16.mxu0 %v5205_v18  ;;  %4790 = vmatpush3.bf16.msra.mxu1 %v5216_v30  ;;  %v4410_v18 = vld [vmem:[%s6603_s7 + $0x2d] ss:$0 sm:$0xff]  ;;  %v4393_v30 = vld [vmem:[%s6603_s7 + $0x29] ss:$0 sm:$0xff] }
0x176e   :  { %4791 = vmatprep.subr.bf16.mxu1 %v5217_v31 }
0x1770   :  { %2263 = vmatpush1.bf16.msra.mxu0 %v5203_v20  ;;  %v5225_v20 = vld [vmem:[%s6602_s1 + $0xa0] sm:$0xff]  }
0x1771   :  { %2264 = vmatprep.subr.bf16.mxu0 %v5208_v22  ;;  %4792 = vmatpush3.bf16.msra.mxu1 %v5218_v32  ;;  %v5227_v22 = vld [vmem:[%s6602_s1 + $0xb0] sm:$0xff]  }
0x1772   :  { %4793 = vmatprep.subr.bf16.mxu1 %v5219_v33 }
0x1774   :  { %2265 = vmatpush1.bf16.msra.mxu0 %v5206_v21  ;;  %v5226_v21 = vld [vmem:[%s6602_s1 + $0xa8] sm:$0xff]  }
0x1775   :  { %4974 = vmatprep.subr.bf16.mxu0 %v5371_v3  ;;  %4794 = vmatpush3.bf16.msra.mxu1 %v5220_v34  ;;  %v4402_v34 = vld [vmem:[%s6603_s7 + $0x2a] ss:$0 sm:$0xff] }
0x183a   :  { %v2128_v42 = vpop.f32.mrb[36].mxu0 }
0x183b   :  { %v2129_v43 = vadd.f32 %v4314_v41, %v2128_v42  ;;  %v4972_v44 = vpop.f32.mrb[37].mxu0  ;;  %v4324_v41 = vld [vmem:[%s6603_s7 + $0x26] ss:$0 sm:$0xff] }
0x183c   :  { %v2131_v45 = vpop.f32.mrb[38].mxu0 }
0x183d   :  { %v4973_v46 = vpop.f32.mrb[39].mxu0  ;;  %v2134_v47 = vadd.f32 %v2129_v43, %v2051_v12  ;;  %v4323_v12 = vld [vmem:[%s6603_s7 + $0x25] ss:$0 sm:$0xff]  ;;  %v5221_v45 = vld [vmem:[%s6605_s3 + $0x270] sm:$0xff]  }
0x183e   :  { %v5222_v46 = vld [vmem:[%s6605_s3 + $0x230] sm:$0xff]   ;;  %4795 = vmatprep.subr.bf16.mxu1 %v5221_v45 }
0x183f   :  { %v2137_v48 = vsel %vm158_vm2, %v2134_v47, 0.0  ;;  %4796 = vmatpush3.bf16.msra.mxu1 %v5222_v46 }
0x1840   :  { %2138 = vadd.xlane.f32.xlu0 %v2137_v48  ;;  %v5224_v48 = vld [vmem:[%s6605_s3 + $0x238] sm:$0xff]  }
0x18cd   :  { %v2139_v49 = vpop.xlane.xlu0 %2138 }
0x18ce   :  { %v2140_v50 = vmul.f32 0.015625, %v2139_v49  ;;  %v4333_v49 = vld [vmem:[%s6606_s8 + $0x4] ss:$8 sm:$0x3] }
0x18d0   :  { %v2141_v51 = vsub.f32 %v2134_v47, %v2140_v50  ;;  %v5223_v47 = vld [vmem:[%s6605_s3 + $0x278] sm:$0xff]   ;;  %v2208_v50 = vrot.slane %v4333_v49, %v5559_v2 }
0x18d1   :  { %4797 = vmatprep.subr.bf16.mxu1 %v5223_v47 }
0x18d2   :  { %v2142_v52 = vmul.f32 %v2141_v51, %v2141_v51  ;;  %4798 = vmatpush3.bf16.msra.mxu1 %v5224_v48 }
0x18d4   :  { %v2143_v53 = vsel %vm158_vm2, %v2142_v52, 0.0 }
0x18d5   :  { %2144 = vadd.xlane.f32.xlu1 %v2143_v53 }
0x1962   :  { %v2145_v54 = vpop.xlane.xlu1 %2144 }
0x1963   :  { %v2146_v55 = vmul.f32 0.015625, %v2145_v54 }
0x1965   :  { %v2147_v56 = vadd.f32 1e-05, %v2146_v55 }
0x1967   :  { %5343 = vrsqrt.f32 %v2147_v56 }
0x1971   :  { %v5344_v57 = vpop.eup %5343 }
0x1972   :  { %v2149_v59 = vmul.f32 %v5344_v57, %v2141_v51  ;;  %v2212_v51 = vrot.slane %v4333_v49, %v5564_v5 }
0x1974   :  { %v2154_v62 = vmul.f32 %v4320_v58, %v2149_v59 }
0x1976   :  { %v2159_v1 = vadd.f32 %v4321_v61, %v2154_v62 }
0x1978   :  { %v2166_v4 = vadd.f32 %v2165_v63, %v2159_v1  ;;  %v4375_v63 = vld [vmem:[%s6603_s7 + $0x27] ss:$0 sm:$0xff] }
0x197a   :  { %v2169_v6 = vsel %vm158_vm2, %v2166_v4, 0.0 }
0x197b   :  { %2170 = vadd.xlane.f32.xlu0 %v2169_v6 }
0x1a08   :  { %v2171_v7 = vpop.xlane.xlu0 %2170 }
0x1a09   :  { %v2172_v8 = vmul.f32 0.015625, %v2171_v7 }
0x1a0b   :  { %v2173_v9 = vsub.f32 %v2166_v4, %v2172_v8 }
0x1a0d   :  { %v2174_v10 = vmul.f32 %v2173_v9, %v2173_v9 }
0x1a0f   :  { %v2175_v13 = vsel %vm158_vm2, %v2174_v10, 0.0 }
0x1a10   :  { %2176 = vadd.xlane.f32.xlu1 %v2175_v13 }
0x1a9d   :  { %v2177_v35 = vpop.xlane.xlu1 %2176 }
0x1a9e   :  { %v2178_v37 = vmul.f32 0.015625, %v2177_v35 }
0x1aa0   :  { %v2179_v38 = vadd.f32 1e-05, %v2178_v37 }
0x1aa2   :  { %5345 = vrsqrt.f32 %v2179_v38 }
0x1aac   :  { %v5346_v39 = vpop.eup %5345 }
0x1aad   :  { %v2181_v40 = vmul.f32 %v5346_v39, %v2173_v9 }
0x1aaf   :  { %v2186_v42 = vmul.f32 %v4323_v12, %v2181_v40 }
0x1ab1   :  { %v2191_v43 = vadd.f32 %v4324_v41, %v2186_v42 }
0x1ab3   :  { %v2201_v44 = vpack.c.bf16 %v2191_v43, %v2191_v43 }
0x1ab5   :  { %4342 = vmatmul.mubr.msk.bf16.vlgmr.msra.gmra.mrb[40].mxu0 %vm158_vm2, %v2201_v44 }
0x1ab6   :  { %4982 = vmatprep.mubr.msk.bf16.mxu0 %vm5370_vm0, %v5371_v3  ;;  %4975 = vmatpush3.bf16.msra.mxu0 %v5225_v20  ;;  %v5245_v20 = vld [vmem:[%s6605_s3 + $0x2d0] sm:$0xff]  }
0x1ab7   :  { %4976 = vmatprep.subr.bf16.mxu0 %v5371_v3 }
0x1aba   :  { %4977 = vmatpush3.bf16.msra.mxu0 %v5226_v21  ;;  %v5246_v21 = vld [vmem:[%s6605_s3 + $0x290] sm:$0xff]  }
0x1abb   :  { %4978 = vmatprep.subr.bf16.mxu0 %v5371_v3 }
0x1abe   :  { %4979 = vmatpush3.bf16.msra.mxu0 %v5227_v22  ;;  %v5247_v22 = vld [vmem:[%s6605_s3 + $0x2d8] sm:$0xff]  }
0x1abf   :  { %4980 = vmatprep.subr.bf16.mxu0 %v5371_v3 }
0x1ac2   :  { %4981 = vmatpush3.bf16.msra.mxu0 %v5228_v23  ;;  %v5248_v23 = vld [vmem:[%s6605_s3 + $0x298] sm:$0xff]  }
0x1b88   :  { %v2292_v52 = vpop.f32.mrb[40].mxu0 }
0x1b89   :  { %v2293_v53 = vadd.f32 %v2292_v52, %v2208_v50  ;;  %v2294_v54 = vpop.f32.mrb[41].mxu0 }
0x1b8a   :  { %v2295_v55 = vadd.f32 %v2294_v54, %v2212_v51  ;;  %v2296_v56 = vpop.f32.mrb[42].mxu0 }
0x1b8b   :  { %v2299_v57 = vmax.f32 %v2293_v53, 0.0  ;;  %v2297_v58 = vpop.f32.mrb[43].mxu0  ;;  %v4408_v53 = vld [vmem:[%s6603_s7 + $0x2b] ss:$0 sm:$0xff] }
0x1b8c   :  { %v2300_v59 = vmax.f32 %v2295_v55, 0.0  ;;  %v4409_v55 = vld [vmem:[%s6603_s7 + $0x2c] ss:$0 sm:$0xff] }
0x1b8d   :  { %v2334_v61 = vpack.c.bf16 %v2299_v57, %v2299_v57 }
0x1b8e   :  { %v2335_v60 = vpack.c.bf16 %v2300_v59, %v2300_v59 }
0x1b90   :  { %2469 = vmatprep.mubr.bf16.mxu1 %v2335_v60 }
0x1b91   :  { %2470 = vmatmul.mubr.bf16.vlgmr.msra.gmra.mrb[24].mxu1 %v2334_v61 }
0x1c64   :  { %v4799_v62 = vpop.f32.mrb[24].mxu1 }
0x1c65   :  { %v4800_v1 = vpop.f32.mrb[25].mxu1 }
0x1c66   :  { %v4801_v4 = vadd.f32 %v4800_v1, %v4799_v62  ;;  %v4802_v6 = vpop.f32.mrb[26].mxu1 }
0x1c67   :  { %v4803_v7 = vpop.f32.mrb[27].mxu1  ;;  %v5229_v6 = vld [vmem:[%s6604_s2 + $0x140] ss:$8 sps:$4 sm:$0xff]  }
0x1c68   :  { %v2472_v8 = vadd.f32 %v4801_v4, %v4375_v63  ;;  %v5231_v4 = vld [vmem:[%s6604_s2 + $0x144] ss:$8 sps:$4 sm:$0xff]   ;;  %v5234_v7 = vld [vmem:[%s6604_s2 + $0x154] ss:$8 sps:$4 sm:$0xff]  }
0x1c69   :  { %2717 = vmatprep.subr.bf16.mxu0 %v5231_v4 }
0x1c6a   :  { %v2477_v9 = vadd.f32 %v2472_v8, %v2191_v43  ;;  %v5232_v8 = vld [vmem:[%s6604_s2 + $0x150] ss:$8 sps:$4 sm:$0xff]  }
0x1c6c   :  { %v2480_v10 = vsel %vm158_vm2, %v2477_v9, 0.0 }
0x1c6d   :  { %2481 = vadd.xlane.f32.xlu0 %v2480_v10  ;;  %v5235_v10 = vld [vmem:[%s6604_s2 + $0x160] ss:$8 sps:$4 sm:$0xff]  }
0x1cfa   :  { %v2482_v13 = vpop.xlane.xlu0 %2481 }
0x1cfb   :  { %v2483_v15 = vmul.f32 0.015625, %v2482_v13  ;;  %v5238_v13 = vld [vmem:[%s6604_s2 + $0x170] ss:$8 sps:$4 sm:$0xff]  }
0x1cfd   :  { %v2484_v14 = vsub.f32 %v2477_v9, %v2483_v15  ;;  %v5237_v9 = vld [vmem:[%s6604_s2 + $0x164] ss:$8 sps:$4 sm:$0xff]   ;;  %v5240_v15 = vld [vmem:[%s6604_s2 + $0x174] ss:$8 sps:$4 sm:$0xff]  }
0x1cff   :  { %v2485_v16 = vmul.f32 %v2484_v14, %v2484_v14 }
0x1d01   :  { %v2486_v17 = vsel %vm158_vm2, %v2485_v16, 0.0  ;;  %v5242_v16 = vld [vmem:[%s6605_s3 + $0x280] sm:$0xff]  }
0x1d02   :  { %2487 = vadd.xlane.f32.xlu1 %v2486_v17  ;;  %v5243_v17 = vld [vmem:[%s6605_s3 + $0x2c8] sm:$0xff]  }
0x1d13   :  { %2617 = vrot.lane.b32.xlu1 %v4410_v18, %s5373_s18  ;;  %v5244_v18 = vld [vmem:[%s6605_s3 + $0x288] sm:$0xff]  }
0x1d8f   :  { %v2488_v24 = vpop.xlane.xlu1 %2487 }
0x1d90   :  { %v2489_v25 = vmul.f32 0.015625, %v2488_v24  ;;  %v5249_v24 = vld [vmem:[%s6605_s3 + $0x2e0] sm:$0xff]  }
0x1d92   :  { %v2490_v26 = vadd.f32 1e-05, %v2489_v25  ;;  %v5250_v25 = vld [vmem:[%s6605_s3 + $0x2a0] sm:$0xff]  }
0x1d93   :  { %v2618_v47 = vpop.permute.xlu1 %2617 }
0x1d94   :  { %5347 = vrsqrt.f32 %v2490_v26  ;;  %v2620_v48 = vadd.f32 %v2618_v47, %v5788_v11  ;;  %v5251_v26 = vld [vmem:[%s6605_s3 + $0x2e8] sm:$0xff]  }
0x1d9e   :  { %v5348_v27 = vpop.eup %5347 }
0x1d9f   :  { %v2492_v29 = vmul.f32 %v5348_v27, %v2484_v14  ;;  %v5241_v14 = vld [vmem:[%s6605_s3 + $0x2c0] sm:$0xff]   ;;  %v5252_v27 = vld [vmem:[%s6605_s3 + $0x2a8] sm:$0xff]  }
0x1da0   :  { %4810 = vmatprep.subr.bf16.mxu1 %v5241_v14 }
0x1da1   :  { %v2497_v31 = vmul.f32 %v4392_v28, %v2492_v29  ;;  %4811 = vmatpush3.bf16.msra.mxu1 %v5242_v16 }
0x1da2   :  { %4812 = vmatprep.subr.bf16.mxu1 %v5243_v17 }
0x1da3   :  { %v2502_v32 = vadd.f32 %v4393_v30, %v2497_v31 }
0x1da5   :  { %v2512_v33 = vpack.c.bf16 %v2502_v32, %v2502_v32  ;;  %4813 = vmatpush3.bf16.msra.mxu1 %v5244_v18  ;;  %v4480_v18 = vld [vmem:[%s6603_s7 + $0x31] ss:$0 sm:$0xff] }
0x1da6   :  { %4814 = vmatprep.subr.bf16.mxu1 %v5245_v20 }
0x1da7   :  { %4983 = vmatmul.mubr.msk.bf16.vlgmr.msra.gmra.mrb[44].mxu0 %vm158_vm2, %v2512_v33 }
0x1da8   :  { %2749 = vmatprep.mubr.bf16.mxu0 %v5372_v36  ;;  %2718 = vmatpush1.bf16.msra.mxu0 %v5229_v6 }
0x1da9   :  { %2719 = vmatprep.subr.bf16.mxu0 %v5234_v7  ;;  %4815 = vmatpush3.bf16.msra.mxu1 %v5246_v21  ;;  %v4481_v21 = vld [vmem:[%s6603_s7 + $0x32] ss:$0 sm:$0xff] }
0x1daa   :  { %4816 = vmatprep.subr.bf16.mxu1 %v5247_v22 }
0x1dac   :  { %2720 = vmatpush1.bf16.msra.mxu0 %v5232_v8  ;;  %v5257_v8 = vld [vmem:[%s6602_s1 + $0xc0] sm:$0xff]  }
0x1dad   :  { %2721 = vmatprep.subr.bf16.mxu0 %v5237_v9  ;;  %4817 = vmatpush3.bf16.msra.mxu1 %v5248_v23  ;;  %v5258_v9 = vld [vmem:[%s6602_s1 + $0xc8] sm:$0xff]  }
0x1dae   :  { %4818 = vmatprep.subr.bf16.mxu1 %v5249_v24 }
0x1db0   :  { %2722 = vmatpush1.bf16.msra.mxu0 %v5235_v10  ;;  %v5259_v10 = vld [vmem:[%s6602_s1 + $0xd0] sm:$0xff]  }
0x1db1   :  { %2723 = vmatprep.subr.bf16.mxu0 %v5240_v15  ;;  %4819 = vmatpush3.bf16.msra.mxu1 %v5250_v25  ;;  %v4490_v25 = vld [vmem:[%s6603_s7 + $0x33] ss:$0 sm:$0xff] }
0x1db2   :  { %4820 = vmatprep.subr.bf16.mxu1 %v5251_v26 }
0x1db4   :  { %2724 = vmatpush1.bf16.msra.mxu0 %v5238_v13  ;;  %v5260_v13 = vld [vmem:[%s6602_s1 + $0xd8] sm:$0xff]  }
0x1db5   :  { %4986 = vmatprep.subr.bf16.mxu0 %v5371_v3  ;;  %4821 = vmatpush3.bf16.msra.mxu1 %v5252_v27 }
0x1e7a   :  { %v2579_v35 = vpop.f32.mrb[44].mxu0 }
0x1e7b   :  { %v2580_v37 = vadd.f32 %v4402_v34, %v2579_v35  ;;  %v4984_v38 = vpop.f32.mrb[45].mxu0  ;;  %v4412_v34 = vld [vmem:[%s6603_s7 + $0x2f] ss:$0 sm:$0xff] }
0x1e7c   :  { %v2582_v39 = vpop.f32.mrb[46].mxu0 }
0x1e7d   :  { %v4985_v12 = vpop.f32.mrb[47].mxu0  ;;  %v2585_v40 = vadd.f32 %v2580_v37, %v2502_v32  ;;  %v4411_v32 = vld [vmem:[%s6603_s7 + $0x2e] ss:$0 sm:$0xff]  ;;  %v5253_v39 = vld [vmem:[%s6605_s3 + $0x2f0] sm:$0xff]  }
0x1e7e   :  { %v5254_v12 = vld [vmem:[%s6605_s3 + $0x2b0] sm:$0xff]   ;;  %4822 = vmatprep.subr.bf16.mxu1 %v5253_v39 }
0x1e7f   :  { %v2588_v41 = vsel %vm158_vm2, %v2585_v40, 0.0  ;;  %4823 = vmatpush3.bf16.msra.mxu1 %v5254_v12 }
0x1e80   :  { %2589 = vadd.xlane.f32.xlu0 %v2588_v41  ;;  %v5256_v41 = vld [vmem:[%s6605_s3 + $0x2b8] sm:$0xff]  }
0x1f0d   :  { %v2590_v42 = vpop.xlane.xlu0 %2589 }
0x1f0e   :  { %v2591_v43 = vmul.f32 0.015625, %v2590_v42  ;;  %v4421_v42 = vld [vmem:[%s6606_s8 + $0x5] ss:$8 sm:$0x3] }
0x1f10   :  { %v2592_v44 = vsub.f32 %v2585_v40, %v2591_v43  ;;  %v5255_v40 = vld [vmem:[%s6605_s3 + $0x2f8] sm:$0xff]   ;;  %v2667_v43 = vrot.slane %v4421_v42, %v5559_v2 }
0x1f11   :  { %4824 = vmatprep.subr.bf16.mxu1 %v5255_v40 }
0x1f12   :  { %v2593_v45 = vmul.f32 %v2592_v44, %v2592_v44  ;;  %4825 = vmatpush3.bf16.msra.mxu1 %v5256_v41 }
0x1f14   :  { %v2594_v46 = vsel %vm158_vm2, %v2593_v45, 0.0 }
0x1f15   :  { %2595 = vadd.xlane.f32.xlu0 %v2594_v46 }
0x1f2b   :  { %2622 = vrot.lane.b32.xlu0 %v2620_v48, %s5373_s18 }
0x1fa2   :  { %v2596_v49 = vpop.xlane.xlu0 %2595 }
0x1fa3   :  { %v2597_v50 = vmul.f32 0.015625, %v2596_v49 }
0x1fa5   :  { %v2598_v51 = vadd.f32 1e-05, %v2597_v50 }
0x1fa6   :  { %v2623_v58 = vpop.permute.xlu0 %2622 }
0x1fa7   :  { %5349 = vrsqrt.f32 %v2598_v51 }
0x1fb1   :  { %v5350_v52 = vpop.eup %5349 }
0x1fb2   :  { %v2600_v54 = vmul.f32 %v5350_v52, %v2592_v44  ;;  %v2671_v44 = vrot.slane %v4421_v42, %v5564_v5  ;;  %v4496_v42 = vld [vmem:[%s6603_s7 + $0x34] ss:$0 sm:$0xff] }
0x1fb4   :  { %v2605_v56 = vmul.f32 %v4408_v53, %v2600_v54 }
0x1fb6   :  { %v2610_v57 = vadd.f32 %v4409_v55, %v2605_v56  ;;  %v4463_v56 = vld [vmem:[%s6603_s7 + $0x30] ss:$0 sm:$0xff] }
0x1fb8   :  { %v2625_v11 = vadd.f32 %v2623_v58, %v2610_v57 }
0x1fba   :  { %v2628_v59 = vsel %vm158_vm2, %v2625_v11, 0.0 }
0x1fbb   :  { %2629 = vadd.xlane.f32.xlu1 %v2628_v59 }
0x2048   :  { %v2630_v60 = vpop.xlane.xlu1 %2629 }
0x2049   :  { %v2631_v61 = vmul.f32 0.015625, %v2630_v60 }
0x204b   :  { %v2632_v62 = vsub.f32 %v2625_v11, %v2631_v61 }
0x204d   :  { %v2633_v63 = vmul.f32 %v2632_v62, %v2632_v62 }
0x204f   :  { %v2634_v1 = vsel %vm158_vm2, %v2633_v63, 0.0 }
0x2050   :  { %2635 = vadd.xlane.f32.xlu0 %v2634_v1 }
0x20dd   :  { %v2636_v28 = vpop.xlane.xlu0 %2635 }
0x20de   :  { %v2637_v29 = vmul.f32 0.015625, %v2636_v28 }
0x20e0   :  { %v2638_v30 = vadd.f32 1e-05, %v2637_v29 }
0x20e2   :  { %5351 = vrsqrt.f32 %v2638_v30 }
0x20ec   :  { %v5352_v31 = vpop.eup %5351 }
0x20ed   :  { %v2640_v33 = vmul.f32 %v5352_v31, %v2632_v62 }
0x20ef   :  { %v2645_v35 = vmul.f32 %v4411_v32, %v2640_v33 }
0x20f1   :  { %v2650_v37 = vadd.f32 %v4412_v34, %v2645_v35 }
0x20f3   :  { %v2660_v38 = vpack.c.bf16 %v2650_v37, %v2650_v37 }
0x20f5   :  { %4430 = vmatmul.mubr.msk.bf16.vlgmr.msra.gmra.mrb[48].mxu0 %vm158_vm2, %v2660_v38 }
0x20f6   :  { %4994 = vmatprep.mubr.msk.bf16.mxu0 %vm5370_vm0, %v5371_v3  ;;  %4987 = vmatpush3.bf16.msra.mxu0 %v5257_v8  ;;  %v5278_v8 = vld [vmem:[%s6605_s3 + $0x310] sm:$0xff]  }
0x20f7   :  { %4988 = vmatprep.subr.bf16.mxu0 %v5371_v3 }
0x20fa   :  { %4989 = vmatpush3.bf16.msra.mxu0 %v5258_v9  ;;  %v5279_v9 = vld [vmem:[%s6605_s3 + $0x358] sm:$0xff]  }
0x20fb   :  { %4990 = vmatprep.subr.bf16.mxu0 %v5371_v3 }
0x20fe   :  { %4991 = vmatpush3.bf16.msra.mxu0 %v5259_v10  ;;  %v5280_v10 = vld [vmem:[%s6605_s3 + $0x318] sm:$0xff]  }
0x20ff   :  { %4992 = vmatprep.subr.bf16.mxu0 %v5371_v3 }
0x2102   :  { %4993 = vmatpush3.bf16.msra.mxu0 %v5260_v13  ;;  %v5281_v13 = vld [vmem:[%s6605_s3 + $0x360] sm:$0xff]  }
0x21c8   :  { %v2751_v45 = vpop.f32.mrb[48].mxu0 }
0x21c9   :  { %v2752_v46 = vadd.f32 %v2751_v45, %v2667_v43  ;;  %v2753_v47 = vpop.f32.mrb[49].mxu0  ;;  %v4497_v45 = vld [vmem:[%s6603_s7 + $0x35] ss:$0 sm:$0xff] }
0x21ca   :  { %v2754_v48 = vadd.f32 %v2753_v47, %v2671_v44  ;;  %v2755_v49 = vpop.f32.mrb[50].mxu0  ;;  %v4498_v44 = vld [vmem:[%s6603_s7 + $0x36] ss:$0 sm:$0xff] }
0x21cb   :  { %v2758_v50 = vmax.f32 %v2752_v46, 0.0  ;;  %v2756_v51 = vpop.f32.mrb[51].mxu0  ;;  %v3075_v47 = vadd.f32 %v4498_v44, %v5791_v19 }
0x21cc   :  { %v2759_v52 = vmax.f32 %v2754_v48, 0.0 }
0x21cd   :  { %v2793_v54 = vpack.c.bf16 %v2758_v50, %v2758_v50 }
0x21ce   :  { %v2794_v53 = vpack.c.bf16 %v2759_v52, %v2759_v52 }
0x21d0   :  { %2928 = vmatprep.mubr.bf16.mxu1 %v2794_v53 }
0x21d1   :  { %2929 = vmatmul.mubr.bf16.vlgmr.msra.gmra.mrb[28].mxu1 %v2793_v54 }
0x22a4   :  { %v4826_v55 = vpop.f32.mrb[28].mxu1 }
0x22a5   :  { %v4827_v57 = vpop.f32.mrb[29].mxu1 }
0x22a6   :  { %v4828_v58 = vadd.f32 %v4827_v57, %v4826_v55  ;;  %v4829_v11 = vpop.f32.mrb[30].mxu1  ;;  %v5261_v57 = vld [vmem:[%s6604_s2 + $0x180] ss:$8 sps:$4 sm:$0xff]  }
0x22a7   :  { %v4830_v59 = vpop.f32.mrb[31].mxu1  ;;  %v5264_v11 = vld [vmem:[%s6604_s2 + $0x190] ss:$8 sps:$4 sm:$0xff]  }
0x22a8   :  { %v2931_v60 = vadd.f32 %v4828_v58, %v4463_v56  ;;  %v5263_v56 = vld [vmem:[%s6604_s2 + $0x184] ss:$8 sps:$4 sm:$0xff]   ;;  %v5266_v58 = vld [vmem:[%s6604_s2 + $0x194] ss:$8 sps:$4 sm:$0xff]  }
0x22a9   :  { %3168 = vmatprep.subr.bf16.mxu0 %v5263_v56  ;;  %v5269_v59 = vld [vmem:[%s6604_s2 + $0x1a4] ss:$8 sps:$4 sm:$0xff]  }
0x22aa   :  { %v2936_v61 = vadd.f32 %v2931_v60, %v2650_v37  ;;  %v5267_v60 = vld [vmem:[%s6604_s2 + $0x1a0] ss:$8 sps:$4 sm:$0xff]  }
0x22ac   :  { %v2939_v62 = vsel %vm158_vm2, %v2936_v61, 0.0 }
0x22ad   :  { %2940 = vadd.xlane.f32.xlu1 %v2939_v62  ;;  %v5272_v62 = vld [vmem:[%s6604_s2 + $0x1b4] ss:$8 sps:$4 sm:$0xff]  }
0x233a   :  { %v2941_v63 = vpop.xlane.xlu1 %2940 }
0x233b   :  { %v2942_v1 = vmul.f32 0.015625, %v2941_v63  ;;  %v5273_v63 = vld [vmem:[%s6605_s3 + $0x340] sm:$0xff]  }
0x233c   :  { %4837 = vmatprep.subr.bf16.mxu1 %v5273_v63 }
0x233d   :  { %v2943_v4 = vsub.f32 %v2936_v61, %v2942_v1  ;;  %v5270_v61 = vld [vmem:[%s6604_s2 + $0x1b0] ss:$8 sps:$4 sm:$0xff]   ;;  %v5274_v1 = vld [vmem:[%s6605_s3 + $0x300] sm:$0xff]  }
0x233e   :  { %4838 = vmatpush3.bf16.msra.mxu1 %v5274_v1 }
0x233f   :  { %v2944_v6 = vmul.f32 %v2943_v4, %v2943_v4 }
0x2341   :  { %v2945_v7 = vsel %vm158_vm2, %v2944_v6, 0.0  ;;  %v5276_v6 = vld [vmem:[%s6605_s3 + $0x308] sm:$0xff]  }
0x2342   :  { %2946 = vadd.xlane.f32.xlu1 %v2945_v7  ;;  %v5277_v7 = vld [vmem:[%s6605_s3 + $0x350] sm:$0xff]  }
0x23cf   :  { %v2947_v15 = vpop.xlane.xlu1 %2946 }
0x23d0   :  { %v2948_v14 = vmul.f32 0.015625, %v2947_v15  ;;  %v5282_v15 = vld [vmem:[%s6605_s3 + $0x320] sm:$0xff]  }
0x23d2   :  { %v2949_v16 = vadd.f32 1e-05, %v2948_v14  ;;  %v5283_v14 = vld [vmem:[%s6605_s3 + $0x368] sm:$0xff]  }
0x23d4   :  { %5353 = vrsqrt.f32 %v2949_v16  ;;  %v5284_v16 = vld [vmem:[%s6605_s3 + $0x328] sm:$0xff]  }
0x23de   :  { %v5354_v17 = vpop.eup %5353 }
0x23df   :  { %v2951_v20 = vmul.f32 %v5354_v17, %v2943_v4  ;;  %v5275_v4 = vld [vmem:[%s6605_s3 + $0x348] sm:$0xff]  }
0x23e0   :  { %4839 = vmatprep.subr.bf16.mxu1 %v5275_v4 }
0x23e1   :  { %v2956_v22 = vmul.f32 %v4480_v18, %v2951_v20  ;;  %4840 = vmatpush3.bf16.msra.mxu1 %v5276_v6 }
0x23e2   :  { %4841 = vmatprep.subr.bf16.mxu1 %v5277_v7  ;;  %v4568_v7 = vld [vmem:[%s6603_s7 + $0x3a] ss:$0 sm:$0xff] }
0x23e3   :  { %v2961_v23 = vadd.f32 %v4481_v21, %v2956_v22  ;;  %v4499_v22 = vld [vmem:[%s6603_s7 + $0x37] ss:$0 sm:$0xff] }
0x23e5   :  { %v2971_v24 = vpack.c.bf16 %v2961_v23, %v2961_v23  ;;  %4842 = vmatpush3.bf16.msra.mxu1 %v5278_v8 }
0x23e6   :  { %4843 = vmatprep.subr.bf16.mxu1 %v5279_v9  ;;  %v4569_v9 = vld [vmem:[%s6603_s7 + $0x3b] ss:$0 sm:$0xff] }
0x23e7   :  { %4995 = vmatmul.mubr.msk.bf16.vlgmr.msra.gmra.mrb[52].mxu0 %vm158_vm2, %v2971_v24  ;;  %v4500_v24 = vld [vmem:[%s6603_s7 + $0x38] ss:$0 sm:$0xff] }
0x23e8   :  { %3200 = vmatprep.mubr.bf16.mxu0 %v5372_v36  ;;  %3169 = vmatpush1.bf16.msra.mxu0 %v5261_v57 }
0x23e9   :  { %3170 = vmatprep.subr.bf16.mxu0 %v5266_v58  ;;  %4844 = vmatpush3.bf16.msra.mxu1 %v5280_v10 }
0x23ea   :  { %4845 = vmatprep.subr.bf16.mxu1 %v5281_v13 }
0x23ec   :  { %3171 = vmatpush1.bf16.msra.mxu0 %v5264_v11  ;;  %v4586_v11 = vld [vmem:[%s6603_s7 + $0x3f] ss:$0 sm:$0xff] }
0x23ed   :  { %3172 = vmatprep.subr.bf16.mxu0 %v5269_v59  ;;  %4846 = vmatpush3.bf16.msra.mxu1 %v5282_v15  ;;  %v5289_v59 = vld [vmem:[%s6602_s1 + $0xe0] sm:$0xff]  }
0x23ee   :  { %4847 = vmatprep.subr.bf16.mxu1 %v5283_v14  ;;  %v4578_v14 = vld [vmem:[%s6603_s7 + $0x3c] ss:$0 sm:$0xff] }
0x23f0   :  { %3173 = vmatpush1.bf16.msra.mxu0 %v5267_v60  ;;  %v5290_v60 = vld [vmem:[%s6602_s1 + $0xe8] sm:$0xff]  }
0x23f1   :  { %3174 = vmatprep.subr.bf16.mxu0 %v5272_v62  ;;  %4848 = vmatpush3.bf16.msra.mxu1 %v5284_v16  ;;  %v5292_v62 = vld [vmem:[%s6602_s1 + $0xf8] sm:$0xff]  }
0x23f4   :  { %3175 = vmatpush1.bf16.msra.mxu0 %v5270_v61  ;;  %v5291_v61 = vld [vmem:[%s6602_s1 + $0xf0] sm:$0xff]  }
0x23f5   :  { %4998 = vmatprep.subr.bf16.mxu0 %v5371_v3 }
0x24ba   :  { %v3038_v26 = vpop.f32.mrb[52].mxu0 }
0x24bb   :  { %v3039_v27 = vadd.f32 %v4490_v25, %v3038_v26  ;;  %v4996_v28 = vpop.f32.mrb[53].mxu0 }
0x24bc   :  { %v3041_v29 = vpop.f32.mrb[54].mxu0  ;;  %v5285_v28 = vld [vmem:[%s6605_s3 + $0x370] sm:$0xff]  }
0x24bd   :  { %v4997_v30 = vpop.f32.mrb[55].mxu0  ;;  %v3044_v31 = vadd.f32 %v3039_v27, %v2961_v23  ;;  %v5286_v29 = vld [vmem:[%s6605_s3 + $0x330] sm:$0xff]   ;;  %4849 = vmatprep.subr.bf16.mxu1 %v5285_v28 }
0x24be   :  { %4850 = vmatpush3.bf16.msra.mxu1 %v5286_v29  ;;  %v5287_v30 = vld [vmem:[%s6605_s3 + $0x378] sm:$0xff]  }
0x24bf   :  { %v3047_v32 = vsel %vm158_vm2, %v3044_v31, 0.0  ;;  %4851 = vmatprep.subr.bf16.mxu1 %v5287_v30 }
0x24c0   :  { %3048 = vadd.xlane.f32.xlu0 %v3047_v32  ;;  %v4509_v32 = vld [vmem:[%s6606_s8 + $0x6] ss:$8 sm:$0x3] }
0x254d   :  { %v3049_v33 = vpop.xlane.xlu0 %3048 }
0x254e   :  { %v3050_v34 = vmul.f32 0.015625, %v3049_v33  ;;  %v3118_v33 = vrot.slane %v4509_v32, %v5559_v2 }
0x2550   :  { %v3051_v35 = vsub.f32 %v3044_v31, %v3050_v34  ;;  %v5288_v31 = vld [vmem:[%s6605_s3 + $0x338] sm:$0xff]   ;;  %v3122_v34 = vrot.slane %v4509_v32, %v5564_v5 }
0x2551   :  { %4852 = vmatpush3.bf16.msra.mxu1 %v5288_v31 }
0x2552   :  { %v3052_v37 = vmul.f32 %v3051_v35, %v3051_v35 }
0x2554   :  { %v3053_v38 = vsel %vm158_vm2, %v3052_v37, 0.0 }
0x2555   :  { %3054 = vadd.xlane.f32.xlu1 %v3053_v38 }
0x25e2   :  { %v3055_v39 = vpop.xlane.xlu1 %3054 }
0x25e3   :  { %v3056_v12 = vmul.f32 0.015625, %v3055_v39 }
0x25e5   :  { %v3057_v40 = vadd.f32 1e-05, %v3056_v12 }
0x25e7   :  { %5355 = vrsqrt.f32 %v3057_v40 }
0x25f1   :  { %v5356_v41 = vpop.eup %5355 }
0x25f2   :  { %v3059_v43 = vmul.f32 %v5356_v41, %v3051_v35 }
0x25f4   :  { %v3064_v46 = vmul.f32 %v4496_v42, %v3059_v43 }
0x25f6   :  { %v3069_v48 = vadd.f32 %v4497_v45, %v3064_v46  ;;  %v4551_v46 = vld [vmem:[%s6603_s7 + $0x39] ss:$0 sm:$0xff] }
0x25f8   :  { %v3076_v49 = vadd.f32 %v3075_v47, %v3069_v48 }
0x25fa   :  { %v3079_v50 = vsel %vm158_vm2, %v3076_v49, 0.0 }
0x25fb   :  { %3080 = vadd.xlane.f32.xlu0 %v3079_v50 }
0x2688   :  { %v3081_v51 = vpop.xlane.xlu0 %3080 }
0x2689   :  { %v3082_v52 = vmul.f32 0.015625, %v3081_v51 }
0x268b   :  { %v3083_v53 = vsub.f32 %v3076_v49, %v3082_v52 }
0x268d   :  { %v3084_v54 = vmul.f32 %v3083_v53, %v3083_v53 }
0x268f   :  { %v3085_v55 = vsel %vm158_vm2, %v3084_v54, 0.0 }
0x2690   :  { %3086 = vadd.xlane.f32.xlu1 %v3085_v55 }
0x271d   :  { %v3087_v17 = vpop.xlane.xlu1 %3086 }
0x271e   :  { %v3088_v18 = vmul.f32 0.015625, %v3087_v17 }
0x2720   :  { %v3089_v20 = vadd.f32 1e-05, %v3088_v18 }
0x2722   :  { %5357 = vrsqrt.f32 %v3089_v20 }
0x272c   :  { %v5358_v21 = vpop.eup %5357 }
0x272d   :  { %v3091_v23 = vmul.f32 %v5358_v21, %v3083_v53 }
0x272f   :  { %v3096_v25 = vmul.f32 %v4499_v22, %v3091_v23 }
0x2731   :  { %v3101_v26 = vadd.f32 %v4500_v24, %v3096_v25 }
0x2733   :  { %v3111_v27 = vpack.c.bf16 %v3101_v26, %v3101_v26 }
0x2735   :  { %4518 = vmatmul.mubr.msk.bf16.vlgmr.msra.gmra.mrb[56].mxu0 %vm158_vm2, %v3111_v27 }
0x2736   :  { %5006 = vmatprep.mubr.msk.bf16.mxu0 %vm5370_vm0, %v5371_v3  ;;  %4999 = vmatpush3.bf16.msra.mxu0 %v5289_v59  ;;  %v5311_v59 = vld [vmem:[%s6605_s3 + $0x3d8] sm:$0xff]  }
0x2737   :  { %5000 = vmatprep.subr.bf16.mxu0 %v5371_v3 }
0x273a   :  { %5001 = vmatpush3.bf16.msra.mxu0 %v5290_v60  ;;  %v5312_v60 = vld [vmem:[%s6605_s3 + $0x398] sm:$0xff]  }
0x273b   :  { %5002 = vmatprep.subr.bf16.mxu0 %v5371_v3 }
0x273e   :  { %5003 = vmatpush3.bf16.msra.mxu0 %v5291_v61  ;;  %v5313_v61 = vld [vmem:[%s6605_s3 + $0x3e0] sm:$0xff]  }
0x273f   :  { %5004 = vmatprep.subr.bf16.mxu0 %v5371_v3 }
0x2742   :  { %5005 = vmatpush3.bf16.msra.mxu0 %v5292_v62  ;;  %v5314_v62 = vld [vmem:[%s6605_s3 + $0x3a0] sm:$0xff]  }
0x2808   :  { %v3202_v35 = vpop.f32.mrb[56].mxu0 }
0x2809   :  { %v3203_v37 = vadd.f32 %v3202_v35, %v3118_v33  ;;  %v3204_v38 = vpop.f32.mrb[57].mxu0 }
0x280a   :  { %v3205_v39 = vadd.f32 %v3204_v38, %v3122_v34  ;;  %v3206_v12 = vpop.f32.mrb[58].mxu0  ;;  %v4584_v34 = vld [vmem:[%s6603_s7 + $0x3d] ss:$0 sm:$0xff] }
0x280b   :  { %v3209_v40 = vmax.f32 %v3203_v37, 0.0  ;;  %v3207_v41 = vpop.f32.mrb[59].mxu0  ;;  %v4585_v37 = vld [vmem:[%s6603_s7 + $0x3e] ss:$0 sm:$0xff] }
0x280c   :  { %v3210_v42 = vmax.f32 %v3205_v39, 0.0 }
0x280d   :  { %v3244_v44 = vpack.c.bf16 %v3209_v40, %v3209_v40 }
0x280e   :  { %v3245_v43 = vpack.c.bf16 %v3210_v42, %v3210_v42 }
0x2810   :  { %3379 = vmatprep.mubr.bf16.mxu1 %v3245_v43 }
0x2811   :  { %3380 = vmatmul.mubr.bf16.vlgmr.msra.gmra.mrb[32].mxu1 %v3244_v44 }
0x28e4   :  { %v4853_v45 = vpop.f32.mrb[32].mxu1 }
0x28e5   :  { %v4854_v47 = vpop.f32.mrb[33].mxu1 }
0x28e6   :  { %v4855_v48 = vadd.f32 %v4854_v47, %v4853_v45  ;;  %v4856_v49 = vpop.f32.mrb[34].mxu1  ;;  %v5293_v47 = vld [vmem:[%s6604_s2 + $0x1c0] ss:$8 sps:$4 sm:$0xff]  }
0x28e7   :  { %v4857_v50 = vpop.f32.mrb[35].mxu1  ;;  %v5296_v49 = vld [vmem:[%s6604_s2 + $0x1d0] ss:$8 sps:$4 sm:$0xff]  }
0x28e8   :  { %v3382_v51 = vadd.f32 %v4855_v48, %v4551_v46  ;;  %v5295_v46 = vld [vmem:[%s6604_s2 + $0x1c4] ss:$8 sps:$4 sm:$0xff]   ;;  %v5298_v48 = vld [vmem:[%s6604_s2 + $0x1d4] ss:$8 sps:$4 sm:$0xff]  }
0x28e9   :  { %3627 = vmatprep.subr.bf16.mxu0 %v5295_v46  ;;  %v5301_v50 = vld [vmem:[%s6604_s2 + $0x1e4] ss:$8 sps:$4 sm:$0xff]  }
0x28ea   :  { %v3387_v52 = vadd.f32 %v3382_v51, %v3101_v26  ;;  %v5299_v51 = vld [vmem:[%s6604_s2 + $0x1e0] ss:$8 sps:$4 sm:$0xff]  }
0x28ec   :  { %v3390_v53 = vsel %vm158_vm2, %v3387_v52, 0.0 }
0x28ed   :  { %3391 = vadd.xlane.f32.xlu0 %v3390_v53  ;;  %v5304_v53 = vld [vmem:[%s6604_s2 + $0x1f4] ss:$8 sps:$4 sm:$0xff]  }
0x297a   :  { %v3392_v54 = vpop.xlane.xlu0 %3391 }
0x297b   :  { %v3393_v55 = vmul.f32 0.015625, %v3392_v54  ;;  %v5305_v54 = vld [vmem:[%s6605_s3 + $0x3c0] sm:$0xff]  }
0x297c   :  { %4864 = vmatprep.subr.bf16.mxu1 %v5305_v54 }
0x297d   :  { %v3394_v56 = vsub.f32 %v3387_v52, %v3393_v55  ;;  %v5302_v52 = vld [vmem:[%s6604_s2 + $0x1f0] ss:$8 sps:$4 sm:$0xff]   ;;  %v5306_v55 = vld [vmem:[%s6605_s3 + $0x380] sm:$0xff]  }
0x297e   :  { %4865 = vmatpush3.bf16.msra.mxu1 %v5306_v55 }
0x297f   :  { %v3395_v57 = vmul.f32 %v3394_v56, %v3394_v56 }
0x2981   :  { %v3396_v58 = vsel %vm158_vm2, %v3395_v57, 0.0  ;;  %v5308_v57 = vld [vmem:[%s6605_s3 + $0x388] sm:$0xff]  }
0x2982   :  { %3397 = vadd.xlane.f32.xlu1 %v3396_v58  ;;  %v5309_v58 = vld [vmem:[%s6605_s3 + $0x3d0] sm:$0xff]  }
0x2993   :  { %3527 = vrot.lane.b32.xlu1 %v4586_v11, %s5373_s18  ;;  %v5310_v11 = vld [vmem:[%s6605_s3 + $0x390] sm:$0xff]  }
0x2a0f   :  { %v3398_v63 = vpop.xlane.xlu1 %3397 }
0x2a10   :  { %v3399_v1 = vmul.f32 0.015625, %v3398_v63  ;;  %v5315_v63 = vld [vmem:[%s6605_s3 + $0x3e8] sm:$0xff]  }
0x2a12   :  { %v3400_v4 = vadd.f32 1e-05, %v3399_v1  ;;  %v5316_v1 = vld [vmem:[%s6605_s3 + $0x3a8] sm:$0xff]  }
0x2a14   :  { %5359 = vrsqrt.f32 %v3400_v4 }
0x2a1e   :  { %v5360_v6 = vpop.eup %5359 }
0x2a1f   :  { %v3402_v8 = vmul.f32 %v5360_v6, %v3394_v56  ;;  %v5307_v56 = vld [vmem:[%s6605_s3 + $0x3c8] sm:$0xff]  }
0x2a20   :  { %4866 = vmatprep.subr.bf16.mxu1 %v5307_v56 }
0x2a21   :  { %v3407_v10 = vmul.f32 %v4568_v7, %v3402_v8  ;;  %4867 = vmatpush3.bf16.msra.mxu1 %v5308_v57 }
0x2a22   :  { %4868 = vmatprep.subr.bf16.mxu1 %v5309_v58 }
0x2a23   :  { %v3412_v13 = vadd.f32 %v4569_v9, %v3407_v10  ;;  %v4587_v9 = vld [vmem:[%s6603_s7 + $0x40] ss:$0 sm:$0xff] }
0x2a25   :  { %v3422_v15 = vpack.c.bf16 %v3412_v13, %v3412_v13  ;;  %4869 = vmatpush3.bf16.msra.mxu1 %v5310_v11  ;;  %v3897_v11 = vld [vmem:[%s6608_s6] sm:$0xff] }
0x2a26   :  { %4870 = vmatprep.subr.bf16.mxu1 %v5311_v59  ;;  %v3898_v59 = vld [vmem:[%s6608_s6 + $0x8] sm:$0xff] }
0x2a27   :  { %5007 = vmatmul.mubr.msk.bf16.vlgmr.msra.gmra.mrb[60].mxu0 %vm158_vm2, %v3422_v15 }
0x2a28   :  { %3659 = vmatprep.mubr.bf16.mxu0 %v5372_v36  ;;  %v3528_v36 = vpop.permute.xlu1 %3527  ;;  %3628 = vmatpush1.bf16.msra.mxu0 %v5293_v47 }
0x2a29   :  { %v3530_v29 = vadd.f32 %v3528_v36, %v5791_v19  ;;  %3629 = vmatprep.subr.bf16.mxu0 %v5298_v48  ;;  %4871 = vmatpush3.bf16.msra.mxu1 %v5312_v60  ;;  %v4656_v48 = vld [vmem:[%s6603_s7 + $0x43] ss:$0 sm:$0xff]  ;;  %v5033_v60 = vpack.c.bf16 %v3898_v59, %v3897_v11 }
0x2a2a   :  { %4872 = vmatprep.subr.bf16.mxu1 %v5313_v61  ;;  %v3899_v61 = vld [vmem:[%s6608_s6 + $0x10] sm:$0xff] }
0x2a2c   :  { %3630 = vmatpush1.bf16.msra.mxu0 %v5296_v49 }
0x2a2d   :  { %3631 = vmatprep.subr.bf16.mxu0 %v5301_v50  ;;  %4873 = vmatpush3.bf16.msra.mxu1 %v5314_v62  ;;  %v4657_v50 = vld [vmem:[%s6603_s7 + $0x44] ss:$0 sm:$0xff]  ;;  %v3900_v62 = vld [vmem:[%s6608_s6 + $0x18] sm:$0xff] }
0x2a2e   :  { %4874 = vmatprep.subr.bf16.mxu1 %v5315_v63  ;;  %v5036_v63 = vpack.c.bf16 %v3900_v62, %v3899_v61 }
0x2a30   :  { %3632 = vmatpush1.bf16.msra.mxu0 %v5299_v51 }
0x2a31   :  { %3633 = vmatprep.subr.bf16.mxu0 %v5304_v53  ;;  %4875 = vmatpush3.bf16.msra.mxu1 %v5316_v1  ;;  %v3901_v1 = vld [vmem:[%s6608_s6 + $0x20] sm:$0xff] }
0x2a34   :  { %3634 = vmatpush1.bf16.msra.mxu0 %v5302_v52 }
0x2a35   :  { %5032 = vmatprep.subr.bf16.mxu0 %v5369_v0 }
0x2afa   :  { %v3489_v16 = vpop.f32.mrb[60].mxu0 }
0x2afb   :  { %v3490_v17 = vadd.f32 %v4578_v14, %v3489_v16  ;;  %v5008_v18 = vpop.f32.mrb[61].mxu0 }
0x2afc   :  { %v3492_v20 = vpop.f32.mrb[62].mxu0  ;;  %v5318_v18 = vld [vmem:[%s6605_s3 + $0x3b0] sm:$0xff]  }
0x2afd   :  { %v5009_v21 = vpop.f32.mrb[63].mxu0  ;;  %v3495_v22 = vadd.f32 %v3490_v17, %v3412_v13  ;;  %v4588_v13 = vld [vmem:[%s6603_s7 + $0x41] ss:$0 sm:$0xff]  ;;  %v5317_v17 = vld [vmem:[%s6605_s3 + $0x3f0] sm:$0xff]   ;;  %v5319_v20 = vld [vmem:[%s6605_s3 + $0x3f8] sm:$0xff]  }
0x2afe   :  { %4876 = vmatprep.subr.bf16.mxu1 %v5317_v17  ;;  %v5320_v21 = vld [vmem:[%s6605_s3 + $0x3b8] sm:$0xff]  }
0x2aff   :  { %v3498_v23 = vsel %vm158_vm2, %v3495_v22, 0.0  ;;  %4877 = vmatpush3.bf16.msra.mxu1 %v5318_v18  ;;  %v4659_v18 = vld [vmem:[%s6603_s7 + $0x46] ss:$0 sm:$0xff] }
0x2b00   :  { %3499 = vadd.xlane.f32.xlu0 %v3498_v23  ;;  %4878 = vmatprep.subr.bf16.mxu1 %v5319_v20 }
0x2b03   :  { %4879 = vmatpush3.bf16.msra.mxu1 %v5320_v21 }
0x2b8d   :  { %v3500_v24 = vpop.xlane.xlu0 %3499 }
0x2b8e   :  { %v3501_v25 = vmul.f32 0.015625, %v3500_v24 }
0x2b90   :  { %v3502_v26 = vsub.f32 %v3495_v22, %v3501_v25 }
0x2b92   :  { %v3503_v27 = vmul.f32 %v3502_v26, %v3502_v26 }
0x2b94   :  { %v3504_v28 = vsel %vm158_vm2, %v3503_v27, 0.0 }
0x2b95   :  { %3505 = vadd.xlane.f32.xlu0 %v3504_v28 }
0x2bab   :  { %3532 = vrot.lane.b32.xlu0 %v3530_v29, %s5373_s18 }
0x2c22   :  { %v3506_v30 = vpop.xlane.xlu0 %3505 }
0x2c23   :  { %v3507_v31 = vmul.f32 0.015625, %v3506_v30 }
0x2c25   :  { %v3508_v32 = vadd.f32 1e-05, %v3507_v31 }
0x2c26   :  { %v3533_v12 = vpop.permute.xlu0 %3532 }
0x2c27   :  { %5361 = vrsqrt.f32 %v3508_v32 }
0x2c31   :  { %v5362_v33 = vpop.eup %5361 }
0x2c32   :  { %v3510_v35 = vmul.f32 %v5362_v33, %v3502_v26 }
0x2c34   :  { %v3515_v38 = vmul.f32 %v4584_v34, %v3510_v35  ;;  %v4639_v34 = vld [vmem:[%s6603_s7 + $0x42] ss:$0 sm:$0xff] }
0x2c36   :  { %v3520_v39 = vadd.f32 %v4585_v37, %v3515_v38 }
0x2c38   :  { %v3535_v19 = vadd.f32 %v3533_v12, %v3520_v39 }
0x2c3a   :  { %v3538_v40 = vsel %vm158_vm2, %v3535_v19, 0.0 }
0x2c3b   :  { %3539 = vadd.xlane.f32.xlu1 %v3538_v40 }
0x2cc8   :  { %v3540_v41 = vpop.xlane.xlu1 %3539 }
0x2cc9   :  { %v3541_v42 = vmul.f32 0.015625, %v3540_v41 }
0x2ccb   :  { %v3542_v43 = vsub.f32 %v3535_v19, %v3541_v42 }
0x2ccd   :  { %v3543_v44 = vmul.f32 %v3542_v43, %v3542_v43 }
0x2ccf   :  { %v3544_v45 = vsel %vm158_vm2, %v3543_v44, 0.0 }
0x2cd0   :  { %3545 = vadd.xlane.f32.xlu0 %v3544_v45 }
0x2d5d   :  { %v3546_v4 = vpop.xlane.xlu0 %3545 }
0x2d5e   :  { %v3547_v6 = vmul.f32 0.015625, %v3546_v4  ;;  %v3902_v4 = vld [vmem:[%s6608_s6 + $0x28] sm:$0xff] }
0x2d60   :  { %v3548_v7 = vadd.f32 1e-05, %v3547_v6  ;;  %v5039_v6 = vpack.c.bf16 %v3902_v4, %v3901_v1 }
0x2d62   :  { %5363 = vrsqrt.f32 %v3548_v7  ;;  %v3903_v7 = vld [vmem:[%s6608_s6 + $0x30] sm:$0xff] }
0x2d6c   :  { %v5364_v8 = vpop.eup %5363 }
0x2d6d   :  { %v3550_v10 = vmul.f32 %v5364_v8, %v3542_v43  ;;  %v3904_v8 = vld [vmem:[%s6608_s6 + $0x38] sm:$0xff] }
0x2d6f   :  { %v3555_v15 = vmul.f32 %v4587_v9, %v3550_v10  ;;  %v5042_v9 = vpack.c.bf16 %v3904_v8, %v3903_v7  ;;  %v15_v10 = vstv %s6609_s9 }
0x2d70   :  { %16 = vst [vmem:[#allocation2] sm:$0x1] %v15_v10 }
0x2d71   :  { %v3560_v14 = vadd.f32 %v4588_v13, %v3555_v15 }
0x2d73   :  { %v3570_v16 = vpack.c.bf16 %v3560_v14, %v3560_v14 }
0x2d75   :  { %4606 = vmatmul.mubr.msk.bf16.vlgmr.msra.gmra.mrb[64].mxu0 %vm158_vm2, %v3570_v16  ;;  %v4658_v16 = vld [vmem:[%s6603_s7 + $0x45] ss:$0 sm:$0xff] }
0x2d76   :  { %5026 = vmatprep.mubr.msk.f32.mxu0 %vm5370_vm0, %v5371_v3  ;;  %v4597_v3 = vld [vmem:[%s6606_s8 + $0x7] ss:$8 sm:$0x3]  ;;  %5034 = vmatpush3.bf16.msra.mxu0 %v5033_v60 }
0x2d77   :  { %v3577_v22 = vrot.slane %v4597_v3, %v5559_v2  ;;  %v3581_v23 = vrot.slane %v4597_v3, %v5564_v5  ;;  %5035 = vmatprep.subr.bf16.mxu0 %v5369_v0  ;;  %v4660_v3 = vld [vmem:[#allocation2] ss:$0 sm:$0xff] }
0x2d7a   :  { %5037 = vmatpush3.bf16.msra.mxu0 %v5036_v63 }
0x2d7b   :  { %5038 = vmatprep.subr.bf16.mxu0 %v5369_v0 }
0x2d7e   :  { %5040 = vmatpush3.bf16.msra.mxu0 %v5039_v6 }
0x2d7f   :  { %5041 = vmatprep.subr.bf16.mxu0 %v5369_v0 }
0x2d82   :  { %5043 = vmatpush3.bf16.msra.mxu0 %v5042_v9 }
0x2e48   :  { %v3661_v24 = vpop.f32.mrb[64].mxu0 }
0x2e49   :  { %v3662_v25 = vadd.f32 %v3661_v24, %v3577_v22  ;;  %v3663_v26 = vpop.f32.mrb[65].mxu0 }
0x2e4a   :  { %v3664_v27 = vadd.f32 %v3663_v26, %v3581_v23  ;;  %v3665_v28 = vpop.f32.mrb[66].mxu0 }
0x2e4b   :  { %v3668_v36 = vmax.f32 %v3662_v25, 0.0  ;;  %v3666_v29 = vpop.f32.mrb[67].mxu0 }
0x2e4c   :  { %v3669_v30 = vmax.f32 %v3664_v27, 0.0 }
0x2e4d   :  { %v3703_v32 = vpack.c.bf16 %v3668_v36, %v3668_v36 }
0x2e4e   :  { %v3704_v31 = vpack.c.bf16 %v3669_v30, %v3669_v30 }
0x2e50   :  { %3838 = vmatprep.mubr.bf16.mxu1 %v3704_v31 }
0x2e51   :  { %3839 = vmatmul.mubr.bf16.vlgmr.msra.gmra.mrb[36].mxu1 %v3703_v32 }
0x2f24   :  { %v4880_v33 = vpop.f32.mrb[36].mxu1 }
0x2f25   :  { %v4881_v2 = vpop.f32.mrb[37].mxu1 }
0x2f26   :  { %v4882_v35 = vadd.f32 %v4881_v2, %v4880_v33  ;;  %v4883_v5 = vpop.f32.mrb[38].mxu1 }
0x2f27   :  { %v4884_v37 = vpop.f32.mrb[39].mxu1 }
0x2f28   :  { %v3841_v38 = vadd.f32 %v4882_v35, %v4639_v34 }
0x2f2a   :  { %v3846_v39 = vadd.f32 %v3841_v38, %v3560_v14 }
0x2f2c   :  { %v3849_v12 = vsel %vm158_vm2, %v3846_v39, 0.0 }
0x2f2d   :  { %3850 = vadd.xlane.f32.xlu1 %v3849_v12 }
0x2fba   :  { %v3851_v19 = vpop.xlane.xlu1 %3850 }
0x2fbb   :  { %v3852_v40 = vmul.f32 0.015625, %v3851_v19 }
0x2fbd   :  { %v3853_v41 = vsub.f32 %v3846_v39, %v3852_v40 }
0x2fbf   :  { %v3854_v42 = vmul.f32 %v3853_v41, %v3853_v41 }
0x2fc1   :  { %v3855_v43 = vsel %vm158_vm2, %v3854_v42, 0.0 }
0x2fc2   :  { %3856 = vadd.xlane.f32.xlu1 %v3855_v43 }
0x304f   :  { %v3857_v44 = vpop.xlane.xlu1 %3856 }
0x3050   :  { %v3858_v45 = vmul.f32 0.015625, %v3857_v44 }
0x3052   :  { %v3859_v46 = vadd.f32 1e-05, %v3858_v45 }
0x3054   :  { %5365 = vrsqrt.f32 %v3859_v46 }
0x305e   :  { %v5366_v47 = vpop.eup %5365 }
0x305f   :  { %v3861_v49 = vmul.f32 %v5366_v47, %v3853_v41 }
0x3061   :  { %v3866_v51 = vmul.f32 %v4656_v48, %v3861_v49 }
0x3063   :  { %v3871_v52 = vadd.f32 %v4657_v50, %v3866_v51 }
0x3065   :  { %v3874_v53 = vsel %vm158_vm2, %v3871_v52, 0.0 }
0x3066   :  { %3875 = vadd.xlane.f32.xlu0 %v3874_v53 }
0x30f3   :  { %v3876_v54 = vpop.xlane.xlu0 %3875 }
0x30f4   :  { %v3877_v55 = vmul.f32 0.015625, %v3876_v54 }
0x30f6   :  { %v3878_v56 = vsub.f32 %v3871_v52, %v3877_v55 }
0x30f8   :  { %v3879_v57 = vmul.f32 %v3878_v56, %v3878_v56 }
0x30fa   :  { %v3880_v58 = vsel %vm158_vm2, %v3879_v57, 0.0 }
0x30fb   :  { %3881 = vadd.xlane.f32.xlu1 %v3880_v58 }
0x3188   :  { %v3882_v13 = vpop.xlane.xlu1 %3881 }
0x3189   :  { %v3883_v15 = vmul.f32 0.015625, %v3882_v13 }
0x318b   :  { %v3884_v14 = vadd.f32 1e-05, %v3883_v15 }
0x318d   :  { %5367 = vrsqrt.f32 %v3884_v14 }
0x3197   :  { %v5368_v0 = vpop.eup %5367 }
0x3198   :  { %v3886_v17 = vmul.f32 %v5368_v0, %v3878_v56 }
0x319a   :  { %v3891_v20 = vmul.f32 %v4658_v16, %v3886_v17 }
0x319c   :  { %v3896_v21 = vadd.f32 %v4659_v18, %v3891_v20 }
0x319e   :  { %5027 = vmatmul.mubr.msk.f32.vlgmr.msra.gmra.mrb[2].mxu0 %vm158_vm2, %v3896_v21 }
0x3271   :  { %v3981_v22 = vpop.f32.mrb[2].mxu0 }
0x3272   :  { %v3982_v23 = vadd.f32 %v4660_v3, %v3981_v22  ;;  %v5028_v24 = vpop.f32.mrb[3].mxu0 }
0x3274   :  { %3986 = vst.msk [vmem:[%s6610_s10] sm:$0xff] %vm3985_vm3, %v3982_v23 }

</bundles_post_ra>
